<compile_context>
chip_gen: v7x
topology: tpu7x:2x2x1
jax: 0.10.0
libtpu: 0.0.40
codegen_flags: <defaults>
</compile_context>

<pallas_src>
import functools

import jax
import jax.numpy as jnp
from jax import lax
from jax.experimental import pallas as pl
from jax.experimental.pallas import tpu as pltpu

_SQRT_2_OVER_PI = 0.7978845608028654


def _gelu(x):
    # TODO(synk): PyTorch nn.GELU default is erf-based; the tanh approximation
    # is used here (guaranteed Mosaic/EUP lowering, ~1e-3 max deviation).
    inner = _SQRT_2_OVER_PI * (x * (1.0 + 0.044715 * (x * x)))
    return 0.5 * x * (1.0 + jnp.tanh(inner))


def _mlp_from_refs(h, wb_refs, *, final_gelu):
    """MLP over a flat list of (weight, bias) refs.

    Matmuls use bf16 operands (weights are stored bf16) with f32 MXU
    accumulation; bias add + GELU run in f32 (safe on v5e, accurate everywhere).
    """
    n_layers = len(wb_refs) // 2
    for i in range(n_layers):
        w = wb_refs[2 * i][...]                  # bf16 [K, N]
        b = wb_refs[2 * i + 1][...]              # f32  [1, N] (broadcast over rows)
        h = jnp.dot(h.astype(jnp.bfloat16), w, preferred_element_type=jnp.float32)
        h = h + b
        if final_gelu or i < n_layers - 1:
            h = _gelu(h)
    return h


# ---------------------------------------------------------------------------
# Kernel 1 (fallback path only): fused branch MLP in one pallas_call.
# ---------------------------------------------------------------------------
def _fused_mlp_kernel(x_ref, *refs, final_gelu):
    o_ref = refs[-1]
    o_ref[...] = _mlp_from_refs(x_ref[...], refs[:-1], final_gelu=final_gelu)


def fused_mlp(layers, x, *, final_gelu=False):
    """Whole MLP (all linear layers + GELUs) in a single pallas_call."""
    m = x.shape[0]
    n_out = layers[-1][0].shape[1]
    args = [x]
    nbytes = 0
    for w, b in layers:
        args += [w.astype(jnp.bfloat16), b.reshape(1, -1).astype(jnp.float32)]
        nbytes += w.size * 2 + b.size * 4
    # TODO(synk): for very large in_channel*size^2*time_step the first branch
    # layer's weight should be K-tiled with a grid + VMEM accumulator instead
    # of kept whole-array resident in VMEM.
    vmem = int(min(max(4 * nbytes + (8 << 20), 24 << 20), 64 << 20))
    return pl.pallas_call(
        functools.partial(_fused_mlp_kernel, final_gelu=final_gelu),
        out_shape=jax.ShapeDtypeStruct((m, n_out), jnp.float32),
        compiler_params=pltpu.CompilerParams(vmem_limit_bytes=vmem),
    )(*args)


# ---------------------------------------------------------------------------
# Kernel 2: (optional branch MLP) + trunk MLP + DeepONet contraction,
# tiled over num_points rows.
# ---------------------------------------------------------------------------
def _deeponet_kernel(bias_ref, g_ref, x_ref, *refs, out_channel, basis_width,
                     n_trunk_layers, fuse_branch):
    o_ref = refs[-1]
    wb = refs[:-1]
    trunk_wb = wb[:2 * n_trunk_layers]
    branch_wb = wb[2 * n_trunk_layers:]

    # Trunk MLP on this row tile.  The PyTorch forward applies the activation
    # to the trunk *output* as well, so every trunk layer gets GELU.
    basis = _mlp_from_refs(g_ref[...], trunk_wb, final_gelu=True)
    basis16 = basis.astype(jnp.bfloat16)         # [tile_n, oc * W]

    if fuse_branch:
        # Branch MLP recomputed per row tile (~0.6 MFLOP): avoids the second
        # pallas_call dispatch and the xb HBM round-trip.  Branch output has
        # no final activation in the module.
        xb = _mlp_from_refs(x_ref[...], branch_wb, final_gelu=False)
    else:
        xb = x_ref[...]
    xb16 = xb.astype(jnp.bfloat16)               # [B, oc * W]

    for c in range(out_channel):
        lo, hi = c * basis_width, (c + 1) * basis_width
        # out[c, b, n] = sum_i xb[b, c*W + i] * basis[n, c*W + i]
        # A @ B^T orientation (same as flash-attention q @ k^T); the basis
        # slice is consumed directly, no relayout/transpose of the big operand.
        out_c = lax.dot_general(xb16[:, lo:hi], basis16[:, lo:hi],
                                (((1,), (1,)), ((), ())),
                                preferred_element_type=jnp.float32)
        o_ref[c, :, :] = out_c + bias_ref[c]


def _pick_tile_n(n_pts, max_tile=1024):
    """Largest 128-multiple <= max_tile that still gives >= 2 row tiles
    (so v7x's two TensorCores can both get work); floor at 128."""
    n128 = ((max(n_pts, 1) + 127) // 128) * 128
    if n128 <= 128:
        return 128
    return max(min(max_tile, (n128 // 2) // 128 * 128), 128)


def deeponet_contract(trunk_layers, g_flat, xb_or_x, bias_c, *, out_channel,
                      branch_layers=None, tile_n=None, max_tile_n=1024):
    """Fused (branch +) trunk MLP + einsum('bci,nci->bnc') + bias."""
    fuse_branch = branch_layers is not None
    n_pts, qd = g_flat.shape
    batch = xb_or_x.shape[0]
    out_w = trunk_layers[-1][0].shape[1]
    assert out_w % out_channel == 0
    basis_width = out_w // out_channel
    if not fuse_branch:
        assert xb_or_x.shape[1] == out_w

    if tile_n is None:
        tile_n = _pick_tile_n(n_pts, max_tile_n)
    assert tile_n % 128 == 0

    n_pad = pl.cdiv(n_pts, tile_n) * tile_n
    if n_pad != n_pts:
        # TODO(synk): mask the ragged last tile in-kernel instead of padding
        # (the pad is one extra HBM read+write of the grid tensor).
        g_flat = jnp.pad(g_flat, ((0, n_pad - n_pts), (0, 0)))

    def _pack(layers):
        args, specs, nbytes = [], [], 0
        for w, b in layers:              # constant index maps: VMEM-resident
            args += [w.astype(jnp.bfloat16), b.reshape(1, -1).astype(jnp.float32)]
            specs += [pl.BlockSpec(w.shape, lambda n, s: (0, 0)),
                      pl.BlockSpec((1, b.shape[0]), lambda n, s: (0, 0))]
            nbytes += w.size * 2 + b.size * 4
        return args, specs, nbytes

    t_args, t_specs, t_bytes = _pack(trunk_layers)
    if fuse_branch:
        b_args, b_specs, b_bytes = _pack(branch_layers)
    else:
        b_args, b_specs, b_bytes = [], [], 0

    # VMEM budget from the actual per-tile buffers (+2x headroom): resident
    # weights, f32/bf16 activation copies, double-buffered grid & output
    # tiles, xb/x input.  Clamped to [24 MiB, 64 MiB] so it is safe on v7x's
    # 64 MiB physical VMEM as well as v5e/v6e.
    act_bytes = tile_n * out_w * 4 * 3 + tile_n * out_w * 2
    io_bytes = tile_n * qd * 4 * 2 + out_channel * batch * tile_n * 4 * 2
    x_bytes = batch * max(xb_or_x.shape[1], out_w) * 4 * 2
    vmem_bytes = int(min(max(2 * (t_bytes + b_bytes + act_bytes + io_bytes + x_bytes)
                             + (8 << 20), 24 << 20), 64 << 20))

    out_cbn = pl.pallas_call(
        functools.partial(_deeponet_kernel,
                          out_channel=out_channel, basis_width=basis_width,
                          n_trunk_layers=len(trunk_layers),
                          fuse_branch=fuse_branch),
        out_shape=jax.ShapeDtypeStruct((out_channel, batch, n_pad), jnp.float32),
        grid_spec=pltpu.PrefetchScalarGridSpec(
            num_scalar_prefetch=1,                         # per-channel bias -> SMEM
            grid=(n_pad // tile_n,),
            in_specs=[pl.BlockSpec((tile_n, qd), lambda n, s: (n, 0)),
                      pl.BlockSpec(xb_or_x.shape, lambda n, s: (0, 0))]
                     + t_specs + b_specs,
            out_specs=pl.BlockSpec((out_channel, batch, tile_n),
                                   lambda n, s: (0, 0, n)),
        ),
        compiler_params=pltpu.CompilerParams(
            dimension_semantics=("parallel",),             # disjoint output slabs
            vmem_limit_bytes=vmem_bytes),
    )(bias_c, g_flat, xb_or_x, *t_args, *b_args)

    out = jnp.transpose(out_cbn, (1, 2, 0))                # [B, n_pad, oc] (small)
    return out[:, :n_pts, :]


# ---------------------------------------------------------------------------
# Parameters (Glorot-normal weights; biases small-random so bias paths are tested)
# ---------------------------------------------------------------------------
def _glorot_normal(key, fan_in, fan_out):
    std = (2.0 / (fan_in + fan_out)) ** 0.5
    return std * jax.random.normal(key, (fan_in, fan_out), jnp.float32)


def init_mlp(key, in_c, out_c, hidden=(128, 128, 128, 128)):
    sizes = [in_c, *hidden, out_c]
    layers = []
    for i in range(1, len(sizes)):
        key, kw, kb = jax.random.split(key, 3)
        w = _glorot_normal(kw, sizes[i - 1], sizes[i])
        # Module uses zero biases; small random values exercise the bias paths.
        b = 0.1 * jax.random.normal(kb, (sizes[i],), jnp.float32)
        layers.append((w, b))
    return layers, key


def init_deeponet3d(key, size, query_dim, time_step, in_channel_branch=1, out_channel=1):
    in_branch = in_channel_branch * size * size * time_step
    width = 128 * out_channel
    branch, key = init_mlp(key, in_branch, width)
    trunk, key = init_mlp(key, query_dim, width)
    key, kb = jax.random.split(key)
    b = 0.1 * jax.random.normal(kb, (out_channel,), jnp.float32)
    params = {"branch": branch, "trunk": trunk, "b": b}
    cfg = {"query_dim": query_dim, "out_channel": out_channel}
    return params, cfg


# ---------------------------------------------------------------------------
# Forward
# ---------------------------------------------------------------------------
def deeponet3d_forward(params, cfg, x, grid, *, tile_n=None, max_tile_n=1024,
                       fuse_branch_byte_limit=8 << 20):
    batchsize = x.shape[0]
    qd, oc = cfg["query_dim"], cfg["out_channel"]
    g = grid[0].reshape(-1, qd)
    x2d = x.reshape(batchsize, -1)

    branch_bytes = sum(w.size * 2 + b.size * 4 for w, b in params["branch"])
    if branch_bytes <= fuse_branch_byte_limit:
        # Single pallas_call: branch MLP (recomputed per row tile), trunk MLP
        # and the DeepONet contraction all fused; neither the basis tensor nor
        # xb ever touches HBM.
        return deeponet_contract(params["trunk"], g, x2d, params["b"],
                                 out_channel=oc, branch_layers=params["branch"],
                                 tile_n=tile_n, max_tile_n=max_tile_n)
    # Fallback for large branch inputs: separate branch kernel, then the
    # fused trunk + contraction kernel.
    xb = fused_mlp(params["branch"], x2d, final_gelu=False)
    return deeponet_contract(params["trunk"], g, xb, params["b"],
                             out_channel=oc, branch_layers=None,
                             tile_n=tile_n, max_tile_n=max_tile_n)


# ---------------------------------------------------------------------------
# Pure-JAX references (same tanh-GELU).
#   bf16_matmul=True  -> same mixed-precision policy as the kernel (tight check)
#   bf16_matmul=False -> full f32 module semantics (loose sanity check)
# ---------------------------------------------------------------------------
def _ref_forward(params, cfg, x, grid, *, bf16_matmul=False):
    def mm(a, w):
        if bf16_matmul:
            return jnp.dot(a.astype(jnp.bfloat16), w.astype(jnp.bfloat16),
                           preferred_element_type=jnp.float32)
        return a @ w

    def mlp(layers, h, final_gelu):
        for i, (w, b) in enumerate(layers):
            h = mm(h, w) + b
            if final_gelu or i < len(layers) - 1:
                h = _gelu(h)
        return h

    batchsize = x.shape[0]
    qd, oc = cfg["query_dim"], cfg["out_channel"]
    g = grid[0].reshape(-1, qd)
    num_points = g.shape[0]
    xb = mlp(params["branch"], x.reshape(batchsize, -1), final_gelu=False)
    basis = mlp(params["trunk"], g, final_gelu=True)   # activation_trunk(trunk(grid))
    xb = xb.reshape(batchsize, oc, -1)
    basis = basis.reshape(num_points, oc, -1)
    if bf16_matmul:
        out = jnp.einsum("bci,nci->bnc", xb.astype(jnp.bfloat16),
                         basis.astype(jnp.bfloat16),
                         preferred_element_type=jnp.float32)
    else:
        out = jnp.einsum("bci,nci->bnc", xb, basis)
    return out + params["b"]


if __name__ == "__main__":
    # DeepONet3D(size=16, query_dim=3, time_step=2, in_channel_branch=1, out_channel=2)
    size, time_step, query_dim, out_channel = 16, 2, 3, 2
    B = 2

    root = jax.random.PRNGKey(0)
    kp, kx, kg = jax.random.split(root, 3)
    params, cfg = init_deeponet3d(kp, size, query_dim, time_step,
                                  in_channel_branch=1, out_channel=out_channel)
    x = jax.random.normal(kx, (B, 1, time_step, size, size), jnp.float32)         # N,C,T,H,W
    grid = jax.random.uniform(kg, (B, time_step, size, size, query_dim), jnp.float32)

    fwd = jax.jit(lambda xx, gg: deeponet3d_forward(params, cfg, xx, gg))
    out = fwd(x, grid)
    jax.block_until_ready(out)

    num_points = time_step * size * size
    assert out.shape == (B, num_points, out_channel), out.shape

    ref_mixed = _ref_forward(params, cfg, x, grid, bf16_matmul=True)
    ref_f32 = _ref_forward(params, cfg, x, grid, bf16_matmul=False)
    err_mixed = float(jnp.max(jnp.abs(out - ref_mixed)))
    err_f32 = float(jnp.max(jnp.abs(out - ref_f32)))
    # Tight check vs. the same mixed-precision math; looser sanity check vs. f32.
    assert jnp.allclose(out, ref_mixed, atol=1e-2, rtol=1e-2), err_mixed
    assert jnp.allclose(out, ref_f32, atol=5e-2, rtol=5e-2), err_f32
    print("KERNEL_OK")
</pallas_src>

<mosaic_0001>
module attributes {stable_mosaic.version = 11 : i64} {
  func.func @_deeponet_kernel(%arg0: i32, %arg1: memref<2xf32, #tpu.memory_space<smem>>, %arg2: memref<256x3xf32, #tpu.memory_space<vmem>>, %arg3: memref<2x512xf32, #tpu.memory_space<vmem>>, %arg4: memref<3x128xbf16, #tpu.memory_space<vmem>>, %arg5: memref<1x128xf32, #tpu.memory_space<vmem>>, %arg6: memref<128x128xbf16, #tpu.memory_space<vmem>>, %arg7: memref<1x128xf32, #tpu.memory_space<vmem>>, %arg8: memref<128x128xbf16, #tpu.memory_space<vmem>>, %arg9: memref<1x128xf32, #tpu.memory_space<vmem>>, %arg10: memref<128x128xbf16, #tpu.memory_space<vmem>>, %arg11: memref<1x128xf32, #tpu.memory_space<vmem>>, %arg12: memref<128x256xbf16, #tpu.memory_space<vmem>>, %arg13: memref<1x256xf32, #tpu.memory_space<vmem>>, %arg14: memref<512x128xbf16, #tpu.memory_space<vmem>>, %arg15: memref<1x128xf32, #tpu.memory_space<vmem>>, %arg16: memref<128x128xbf16, #tpu.memory_space<vmem>>, %arg17: memref<1x128xf32, #tpu.memory_space<vmem>>, %arg18: memref<128x128xbf16, #tpu.memory_space<vmem>>, %arg19: memref<1x128xf32, #tpu.memory_space<vmem>>, %arg20: memref<128x128xbf16, #tpu.memory_space<vmem>>, %arg21: memref<1x128xf32, #tpu.memory_space<vmem>>, %arg22: memref<128x256xbf16, #tpu.memory_space<vmem>>, %arg23: memref<1x256xf32, #tpu.memory_space<vmem>>, %arg24: memref<2x2x256xf32, #tpu.memory_space<vmem>>) attributes {dimension_semantics = [#tpu.dimension_semantics<parallel>], iteration_bounds = array<i64: 2>, scalar_prefetch = 1 : i64, scratch_operands = 0 : i64, tpu.core_type = #tpu.core_type<tc>, window_params = [{transform_indices = @transform_0, window_bounds = array<i64: 256, 3>}, {pipeline_mode = #tpu.pipeline_mode<synchronous>, transform_indices = @transform_1, window_bounds = array<i64: 2, 512>}, {pipeline_mode = #tpu.pipeline_mode<synchronous>, transform_indices = @transform_2, window_bounds = array<i64: 3, 128>}, {pipeline_mode = #tpu.pipeline_mode<synchronous>, transform_indices = @transform_3, window_bounds = array<i64: 1, 128>}, {pipeline_mode = #tpu.pipeline_mode<synchronous>, transform_indices = @transform_4, window_bounds = array<i64: 128, 128>}, {pipeline_mode = #tpu.pipeline_mode<synchronous>, transform_indices = @transform_5, window_bounds = array<i64: 1, 128>}, {pipeline_mode = #tpu.pipeline_mode<synchronous>, transform_indices = @transform_6, window_bounds = array<i64: 128, 128>}, {pipeline_mode = #tpu.pipeline_mode<synchronous>, transform_indices = @transform_7, window_bounds = array<i64: 1, 128>}, {pipeline_mode = #tpu.pipeline_mode<synchronous>, transform_indices = @transform_8, window_bounds = array<i64: 128, 128>}, {pipeline_mode = #tpu.pipeline_mode<synchronous>, transform_indices = @transform_9, window_bounds = array<i64: 1, 128>}, {pipeline_mode = #tpu.pipeline_mode<synchronous>, transform_indices = @transform_10, window_bounds = array<i64: 128, 256>}, {pipeline_mode = #tpu.pipeline_mode<synchronous>, transform_indices = @transform_11, window_bounds = array<i64: 1, 256>}, {pipeline_mode = #tpu.pipeline_mode<synchronous>, transform_indices = @transform_12, window_bounds = array<i64: 512, 128>}, {pipeline_mode = #tpu.pipeline_mode<synchronous>, transform_indices = @transform_13, window_bounds = array<i64: 1, 128>}, {pipeline_mode = #tpu.pipeline_mode<synchronous>, transform_indices = @transform_14, window_bounds = array<i64: 128, 128>}, {pipeline_mode = #tpu.pipeline_mode<synchronous>, transform_indices = @transform_15, window_bounds = array<i64: 1, 128>}, {pipeline_mode = #tpu.pipeline_mode<synchronous>, transform_indices = @transform_16, window_bounds = array<i64: 128, 128>}, {pipeline_mode = #tpu.pipeline_mode<synchronous>, transform_indices = @transform_17, window_bounds = array<i64: 1, 128>}, {pipeline_mode = #tpu.pipeline_mode<synchronous>, transform_indices = @transform_18, window_bounds = array<i64: 128, 128>}, {pipeline_mode = #tpu.pipeline_mode<synchronous>, transform_indices = @transform_19, window_bounds = array<i64: 1, 128>}, {pipeline_mode = #tpu.pipeline_mode<synchronous>, transform_indices = @transform_20, window_bounds = array<i64: 128, 256>}, {pipeline_mode = #tpu.pipeline_mode<synchronous>, transform_indices = @transform_21, window_bounds = array<i64: 1, 256>}, {transform_indices = @transform_22, window_bounds = array<i64: 2, 2, 256>}]} {
    %c0 = arith.constant 0 : index
    %c0_0 = arith.constant 0 : index
    %0 = vector.load %arg2[%c0, %c0_0] : memref<256x3xf32, #tpu.memory_space<vmem>>, vector<256x3xf32>
    %c0_1 = arith.constant 0 : index
    %c0_2 = arith.constant 0 : index
    %1 = vector.load %arg4[%c0_1, %c0_2] : memref<3x128xbf16, #tpu.memory_space<vmem>>, vector<3x128xbf16>
    %c0_3 = arith.constant 0 : index
    %c0_4 = arith.constant 0 : index
    %2 = vector.load %arg5[%c0_3, %c0_4] : memref<1x128xf32, #tpu.memory_space<vmem>>, vector<1x128xf32>
    %3 = arith.truncf %0 : vector<256x3xf32> to vector<256x3xbf16>
    %cst = arith.constant dense<0.000000e+00> : vector<256x128xf32>
    %4 = tpu.matmul %3, %1, %cst {dimension_numbers = #tpu.dot_dimension_numbers<[1], [0], [0], [1], [0, 0, 1, 1], [], []>} : vector<256x3xbf16>, vector<3x128xbf16>, vector<256x128xf32> -> vector<256x128xf32>
    %5 = vector.broadcast %2 : vector<1x128xf32> to vector<256x128xf32>
    %6 = arith.addf %4, %5 : vector<256x128xf32>
    %7 = arith.mulf %6, %6 : vector<256x128xf32>
    %cst_5 = arith.constant 4.471500e-02 : f32
    %8 = vector.broadcast %cst_5 : f32 to vector<256x128xf32>
    %9 = arith.mulf %8, %7 : vector<256x128xf32>
    %cst_6 = arith.constant 1.000000e+00 : f32
    %10 = vector.broadcast %cst_6 : f32 to vector<256x128xf32>
    %11 = arith.addf %10, %9 : vector<256x128xf32>
    %12 = arith.mulf %6, %11 : vector<256x128xf32>
    %cst_7 = arith.constant 0.797884583 : f32
    %13 = vector.broadcast %cst_7 : f32 to vector<256x128xf32>
    %14 = arith.mulf %13, %12 : vector<256x128xf32>
    %cst_8 = arith.constant 5.000000e-01 : f32
    %15 = vector.broadcast %cst_8 : f32 to vector<256x128xf32>
    %16 = arith.mulf %15, %6 : vector<256x128xf32>
    %17 = math.tanh %14 : vector<256x128xf32>
    %cst_9 = arith.constant 1.000000e+00 : f32
    %18 = vector.broadcast %cst_9 : f32 to vector<256x128xf32>
    %19 = arith.addf %18, %17 : vector<256x128xf32>
    %20 = arith.mulf %16, %19 : vector<256x128xf32>
    %c0_10 = arith.constant 0 : index
    %c0_11 = arith.constant 0 : index
    %21 = vector.load %arg6[%c0_10, %c0_11] : memref<128x128xbf16, #tpu.memory_space<vmem>>, vector<128x128xbf16>
    %c0_12 = arith.constant 0 : index
    %c0_13 = arith.constant 0 : index
    %22 = vector.load %arg7[%c0_12, %c0_13] : memref<1x128xf32, #tpu.memory_space<vmem>>, vector<1x128xf32>
    %23 = arith.truncf %20 : vector<256x128xf32> to vector<256x128xbf16>
    %cst_14 = arith.constant dense<0.000000e+00> : vector<256x128xf32>
    %24 = tpu.matmul %23, %21, %cst_14 {dimension_numbers = #tpu.dot_dimension_numbers<[1], [0], [0], [1], [0, 0, 1, 1], [], []>} : vector<256x128xbf16>, vector<128x128xbf16>, vector<256x128xf32> -> vector<256x128xf32>
    %25 = vector.broadcast %22 : vector<1x128xf32> to vector<256x128xf32>
    %26 = arith.addf %24, %25 : vector<256x128xf32>
    %27 = arith.mulf %26, %26 : vector<256x128xf32>
    %cst_15 = arith.constant 4.471500e-02 : f32
    %28 = vector.broadcast %cst_15 : f32 to vector<256x128xf32>
    %29 = arith.mulf %28, %27 : vector<256x128xf32>
    %cst_16 = arith.constant 1.000000e+00 : f32
    %30 = vector.broadcast %cst_16 : f32 to vector<256x128xf32>
    %31 = arith.addf %30, %29 : vector<256x128xf32>
    %32 = arith.mulf %26, %31 : vector<256x128xf32>
    %cst_17 = arith.constant 0.797884583 : f32
    %33 = vector.broadcast %cst_17 : f32 to vector<256x128xf32>
    %34 = arith.mulf %33, %32 : vector<256x128xf32>
    %cst_18 = arith.constant 5.000000e-01 : f32
    %35 = vector.broadcast %cst_18 : f32 to vector<256x128xf32>
    %36 = arith.mulf %35, %26 : vector<256x128xf32>
    %37 = math.tanh %34 : vector<256x128xf32>
    %cst_19 = arith.constant 1.000000e+00 : f32
    %38 = vector.broadcast %cst_19 : f32 to vector<256x128xf32>
    %39 = arith.addf %38, %37 : vector<256x128xf32>
    %40 = arith.mulf %36, %39 : vector<256x128xf32>
    %c0_20 = arith.constant 0 : index
    %c0_21 = arith.constant 0 : index
    %41 = vector.load %arg8[%c0_20, %c0_21] : memref<128x128xbf16, #tpu.memory_space<vmem>>, vector<128x128xbf16>
    %c0_22 = arith.constant 0 : index
    %c0_23 = arith.constant 0 : index
    %42 = vector.load %arg9[%c0_22, %c0_23] : memref<1x128xf32, #tpu.memory_space<vmem>>, vector<1x128xf32>
    %43 = arith.truncf %40 : vector<256x128xf32> to vector<256x128xbf16>
    %cst_24 = arith.constant dense<0.000000e+00> : vector<256x128xf32>
    %44 = tpu.matmul %43, %41, %cst_24 {dimension_numbers = #tpu.dot_dimension_numbers<[1], [0], [0], [1], [0, 0, 1, 1], [], []>} : vector<256x128xbf16>, vector<128x128xbf16>, vector<256x128xf32> -> vector<256x128xf32>
    %45 = vector.broadcast %42 : vector<1x128xf32> to vector<256x128xf32>
    %46 = arith.addf %44, %45 : vector<256x128xf32>
    %47 = arith.mulf %46, %46 : vector<256x128xf32>
    %cst_25 = arith.constant 4.471500e-02 : f32
    %48 = vector.broadcast %cst_25 : f32 to vector<256x128xf32>
    %49 = arith.mulf %48, %47 : vector<256x128xf32>
    %cst_26 = arith.constant 1.000000e+00 : f32
    %50 = vector.broadcast %cst_26 : f32 to vector<256x128xf32>
    %51 = arith.addf %50, %49 : vector<256x128xf32>
    %52 = arith.mulf %46, %51 : vector<256x128xf32>
    %cst_27 = arith.constant 0.797884583 : f32
    %53 = vector.broadcast %cst_27 : f32 to vector<256x128xf32>
    %54 = arith.mulf %53, %52 : vector<256x128xf32>
    %cst_28 = arith.constant 5.000000e-01 : f32
    %55 = vector.broadcast %cst_28 : f32 to vector<256x128xf32>
    %56 = arith.mulf %55, %46 : vector<256x128xf32>
    %57 = math.tanh %54 : vector<256x128xf32>
    %cst_29 = arith.constant 1.000000e+00 : f32
    %58 = vector.broadcast %cst_29 : f32 to vector<256x128xf32>
    %59 = arith.addf %58, %57 : vector<256x128xf32>
    %60 = arith.mulf %56, %59 : vector<256x128xf32>
    %c0_30 = arith.constant 0 : index
    %c0_31 = arith.constant 0 : index
    %61 = vector.load %arg10[%c0_30, %c0_31] : memref<128x128xbf16, #tpu.memory_space<vmem>>, vector<128x128xbf16>
    %c0_32 = arith.constant 0 : index
    %c0_33 = arith.constant 0 : index
    %62 = vector.load %arg11[%c0_32, %c0_33] : memref<1x128xf32, #tpu.memory_space<vmem>>, vector<1x128xf32>
    %63 = arith.truncf %60 : vector<256x128xf32> to vector<256x128xbf16>
    %cst_34 = arith.constant dense<0.000000e+00> : vector<256x128xf32>
    %64 = tpu.matmul %63, %61, %cst_34 {dimension_numbers = #tpu.dot_dimension_numbers<[1], [0], [0], [1], [0, 0, 1, 1], [], []>} : vector<256x128xbf16>, vector<128x128xbf16>, vector<256x128xf32> -> vector<256x128xf32>
    %65 = vector.broadcast %62 : vector<1x128xf32> to vector<256x128xf32>
    %66 = arith.addf %64, %65 : vector<256x128xf32>
    %67 = arith.mulf %66, %66 : vector<256x128xf32>
    %cst_35 = arith.constant 4.471500e-02 : f32
    %68 = vector.broadcast %cst_35 : f32 to vector<256x128xf32>
    %69 = arith.mulf %68, %67 : vector<256x128xf32>
    %cst_36 = arith.constant 1.000000e+00 : f32
    %70 = vector.broadcast %cst_36 : f32 to vector<256x128xf32>
    %71 = arith.addf %70, %69 : vector<256x128xf32>
    %72 = arith.mulf %66, %71 : vector<256x128xf32>
    %cst_37 = arith.constant 0.797884583 : f32
    %73 = vector.broadcast %cst_37 : f32 to vector<256x128xf32>
    %74 = arith.mulf %73, %72 : vector<256x128xf32>
    %cst_38 = arith.constant 5.000000e-01 : f32
    %75 = vector.broadcast %cst_38 : f32 to vector<256x128xf32>
    %76 = arith.mulf %75, %66 : vector<256x128xf32>
    %77 = math.tanh %74 : vector<256x128xf32>
    %cst_39 = arith.constant 1.000000e+00 : f32
    %78 = vector.broadcast %cst_39 : f32 to vector<256x128xf32>
    %79 = arith.addf %78, %77 : vector<256x128xf32>
    %80 = arith.mulf %76, %79 : vector<256x128xf32>
    %c0_40 = arith.constant 0 : index
    %c0_41 = arith.constant 0 : index
    %81 = vector.load %arg12[%c0_40, %c0_41] : memref<128x256xbf16, #tpu.memory_space<vmem>>, vector<128x256xbf16>
    %c0_42 = arith.constant 0 : index
    %c0_43 = arith.constant 0 : index
    %82 = vector.load %arg13[%c0_42, %c0_43] : memref<1x256xf32, #tpu.memory_space<vmem>>, vector<1x256xf32>
    %83 = arith.truncf %80 : vector<256x128xf32> to vector<256x128xbf16>
    %cst_44 = arith.constant dense<0.000000e+00> : vector<256x256xf32>
    %84 = tpu.matmul %83, %81, %cst_44 {dimension_numbers = #tpu.dot_dimension_numbers<[1], [0], [0], [1], [0, 0, 1, 1], [], []>} : vector<256x128xbf16>, vector<128x256xbf16>, vector<256x256xf32> -> vector<256x256xf32>
    %85 = vector.broadcast %82 : vector<1x256xf32> to vector<256x256xf32>
    %86 = arith.addf %84, %85 : vector<256x256xf32>
    %87 = arith.mulf %86, %86 : vector<256x256xf32>
    %cst_45 = arith.constant 4.471500e-02 : f32
    %88 = vector.broadcast %cst_45 : f32 to vector<256x256xf32>
    %89 = arith.mulf %88, %87 : vector<256x256xf32>
    %cst_46 = arith.constant 1.000000e+00 : f32
    %90 = vector.broadcast %cst_46 : f32 to vector<256x256xf32>
    %91 = arith.addf %90, %89 : vector<256x256xf32>
    %92 = arith.mulf %86, %91 : vector<256x256xf32>
    %cst_47 = arith.constant 0.797884583 : f32
    %93 = vector.broadcast %cst_47 : f32 to vector<256x256xf32>
    %94 = arith.mulf %93, %92 : vector<256x256xf32>
    %cst_48 = arith.constant 5.000000e-01 : f32
    %95 = vector.broadcast %cst_48 : f32 to vector<256x256xf32>
    %96 = arith.mulf %95, %86 : vector<256x256xf32>
    %97 = math.tanh %94 : vector<256x256xf32>
    %cst_49 = arith.constant 1.000000e+00 : f32
    %98 = vector.broadcast %cst_49 : f32 to vector<256x256xf32>
    %99 = arith.addf %98, %97 : vector<256x256xf32>
    %100 = arith.mulf %96, %99 : vector<256x256xf32>
    %101 = arith.truncf %100 : vector<256x256xf32> to vector<256x256xbf16>
    %c0_50 = arith.constant 0 : index
    %c0_51 = arith.constant 0 : index
    %102 = vector.load %arg3[%c0_50, %c0_51] : memref<2x512xf32, #tpu.memory_space<vmem>>, vector<2x512xf32>
    %c0_52 = arith.constant 0 : index
    %c0_53 = arith.constant 0 : index
    %103 = vector.load %arg14[%c0_52, %c0_53] : memref<512x128xbf16, #tpu.memory_space<vmem>>, vector<512x128xbf16>
    %c0_54 = arith.constant 0 : index
    %c0_55 = arith.constant 0 : index
    %104 = vector.load %arg15[%c0_54, %c0_55] : memref<1x128xf32, #tpu.memory_space<vmem>>, vector<1x128xf32>
    %105 = arith.truncf %102 : vector<2x512xf32> to vector<2x512xbf16>
    %cst_56 = arith.constant dense<0.000000e+00> : vector<2x128xf32>
    %106 = tpu.matmul %105, %103, %cst_56 {dimension_numbers = #tpu.dot_dimension_numbers<[1], [0], [0], [1], [0, 0, 1, 1], [], []>} : vector<2x512xbf16>, vector<512x128xbf16>, vector<2x128xf32> -> vector<2x128xf32>
    %107 = vector.broadcast %104 : vector<1x128xf32> to vector<2x128xf32>
    %108 = arith.addf %106, %107 : vector<2x128xf32>
    %109 = arith.mulf %108, %108 : vector<2x128xf32>
    %cst_57 = arith.constant 4.471500e-02 : f32
    %110 = vector.broadcast %cst_57 : f32 to vector<2x128xf32>
    %111 = arith.mulf %110, %109 : vector<2x128xf32>
    %cst_58 = arith.constant 1.000000e+00 : f32
    %112 = vector.broadcast %cst_58 : f32 to vector<2x128xf32>
    %113 = arith.addf %112, %111 : vector<2x128xf32>
    %114 = arith.mulf %108, %113 : vector<2x128xf32>
    %cst_59 = arith.constant 0.797884583 : f32
    %115 = vector.broadcast %cst_59 : f32 to vector<2x128xf32>
    %116 = arith.mulf %115, %114 : vector<2x128xf32>
    %cst_60 = arith.constant 5.000000e-01 : f32
    %117 = vector.broadcast %cst_60 : f32 to vector<2x128xf32>
    %118 = arith.mulf %117, %108 : vector<2x128xf32>
    %119 = math.tanh %116 : vector<2x128xf32>
    %cst_61 = arith.constant 1.000000e+00 : f32
    %120 = vector.broadcast %cst_61 : f32 to vector<2x128xf32>
    %121 = arith.addf %120, %119 : vector<2x128xf32>
    %122 = arith.mulf %118, %121 : vector<2x128xf32>
    %c0_62 = arith.constant 0 : index
    %c0_63 = arith.constant 0 : index
    %123 = vector.load %arg16[%c0_62, %c0_63] : memref<128x128xbf16, #tpu.memory_space<vmem>>, vector<128x128xbf16>
    %c0_64 = arith.constant 0 : index
    %c0_65 = arith.constant 0 : index
    %124 = vector.load %arg17[%c0_64, %c0_65] : memref<1x128xf32, #tpu.memory_space<vmem>>, vector<1x128xf32>
    %125 = arith.truncf %122 : vector<2x128xf32> to vector<2x128xbf16>
    %cst_66 = arith.constant dense<0.000000e+00> : vector<2x128xf32>
    %126 = tpu.matmul %125, %123, %cst_66 {dimension_numbers = #tpu.dot_dimension_numbers<[1], [0], [0], [1], [0, 0, 1, 1], [], []>} : vector<2x128xbf16>, vector<128x128xbf16>, vector<2x128xf32> -> vector<2x128xf32>
    %127 = vector.broadcast %124 : vector<1x128xf32> to vector<2x128xf32>
    %128 = arith.addf %126, %127 : vector<2x128xf32>
    %129 = arith.mulf %128, %128 : vector<2x128xf32>
    %cst_67 = arith.constant 4.471500e-02 : f32
    %130 = vector.broadcast %cst_67 : f32 to vector<2x128xf32>
    %131 = arith.mulf %130, %129 : vector<2x128xf32>
    %cst_68 = arith.constant 1.000000e+00 : f32
    %132 = vector.broadcast %cst_68 : f32 to vector<2x128xf32>
    %133 = arith.addf %132, %131 : vector<2x128xf32>
    %134 = arith.mulf %128, %133 : vector<2x128xf32>
    %cst_69 = arith.constant 0.797884583 : f32
    %135 = vector.broadcast %cst_69 : f32 to vector<2x128xf32>
    %136 = arith.mulf %135, %134 : vector<2x128xf32>
    %cst_70 = arith.constant 5.000000e-01 : f32
    %137 = vector.broadcast %cst_70 : f32 to vector<2x128xf32>
    %138 = arith.mulf %137, %128 : vector<2x128xf32>
    %139 = math.tanh %136 : vector<2x128xf32>
    %cst_71 = arith.constant 1.000000e+00 : f32
    %140 = vector.broadcast %cst_71 : f32 to vector<2x128xf32>
    %141 = arith.addf %140, %139 : vector<2x128xf32>
    %142 = arith.mulf %138, %141 : vector<2x128xf32>
    %c0_72 = arith.constant 0 : index
    %c0_73 = arith.constant 0 : index
    %143 = vector.load %arg18[%c0_72, %c0_73] : memref<128x128xbf16, #tpu.memory_space<vmem>>, vector<128x128xbf16>
    %c0_74 = arith.constant 0 : index
    %c0_75 = arith.constant 0 : index
    %144 = vector.load %arg19[%c0_74, %c0_75] : memref<1x128xf32, #tpu.memory_space<vmem>>, vector<1x128xf32>
    %145 = arith.truncf %142 : vector<2x128xf32> to vector<2x128xbf16>
    %cst_76 = arith.constant dense<0.000000e+00> : vector<2x128xf32>
    %146 = tpu.matmul %145, %143, %cst_76 {dimension_numbers = #tpu.dot_dimension_numbers<[1], [0], [0], [1], [0, 0, 1, 1], [], []>} : vector<2x128xbf16>, vector<128x128xbf16>, vector<2x128xf32> -> vector<2x128xf32>
    %147 = vector.broadcast %144 : vector<1x128xf32> to vector<2x128xf32>
    %148 = arith.addf %146, %147 : vector<2x128xf32>
    %149 = arith.mulf %148, %148 : vector<2x128xf32>
    %cst_77 = arith.constant 4.471500e-02 : f32
    %150 = vector.broadcast %cst_77 : f32 to vector<2x128xf32>
    %151 = arith.mulf %150, %149 : vector<2x128xf32>
    %cst_78 = arith.constant 1.000000e+00 : f32
    %152 = vector.broadcast %cst_78 : f32 to vector<2x128xf32>
    %153 = arith.addf %152, %151 : vector<2x128xf32>
    %154 = arith.mulf %148, %153 : vector<2x128xf32>
    %cst_79 = arith.constant 0.797884583 : f32
    %155 = vector.broadcast %cst_79 : f32 to vector<2x128xf32>
    %156 = arith.mulf %155, %154 : vector<2x128xf32>
    %cst_80 = arith.constant 5.000000e-01 : f32
    %157 = vector.broadcast %cst_80 : f32 to vector<2x128xf32>
    %158 = arith.mulf %157, %148 : vector<2x128xf32>
    %159 = math.tanh %156 : vector<2x128xf32>
    %cst_81 = arith.constant 1.000000e+00 : f32
    %160 = vector.broadcast %cst_81 : f32 to vector<2x128xf32>
    %161 = arith.addf %160, %159 : vector<2x128xf32>
    %162 = arith.mulf %158, %161 : vector<2x128xf32>
    %c0_82 = arith.constant 0 : index
    %c0_83 = arith.constant 0 : index
    %163 = vector.load %arg20[%c0_82, %c0_83] : memref<128x128xbf16, #tpu.memory_space<vmem>>, vector<128x128xbf16>
    %c0_84 = arith.constant 0 : index
    %c0_85 = arith.constant 0 : index
    %164 = vector.load %arg21[%c0_84, %c0_85] : memref<1x128xf32, #tpu.memory_space<vmem>>, vector<1x128xf32>
    %165 = arith.truncf %162 : vector<2x128xf32> to vector<2x128xbf16>
    %cst_86 = arith.constant dense<0.000000e+00> : vector<2x128xf32>
    %166 = tpu.matmul %165, %163, %cst_86 {dimension_numbers = #tpu.dot_dimension_numbers<[1], [0], [0], [1], [0, 0, 1, 1], [], []>} : vector<2x128xbf16>, vector<128x128xbf16>, vector<2x128xf32> -> vector<2x128xf32>
    %167 = vector.broadcast %164 : vector<1x128xf32> to vector<2x128xf32>
    %168 = arith.addf %166, %167 : vector<2x128xf32>
    %169 = arith.mulf %168, %168 : vector<2x128xf32>
    %cst_87 = arith.constant 4.471500e-02 : f32
    %170 = vector.broadcast %cst_87 : f32 to vector<2x128xf32>
    %171 = arith.mulf %170, %169 : vector<2x128xf32>
    %cst_88 = arith.constant 1.000000e+00 : f32
    %172 = vector.broadcast %cst_88 : f32 to vector<2x128xf32>
    %173 = arith.addf %172, %171 : vector<2x128xf32>
    %174 = arith.mulf %168, %173 : vector<2x128xf32>
    %cst_89 = arith.constant 0.797884583 : f32
    %175 = vector.broadcast %cst_89 : f32 to vector<2x128xf32>
    %176 = arith.mulf %175, %174 : vector<2x128xf32>
    %cst_90 = arith.constant 5.000000e-01 : f32
    %177 = vector.broadcast %cst_90 : f32 to vector<2x128xf32>
    %178 = arith.mulf %177, %168 : vector<2x128xf32>
    %179 = math.tanh %176 : vector<2x128xf32>
    %cst_91 = arith.constant 1.000000e+00 : f32
    %180 = vector.broadcast %cst_91 : f32 to vector<2x128xf32>
    %181 = arith.addf %180, %179 : vector<2x128xf32>
    %182 = arith.mulf %178, %181 : vector<2x128xf32>
    %c0_92 = arith.constant 0 : index
    %c0_93 = arith.constant 0 : index
    %183 = vector.load %arg22[%c0_92, %c0_93] : memref<128x256xbf16, #tpu.memory_space<vmem>>, vector<128x256xbf16>
    %c0_94 = arith.constant 0 : index
    %c0_95 = arith.constant 0 : index
    %184 = vector.load %arg23[%c0_94, %c0_95] : memref<1x256xf32, #tpu.memory_space<vmem>>, vector<1x256xf32>
    %185 = arith.truncf %182 : vector<2x128xf32> to vector<2x128xbf16>
    %cst_96 = arith.constant dense<0.000000e+00> : vector<2x256xf32>
    %186 = tpu.matmul %185, %183, %cst_96 {dimension_numbers = #tpu.dot_dimension_numbers<[1], [0], [0], [1], [0, 0, 1, 1], [], []>} : vector<2x128xbf16>, vector<128x256xbf16>, vector<2x256xf32> -> vector<2x256xf32>
    %187 = vector.broadcast %184 : vector<1x256xf32> to vector<2x256xf32>
    %188 = arith.addf %186, %187 : vector<2x256xf32>
    %189 = arith.truncf %188 : vector<2x256xf32> to vector<2x256xbf16>
    %190 = vector.extract_strided_slice %189 {offsets = [0, 0], sizes = [2, 128], strides = [1, 1]} : vector<2x256xbf16> to vector<2x128xbf16>
    %191 = vector.extract_strided_slice %101 {offsets = [0, 0], sizes = [256, 128], strides = [1, 1]} : vector<256x256xbf16> to vector<256x128xbf16>
    %cst_97 = arith.constant dense<0.000000e+00> : vector<2x256xf32>
    %192 = tpu.matmul %190, %191, %cst_97 {dimension_numbers = #tpu.dot_dimension_numbers<[1], [1], [0], [0], [0, 0, 1, 0], [], []>} : vector<2x128xbf16>, vector<256x128xbf16>, vector<2x256xf32> -> vector<2x256xf32>
    %c0_98 = arith.constant 0 : index
    %193 = memref.load %arg1[%c0_98] : memref<2xf32, #tpu.memory_space<smem>>
    %194 = vector.broadcast %193 : f32 to vector<2x256xf32>
    %195 = arith.addf %192, %194 : vector<2x256xf32>
    %c0_99 = arith.constant 0 : index
    %c0_100 = arith.constant 0 : index
    %c0_101 = arith.constant 0 : index
    %196 = vector.load %arg24[%c0_99, %c0_100, %c0_101] : memref<2x2x256xf32, #tpu.memory_space<vmem>>, vector<1x2x256xf32>
    %197 = vector.shape_cast %196 : vector<1x2x256xf32> to vector<2x256xf32>
    %198 = vector.shape_cast %195 : vector<2x256xf32> to vector<1x2x256xf32>
    tpu.vector_store %arg24[%c0_99, %c0_100, %c0_101], %198 {strides = array<i32>} : memref<2x2x256xf32, #tpu.memory_space<vmem>>, vector<1x2x256xf32>,
    %199 = vector.extract_strided_slice %189 {offsets = [0, 128], sizes = [2, 128], strides = [1, 1]} : vector<2x256xbf16> to vector<2x128xbf16>
    %200 = vector.extract_strided_slice %101 {offsets = [0, 128], sizes = [256, 128], strides = [1, 1]} : vector<256x256xbf16> to vector<256x128xbf16>
    %cst_102 = arith.constant dense<0.000000e+00> : vector<2x256xf32>
    %201 = tpu.matmul %199, %200, %cst_102 {dimension_numbers = #tpu.dot_dimension_numbers<[1], [1], [0], [0], [0, 0, 1, 0], [], []>} : vector<2x128xbf16>, vector<256x128xbf16>, vector<2x256xf32> -> vector<2x256xf32>
    %c1 = arith.constant 1 : index
    %202 = memref.load %arg1[%c1] : memref<2xf32, #tpu.memory_space<smem>>
    %203 = vector.broadcast %202 : f32 to vector<2x256xf32>
    %204 = arith.addf %201, %203 : vector<2x256xf32>
    %c1_103 = arith.constant 1 : index
    %c0_104 = arith.constant 0 : index
    %c0_105 = arith.constant 0 : index
    %205 = vector.load %arg24[%c1_103, %c0_104, %c0_105] : memref<2x2x256xf32, #tpu.memory_space<vmem>>, vector<1x2x256xf32>
    %206 = vector.shape_cast %205 : vector<1x2x256xf32> to vector<2x256xf32>
    %207 = vector.shape_cast %204 : vector<2x256xf32> to vector<1x2x256xf32>
    tpu.vector_store %arg24[%c1_103, %c0_104, %c0_105], %207 {strides = array<i32>} : memref<2x2x256xf32, #tpu.memory_space<vmem>>, vector<1x2x256xf32>,
    return
  }
  func.func @transform_0(%arg0: i32, %arg1: memref<2xf32, #tpu.memory_space<smem>>) -> (i32, i32) {
    %c0_i32 = arith.constant 0 : i32
    %c0_i32_0 = arith.constant 0 : i32
    return %arg0, %c0_i32 : i32, i32
  }
  func.func @transform_1(%arg0: i32, %arg1: memref<2xf32, #tpu.memory_space<smem>>) -> (i32, i32) {
    %c0_i32 = arith.constant 0 : i32
    %c0_i32_0 = arith.constant 0 : i32
    %c0_i32_1 = arith.constant 0 : i32
    return %c0_i32, %c0_i32_0 : i32, i32
  }
  func.func @transform_2(%arg0: i32, %arg1: memref<2xf32, #tpu.memory_space<smem>>) -> (i32, i32) {
    %c0_i32 = arith.constant 0 : i32
    %c0_i32_0 = arith.constant 0 : i32
    %c0_i32_1 = arith.constant 0 : i32
    return %c0_i32, %c0_i32_0 : i32, i32
  }
  func.func @transform_3(%arg0: i32, %arg1: memref<2xf32, #tpu.memory_space<smem>>) -> (i32, i32) {
    %c0_i32 = arith.constant 0 : i32
    %c0_i32_0 = arith.constant 0 : i32
    %c0_i32_1 = arith.constant 0 : i32
    return %c0_i32, %c0_i32_0 : i32, i32
  }
  func.func @transform_4(%arg0: i32, %arg1: memref<2xf32, #tpu.memory_space<smem>>) -> (i32, i32) {
    %c0_i32 = arith.constant 0 : i32
    %c0_i32_0 = arith.constant 0 : i32
    %c0_i32_1 = arith.constant 0 : i32
    return %c0_i32, %c0_i32_0 : i32, i32
  }
  func.func @transform_5(%arg0: i32, %arg1: memref<2xf32, #tpu.memory_space<smem>>) -> (i32, i32) {
    %c0_i32 = arith.constant 0 : i32
    %c0_i32_0 = arith.constant 0 : i32
    %c0_i32_1 = arith.constant 0 : i32
    return %c0_i32, %c0_i32_0 : i32, i32
  }
  func.func @transform_6(%arg0: i32, %arg1: memref<2xf32, #tpu.memory_space<smem>>) -> (i32, i32) {
    %c0_i32 = arith.constant 0 : i32
    %c0_i32_0 = arith.constant 0 : i32
    %c0_i32_1 = arith.constant 0 : i32
    return %c0_i32, %c0_i32_0 : i32, i32
  }
  func.func @transform_7(%arg0: i32, %arg1: memref<2xf32, #tpu.memory_space<smem>>) -> (i32, i32) {
    %c0_i32 = arith.constant 0 : i32
    %c0_i32_0 = arith.constant 0 : i32
    %c0_i32_1 = arith.constant 0 : i32
    return %c0_i32, %c0_i32_0 : i32, i32
  }
  func.func @transform_8(%arg0: i32, %arg1: memref<2xf32, #tpu.memory_space<smem>>) -> (i32, i32) {
    %c0_i32 = arith.constant 0 : i32
    %c0_i32_0 = arith.constant 0 : i32
    %c0_i32_1 = arith.constant 0 : i32
    return %c0_i32, %c0_i32_0 : i32, i32
  }
  func.func @transform_9(%arg0: i32, %arg1: memref<2xf32, #tpu.memory_space<smem>>) -> (i32, i32) {
    %c0_i32 = arith.constant 0 : i32
    %c0_i32_0 = arith.constant 0 : i32
    %c0_i32_1 = arith.constant 0 : i32
    return %c0_i32, %c0_i32_0 : i32, i32
  }
  func.func @transform_10(%arg0: i32, %arg1: memref<2xf32, #tpu.memory_space<smem>>) -> (i32, i32) {
    %c0_i32 = arith.constant 0 : i32
    %c0_i32_0 = arith.constant 0 : i32
    %c0_i32_1 = arith.constant 0 : i32
    return %c0_i32, %c0_i32_0 : i32, i32
  }
  func.func @transform_11(%arg0: i32, %arg1: memref<2xf32, #tpu.memory_space<smem>>) -> (i32, i32) {
    %c0_i32 = arith.constant 0 : i32
    %c0_i32_0 = arith.constant 0 : i32
    %c0_i32_1 = arith.constant 0 : i32
    return %c0_i32, %c0_i32_0 : i32, i32
  }
  func.func @transform_12(%arg0: i32, %arg1: memref<2xf32, #tpu.memory_space<smem>>) -> (i32, i32) {
    %c0_i32 = arith.constant 0 : i32
    %c0_i32_0 = arith.constant 0 : i32
    %c0_i32_1 = arith.constant 0 : i32
    return %c0_i32, %c0_i32_0 : i32, i32
  }
  func.func @transform_13(%arg0: i32, %arg1: memref<2xf32, #tpu.memory_space<smem>>) -> (i32, i32) {
    %c0_i32 = arith.constant 0 : i32
    %c0_i32_0 = arith.constant 0 : i32
    %c0_i32_1 = arith.constant 0 : i32
    return %c0_i32, %c0_i32_0 : i32, i32
  }
  func.func @transform_14(%arg0: i32, %arg1: memref<2xf32, #tpu.memory_space<smem>>) -> (i32, i32) {
    %c0_i32 = arith.constant 0 : i32
    %c0_i32_0 = arith.constant 0 : i32
    %c0_i32_1 = arith.constant 0 : i32
    return %c0_i32, %c0_i32_0 : i32, i32
  }
  func.func @transform_15(%arg0: i32, %arg1: memref<2xf32, #tpu.memory_space<smem>>) -> (i32, i32) {
    %c0_i32 = arith.constant 0 : i32
    %c0_i32_0 = arith.constant 0 : i32
    %c0_i32_1 = arith.constant 0 : i32
    return %c0_i32, %c0_i32_0 : i32, i32
  }
  func.func @transform_16(%arg0: i32, %arg1: memref<2xf32, #tpu.memory_space<smem>>) -> (i32, i32) {
    %c0_i32 = arith.constant 0 : i32
    %c0_i32_0 = arith.constant 0 : i32
    %c0_i32_1 = arith.constant 0 : i32
    return %c0_i32, %c0_i32_0 : i32, i32
  }
  func.func @transform_17(%arg0: i32, %arg1: memref<2xf32, #tpu.memory_space<smem>>) -> (i32, i32) {
    %c0_i32 = arith.constant 0 : i32
    %c0_i32_0 = arith.constant 0 : i32
    %c0_i32_1 = arith.constant 0 : i32
    return %c0_i32, %c0_i32_0 : i32, i32
  }
  func.func @transform_18(%arg0: i32, %arg1: memref<2xf32, #tpu.memory_space<smem>>) -> (i32, i32) {
    %c0_i32 = arith.constant 0 : i32
    %c0_i32_0 = arith.constant 0 : i32
    %c0_i32_1 = arith.constant 0 : i32
    return %c0_i32, %c0_i32_0 : i32, i32
  }
  func.func @transform_19(%arg0: i32, %arg1: memref<2xf32, #tpu.memory_space<smem>>) -> (i32, i32) {
    %c0_i32 = arith.constant 0 : i32
    %c0_i32_0 = arith.constant 0 : i32
    %c0_i32_1 = arith.constant 0 : i32
    return %c0_i32, %c0_i32_0 : i32, i32
  }
  func.func @transform_20(%arg0: i32, %arg1: memref<2xf32, #tpu.memory_space<smem>>) -> (i32, i32) {
    %c0_i32 = arith.constant 0 : i32
    %c0_i32_0 = arith.constant 0 : i32
    %c0_i32_1 = arith.constant 0 : i32
    return %c0_i32, %c0_i32_0 : i32, i32
  }
  func.func @transform_21(%arg0: i32, %arg1: memref<2xf32, #tpu.memory_space<smem>>) -> (i32, i32) {
    %c0_i32 = arith.constant 0 : i32
    %c0_i32_0 = arith.constant 0 : i32
    %c0_i32_1 = arith.constant 0 : i32
    return %c0_i32, %c0_i32_0 : i32, i32
  }
  func.func @transform_22(%arg0: i32, %arg1: memref<2xf32, #tpu.memory_space<smem>>) -> (i32, i32, i32) {
    %c0_i32 = arith.constant 0 : i32
    %c0_i32_0 = arith.constant 0 : i32
    %c0_i32_1 = arith.constant 0 : i32
    return %c0_i32, %c0_i32_0, %arg0 : i32, i32, i32
  }
}

</mosaic_0001>

<bundles_post_ra>
// kernel: _lambda_.1
= control target key start
LH: loop header
LB: loop body
LE: loop exit
PB: predicated region body
PF: predicated region fallthrough
CT: control target
= control target key end

     0   :  { %s8188_s0 = inlined_call_operand.vmem [shape: f32[2], index: 0, kind: input, shape index: {}]   ;;  %s8189_s1 = inlined_call_operand.vmem [shape: f32[512,3], index: 1, kind: input, shape index: {}]   ;;  %s8190_s2 = inlined_call_operand.vmem [shape: f32[2,512], index: 2, kind: input, shape index: {}]   ;;  %s8191_s3 = inlined_call_operand.vmem [shape: bf16[3,128], index: 3, kind: input, shape index: {}]   ;;  %s8192_s4 = inlined_call_operand.vmem [shape: f32[1,128], index: 4, kind: input, shape index: {}]   ;;  %s8193_s5 = inlined_call_operand.vmem [shape: bf16[128,128], index: 5, kind: input, shape index: {}]   ;;  %s8194_s6 = inlined_call_operand.vmem [shape: f32[1,128], index: 6, kind: input, shape index: {}]   ;;  %s8195_s7 = inlined_call_operand.vmem [shape: bf16[128,128], index: 7, kind: input, shape index: {}]   ;;  %s8196_s8 = inlined_call_operand.vmem [shape: f32[1,128], index: 8, kind: input, shape index: {}]   ;;  %s8197_s9 = inlined_call_operand.vmem [shape: bf16[128,128], index: 9, kind: input, shape index: {}]   ;;  %s8198_s10 = inlined_call_operand.vmem [shape: f32[1,128], index: 10, kind: input, shape index: {}]   ;;  %s8199_s11 = inlined_call_operand.vmem [shape: bf16[128,256], index: 11, kind: input, shape index: {}]   ;;  %s8200_s12 = inlined_call_operand.vmem [shape: f32[1,256], index: 12, kind: input, shape index: {}]   ;;  %s8201_s13 = inlined_call_operand.vmem [shape: bf16[512,128], index: 13, kind: input, shape index: {}]   ;;  %s8202_s14 = inlined_call_operand.vmem [shape: f32[1,128], index: 14, kind: input, shape index: {}]   ;;  %s8203_s15 = inlined_call_operand.vmem [shape: bf16[128,128], index: 15, kind: input, shape index: {}]   ;;  %s8204_s16 = inlined_call_operand.vmem [shape: f32[1,128], index: 16, kind: input, shape index: {}]   ;;  %s8205_s17 = inlined_call_operand.vmem [shape: bf16[128,128], index: 17, kind: input, shape index: {}]   ;;  %s8206_s18 = inlined_call_operand.vmem [shape: f32[1,128], index: 18, kind: input, shape index: {}]   ;;  %s8207_s19 = inlined_call_operand.vmem [shape: bf16[128,128], index: 19, kind: input, shape index: {}]   ;;  %s8208_s20 = inlined_call_operand.vmem [shape: f32[1,128], index: 20, kind: input, shape index: {}]   ;;  %s8209_s21 = inlined_call_operand.vmem [shape: bf16[128,256], index: 21, kind: input, shape index: {}]   ;;  %s8210_s22 = inlined_call_operand.vmem [shape: f32[1,256], index: 22, kind: input, shape index: {}]   ;;  %s8211_s23 = inlined_call_operand.vmem [shape: f32[2,2,512], index: 23, kind: output, shape index: {}]  }
   0x1   :  { %8245 = sst [smem:[#allocation46_spill]] %s8188_s0 }
   0x2   :  { %8246 = sst [smem:[#allocation47_spill]] %s8189_s1  ;;  %s8254_s24 = sld [smem:[#allocation46_spill]] }
   0x3   :  { %8247 = sst [smem:[#allocation48_spill]] %s8190_s2 }
   0x4   :  { %8248 = sst [smem:[#allocation49_spill]] %s8191_s3 }
   0x5   :  { %8249 = sst [smem:[#allocation50_spill]] %s8192_s4 }
   0x6   :  { %8250 = sst [smem:[#allocation51_spill]] %s8193_s5 }
   0x7   :  { %8251 = sst [smem:[#allocation52_spill]] %s8194_s6 }
   0x8   :  { %8252 = sst [smem:[#allocation53_spill]] %s8195_s7 }
   0x9   :  { %8253 = sst [smem:[#allocation54_spill]] %s8204_s16  ;;  %s28_s16 = sshll.u32 %s8254_s24, 4  ;;  %s29_s16 = int_to_ptr.vmem [resolvable:$true] %s28_s16 }
   0xa   :  { %s6030_s25 = scalar_lea.vmem %s29_s16, 16  ;;  %p6035_p1 = scmp.lt.s32.totalorder %s29_s16, %s29_s16 }
   0xb   :  { %p6031_p0 = scmp.ne.s32.totalorder %s29_s16, %s6030_s25  ;;  %p6036_p2 = scmp.lt.s32.totalorder %s6030_s25, %s6030_s25 }
   0xd   :  { %p6037_p3 = por %p6036_p2, %p6035_p1 }
   0xf   :  { %p6038_p4 = pnand %p6037_p3, %p6031_p0 }
  0x11   :  { %6041 = shalt.err (!%p6038_p4)  }
  0x12   :  { %s6068_s5 = smov [#allocation3]  }
  0x13   :  { %31 = dma.vmem_to_smem %s29_s16, 16, %s6068_s5, [#allocation2] }
  0x14   :  { %6054 = dma.done.wait [#allocation2], 16 }
  0x15   :  { %6055 = vsyncadd [#allocation2], 4294967280 }
  0x16   :  { %33 = sfence }
  0x17   :  { %s6197_s1 = smov 0   ;;  %s6199_s26 = smov 0  }
  0x18   :  { %s6201_s2 = smov 0  }
  0x19 LB: > { %s6210_s16 = sadd.s32 4294967295, %s6066_s2   ;;  %s6212_s6 = sadd.s32 1, %s6066_s2   ;;  %s6066_s2 = sphi %s6201_s2, %s8381_s2   ;;  %s6062_s26 = sphi %s6199_s26, %s8380_s26   ;;  %s6058_s1 = sphi %s6197_s1, %s8379_s1  }
  0x1a   : > { %s510_s27 = ssub.s32 %s6066_s2, %s6212_s6  ;;  %s513_s7 = sadd.s32 1, %s6062_s26 }
  0x1b   : > { %p511_p5 = scmp.eq.s32.totalorder %s510_s27, 0  ;;  %p523_p6 = scmp.ne.s32.totalorder %s6062_s26, %s6058_s1 }
  0x1c   : > { %p524_p7 = scmp.eq.s32.totalorder %s6210_s16, 1  ;;  %p4895_p8 = scmp.ge.s32.totalorder %s6066_s2, 1 }
  0x1d   : > { %s6220_s28 = scalar_select %p511_p5, %s6062_s26, %s513_s7  }
  0x1e   : > { %p6222_p9 = por %p524_p7, %p523_p6  ;;  %p620_p10 = scmp.lt.s32.totalorder %s6066_s2, 3 }
  0x20   : > { %p621_p11 = pnand %p4895_p8, %p620_p10 }
  0x22   : > { %624 = sbr.rel (%p621_p11) target bundleno = 2366 (0x93e), region = 108 }
  0x29   : > { %s8256_s4 = sld [smem:[#allocation49_spill]]  ;;  %vm794_vm0 = vcmask 1040384   ;;  %vm795_vm1 = vcmask 1041408   ;;  %s4897_s30 = sshll.u32 %s6210_s16, 5  ;;  %v6069_v1 = vmov 65535   ;;  %vm745_vm2 = vcmask 23552  }
  0x2a   : > { %v796_v2 = vsel %vm794_vm0, 4294967295, %v6069_v1  ;;  %p682_p12 = scmp.lt.s32.totalorder %s4897_s30, 63  ;;  %s8257_s2 = sld [smem:[#allocation47_spill]]  ;;  %vm6073_vm3 = vmmov 0  }
  0x2b   : > { %v797_v3 = vsel %vm795_vm1, %v796_v2, 0  ;;  %s8258_s0 = sld [smem:[#allocation51_spill]]  ;;  %s8259_s7 = sld [smem:[#allocation53_spill]] }
  0x2c   : > { %s8383_s30 = smov (!%p682_p12, %s4897_s30), 63  ;;  %s4677_s3 = sld [smem:[#allocation3]] }
  0x2d   : > { %s4898_s24 = sshll.u32 %s8383_s30, 3  ;;  %s678_s30 = sand.u32 1, %s6058_s1  }
  0x2e   : > { %s5044_s1 = sshll.u32 (%p6222_p9), %s6210_s16, 2 }
  0x2f   : > { %v721_v0 = vld [vmem:[%s8256_s4] sm:$0x3]  ;;  %s8263_s4 = sld [smem:[#allocation48_spill]] }
  0x30   : > { %v799_v4 = vand.u32 %v797_v3, %v721_v0  ;;  %s6233_s27 = scalar_lea.vmem %s8257_s2, %s4898_s24  ;;  %s8292_s24 = sld [smem:[#allocation54_spill]] }
  0x31   : > { %v689_v5 = vld [vmem:[%s6233_s27] sm:$0xff]  ;;  %v690_v6 = vld [vmem:[%s6233_s27 + $0x8] sm:$0xff]  ;;  %v691_v7 = vld [vmem:[%s6233_s27 + $0x10] sm:$0xff]  ;;  %s4797_s2 = scalar_lea.vmem (%p6222_p9), %s8211_s23, %s5044_s1 }
  0x32   : > { %5241 = vmatprep.subr.bf16.mxu0 %v799_v4  ;;  %v723_v8 = vpack.c.bf16 %v690_v6, %v689_v5  ;;  %v692_v9 = vld [vmem:[%s6233_s27 + $0x18] sm:$0xff]  ;;  %v693_v10 = vld [vmem:[%s6233_s27 + $0x20] sm:$0xff]  ;;  %v694_v11 = vld [vmem:[%s6233_s27 + $0x28] sm:$0xff] }
  0x33   : > { %5242 = vmatpush3.bf16.msra.mxu0 %v799_v4  ;;  %v724_v12 = vpack.c.bf16 %v692_v9, %v691_v7  ;;  %v725_v13 = vpack.c.bf16 %v694_v11, %v693_v10  ;;  %v695_v14 = vld [vmem:[%s6233_s27 + $0x30] sm:$0xff]  ;;  %v696_v15 = vld [vmem:[%s6233_s27 + $0x38] sm:$0xff]  ;;  %v697_v16 = vld [vmem:[%s6233_s27 + $0x40] sm:$0xff] }
  0x34   : > { %5243 = vmatprep.mubr.msk.bf16.mxu0 %vm745_vm2, %v723_v8  ;;  %v698_v17 = vld [vmem:[%s6233_s27 + $0x48] sm:$0xff]  ;;  %v726_v18 = vpack.c.bf16 %v696_v15, %v695_v14  ;;  %v699_v20 = vld [vmem:[%s6233_s27 + $0x50] sm:$0xff]  ;;  %v700_v21 = vld [vmem:[%s6233_s27 + $0x58] sm:$0xff] }
  0x35   : > { %v727_v19 = vpack.c.bf16 %v698_v17, %v697_v16  ;;  %v701_v22 = vld [vmem:[%s6233_s27 + $0x60] sm:$0xff]  ;;  %v702_v23 = vld [vmem:[%s6233_s27 + $0x68] sm:$0xff]  ;;  %v728_v24 = vpack.c.bf16 %v700_v21, %v699_v20  ;;  %v703_v26 = vld [vmem:[%s6233_s27 + $0x70] sm:$0xff] }
  0x36   : > { %5244 = vmatmul.mubr.msk.bf16.vlgmr.msra.gmra.mrb[0].mxu0 %vm745_vm2, %v724_v12  ;;  %v729_v25 = vpack.c.bf16 %v702_v23, %v701_v22  ;;  %v704_v27 = vld [vmem:[%s6233_s27 + $0x78] sm:$0xff]  ;;  %v705_v28 = vld [vmem:[%s6233_s27 + $0x80] sm:$0xff]  ;;  %v706_v29 = vld [vmem:[%s6233_s27 + $0x88] sm:$0xff] }
  0x37   : > { %5247 = vmatprep.mubr.msk.bf16.mxu0 %vm745_vm2, %v725_v13  ;;  %v730_v30 = vpack.c.bf16 %v704_v27, %v703_v26  ;;  %v731_v31 = vpack.c.bf16 %v706_v29, %v705_v28  ;;  %v707_v32 = vld [vmem:[%s6233_s27 + $0x90] sm:$0xff]  ;;  %v708_v33 = vld [vmem:[%s6233_s27 + $0x98] sm:$0xff]  ;;  %v709_v34 = vld [vmem:[%s6233_s27 + $0xa0] sm:$0xff] }
  0x38   : > { %v710_v35 = vld [vmem:[%s6233_s27 + $0xa8] sm:$0xff]  ;;  %v732_v36 = vpack.c.bf16 %v708_v33, %v707_v32  ;;  %v711_v38 = vld [vmem:[%s6233_s27 + $0xb0] sm:$0xff]  ;;  %v712_v39 = vld [vmem:[%s6233_s27 + $0xb8] sm:$0xff] }
  0x39   : > { %v733_v37 = vpack.c.bf16 %v710_v35, %v709_v34  ;;  %v713_v40 = vld [vmem:[%s6233_s27 + $0xc0] sm:$0xff]  ;;  %v714_v41 = vld [vmem:[%s6233_s27 + $0xc8] sm:$0xff]  ;;  %v734_v42 = vpack.c.bf16 %v712_v39, %v711_v38  ;;  %v715_v44 = vld [vmem:[%s6233_s27 + $0xd0] sm:$0xff] }
  0x3a   : > { %v735_v43 = vpack.c.bf16 %v714_v41, %v713_v40  ;;  %v716_v45 = vld [vmem:[%s6233_s27 + $0xd8] sm:$0xff]  ;;  %v717_v46 = vld [vmem:[%s6233_s27 + $0xe0] sm:$0xff]  ;;  %v718_v47 = vld [vmem:[%s6233_s27 + $0xe8] sm:$0xff] }
  0x3b   : > { %v736_v48 = vpack.c.bf16 %v716_v45, %v715_v44  ;;  %v737_v49 = vpack.c.bf16 %v718_v47, %v717_v46  ;;  %v719_v50 = vld [vmem:[%s6233_s27 + $0xf0] sm:$0xff]  ;;  %v720_v51 = vld [vmem:[%s6233_s27 + $0xf8] sm:$0xff]  ;;  %v5509_v53 = vld [vmem:[%s8258_s0] sm:$0xff]  }
  0x3c   : > { %v738_v52 = vpack.c.bf16 %v720_v51, %v719_v50  ;;  %5275 = vmatprep.subr.bf16.mxu1 %v5509_v53  ;;  %v5510_v54 = vld [vmem:[%s8258_s0 + $0x8] sm:$0xff]   ;;  %v5511_v55 = vld [vmem:[%s8258_s0 + $0x10] sm:$0xff]   ;;  %v5512_v56 = vld [vmem:[%s8258_s0 + $0x18] sm:$0xff]  }
  0x3d   : > { %5276 = vmatpush3.bf16.msra.mxu1 %v5509_v53  ;;  %v5513_v57 = vld [vmem:[%s8258_s0 + $0x20] sm:$0xff]   ;;  %v5514_v58 = vld [vmem:[%s8258_s0 + $0x28] sm:$0xff]   ;;  %v5515_v59 = vld [vmem:[%s8258_s0 + $0x30] sm:$0xff]  }
  0x3e   : > { %5248 = vmatmul.mubr.msk.bf16.gmra.mrb[4].mxu0 %vm745_vm2, %v726_v18  ;;  %5277 = vmatprep.subr.bf16.mxu1 %v5510_v54  ;;  %v5516_v60 = vld [vmem:[%s8258_s0 + $0x38] sm:$0xff]   ;;  %v5517_v61 = vld [vmem:[%s8259_s7] sm:$0xff]   ;;  %v5518_v62 = vld [vmem:[%s8259_s7 + $0x8] sm:$0xff]   ;;  %s8260_s0 = sld [smem:[#allocation50_spill]] }
  0x3f   : > { %5251 = vmatprep.mubr.msk.bf16.mxu0 %vm745_vm2, %v727_v19  ;;  %5323 = vmatprep.subr.bf16.mxu0 %v5517_v61  ;;  %v5519_v63 = vld [vmem:[%s8259_s7 + $0x10] sm:$0xff]   ;;  %v5520_v0 = vld [vmem:[%s8259_s7 + $0x18] sm:$0xff]  }
  0x40   : > { %5324 = vmatpush3.bf16.msra.mxu0 %v5517_v61 }
  0x41   : > { %5278 = vmatpush3.bf16.msra.mxu1 %v5510_v54  ;;  %5325 = vmatprep.subr.bf16.mxu0 %v5518_v62 }
  0x42   : > { %5279 = vmatprep.subr.bf16.mxu1 %v5511_v55 }
  0x44   : > { %5326 = vmatpush3.bf16.msra.mxu0 %v5518_v62  ;;  %v6322_v1 = vld [vmem:[%s8260_s0] ss:$0 sm:$0xff]  ;;  %s8261_s0 = sld [smem:[#allocation52_spill]] }
  0x45   : > { %5280 = vmatpush3.bf16.msra.mxu1 %v5511_v55  ;;  %5327 = vmatprep.subr.bf16.mxu0 %v5519_v63 }
  0x46   : > { %5252 = vmatmul.mubr.msk.bf16.gmra.mrb[8].mxu0 %vm745_vm2, %v728_v24  ;;  %5281 = vmatprep.subr.bf16.mxu1 %v5512_v56 }
  0x47   : > { %5255 = vmatprep.mubr.msk.bf16.mxu0 %vm745_vm2, %v729_v25 }
  0x48   : > { %5328 = vmatpush3.bf16.msra.mxu0 %v5519_v63 }
  0x49   : > { %5282 = vmatpush3.bf16.msra.mxu1 %v5512_v56  ;;  %5329 = vmatprep.subr.bf16.mxu0 %v5520_v0 }
  0x4a   : > { %5283 = vmatprep.subr.bf16.mxu1 %v5513_v57 }
  0x4c   : > { %5330 = vmatpush3.bf16.msra.mxu0 %v5520_v0 }
  0x4d   : > { %5284 = vmatpush3.bf16.msra.mxu1 %v5513_v57 }
  0x4e   : > { %5256 = vmatmul.mubr.msk.bf16.gmra.mrb[12].mxu0 %vm745_vm2, %v730_v30  ;;  %5285 = vmatprep.subr.bf16.mxu1 %v5514_v58 }
  0x4f   : > { %5259 = vmatprep.mubr.msk.bf16.mxu0 %vm745_vm2, %v731_v31 }
  0x51   : > { %5286 = vmatpush3.bf16.msra.mxu1 %v5514_v58 }
  0x52   : > { %5287 = vmatprep.subr.bf16.mxu1 %v5515_v59 }
  0x55   : > { %5288 = vmatpush3.bf16.msra.mxu1 %v5515_v59 }
  0x56   : > { %5260 = vmatmul.mubr.msk.bf16.gmra.mrb[16].mxu0 %vm745_vm2, %v732_v36  ;;  %5289 = vmatprep.subr.bf16.mxu1 %v5516_v60 }
  0x57   : > { %5263 = vmatprep.mubr.msk.bf16.mxu0 %vm745_vm2, %v733_v37 }
  0x59   : > { %5290 = vmatpush3.bf16.msra.mxu1 %v5516_v60 }
  0x5e   : > { %5264 = vmatmul.mubr.msk.bf16.gmra.mrb[20].mxu0 %vm745_vm2, %v734_v42 }
  0x5f   : > { %5267 = vmatprep.mubr.msk.bf16.mxu0 %vm745_vm2, %v735_v43 }
  0x66   : > { %5268 = vmatmul.mubr.msk.bf16.gmra.mrb[24].mxu0 %vm745_vm2, %v736_v48 }
  0x67   : > { %5271 = vmatprep.mubr.msk.bf16.mxu0 %vm745_vm2, %v737_v49 }
  0x6e   : > { %5272 = vmatmul.mubr.msk.bf16.gmra.mrb[28].mxu0 %vm745_vm2, %v738_v52 }
 0x109   : > { %v5245_v2 = vpop.f32.mrb[0].mxu0 }
 0x10a   : > { %v844_v3 = vadd.f32 %v5245_v2, %v6322_v1  ;;  %v835_v4 = vpop.f32.mrb[1].mxu0 }
 0x10b   : > { %v836_v5 = vadd.f32 %v6322_v1, %v835_v4  ;;  %v5246_v6 = vpop.f32.mrb[2].mxu0 }
 0x10c   : > { %v964_v7 = vmul.f32 %v844_v3, %v844_v3  ;;  %v847_v8 = vadd.f32 %v5246_v6, %v6322_v1  ;;  %v838_v9 = vpop.f32.mrb[3].mxu0  ;;  %v6330_v33 = vmul.f32 0.5, %v844_v3 }
 0x10d   : > { %v962_v10 = vmul.f32 %v836_v5, %v836_v5  ;;  %v839_v11 = vadd.f32 %v6322_v1, %v838_v9  ;;  %v6333_v36 = vmul.f32 0.5, %v836_v5 }
 0x10e   : > { %v996_v12 = vmul.f32 0.044715, %v964_v7  ;;  %v965_v13 = vmul.f32 %v847_v8, %v847_v8  ;;  %v6336_v42 = vmul.f32 0.5, %v847_v8 }
 0x10f   : > { %v994_v14 = vmul.f32 0.044715, %v962_v10  ;;  %v963_v15 = vmul.f32 %v839_v11, %v839_v11  ;;  %v6338_v49 = vmul.f32 0.5, %v839_v11 }
 0x110   : > { %v1028_v16 = vadd.f32 1.0, %v996_v12  ;;  %v997_v17 = vmul.f32 0.044715, %v965_v13 }
 0x111   : > { %v1026_v18 = vadd.f32 1.0, %v994_v14  ;;  %v995_v19 = vmul.f32 0.044715, %v963_v15  ;;  %v5249_v20 = vpop.f32.mrb[4].mxu0 }
 0x112   : > { %v1029_v21 = vadd.f32 1.0, %v997_v17  ;;  %v860_v22 = vadd.f32 %v5249_v20, %v6322_v1  ;;  %v851_v23 = vpop.f32.mrb[5].mxu0  ;;  %v1060_v24 = vmul.f32 %v1028_v16, %v844_v3 }
 0x113   : > { %v1027_v25 = vadd.f32 1.0, %v995_v19  ;;  %v852_v26 = vadd.f32 %v6322_v1, %v851_v23  ;;  %v5250_v27 = vpop.f32.mrb[6].mxu0  ;;  %v1058_v28 = vmul.f32 %v1026_v18, %v836_v5 }
 0x114   : > { %v968_v29 = vmul.f32 %v860_v22, %v860_v22  ;;  %v854_v30 = vpop.f32.mrb[7].mxu0  ;;  %v1061_v31 = vmul.f32 %v1029_v21, %v847_v8  ;;  %v863_v35 = vadd.f32 %v5250_v27, %v6322_v1  ;;  %v1092_v37 = vmul.f32 0.7978846, %v1060_v24 }
 0x115   : > { %v966_v32 = vmul.f32 %v852_v26, %v852_v26  ;;  %v1059_v38 = vmul.f32 %v1027_v25, %v839_v11  ;;  %v855_v40 = vadd.f32 %v6322_v1, %v854_v30  ;;  %v1090_v41 = vmul.f32 0.7978846, %v1058_v28 }
 0x116   : > { %v1000_v34 = vmul.f32 0.044715, %v968_v29  ;;  %v969_v44 = vmul.f32 %v863_v35, %v863_v35  ;;  %v1093_v45 = vmul.f32 0.7978846, %v1061_v31  ;;  %v6340_v50 = vmul.f32 0.5, %v860_v22 }
 0x117   : > { %v998_v39 = vmul.f32 0.044715, %v966_v32  ;;  %v967_v47 = vmul.f32 %v855_v40, %v855_v40  ;;  %v6342_v51 = vmul.f32 0.5, %v852_v26  ;;  %5638 = vtanh.f32 %v1092_v37 }
 0x118   : > { %v1032_v43 = vadd.f32 1.0, %v1000_v34  ;;  %v1001_v52 = vmul.f32 0.044715, %v969_v44  ;;  %v1091_v55 = vmul.f32 0.7978846, %v1059_v38  ;;  %5640 = vtanh.f32 %v1090_v41 }
 0x119   : > { %v1030_v46 = vadd.f32 1.0, %v998_v39  ;;  %v5253_v48 = vpop.f32.mrb[8].mxu0  ;;  %v999_v56 = vmul.f32 0.044715, %v967_v47  ;;  %5642 = vtanh.f32 %v1093_v45  ;;  %v6346_v4 = vmul.f32 0.5, %v863_v35 }
 0x11a   : > { %v876_v53 = vadd.f32 %v5253_v48, %v6322_v1  ;;  %v867_v54 = vpop.f32.mrb[9].mxu0  ;;  %v1064_v59 = vmul.f32 %v1032_v43, %v860_v22  ;;  %v1033_v60 = vadd.f32 1.0, %v1001_v52  ;;  %5644 = vtanh.f32 %v1091_v55 }
 0x11b   : > { %v868_v57 = vadd.f32 %v6322_v1, %v867_v54  ;;  %v5254_v58 = vpop.f32.mrb[10].mxu0  ;;  %v1062_v63 = vmul.f32 %v1030_v46, %v852_v26  ;;  %v1031_v0 = vadd.f32 1.0, %v999_v56  ;;  %v6350_v11 = vmul.f32 0.5, %v855_v40 }
 0x11c   : > { %v972_v61 = vmul.f32 %v876_v53, %v876_v53  ;;  %v870_v62 = vpop.f32.mrb[11].mxu0  ;;  %v1065_v3 = vmul.f32 %v1033_v60, %v863_v35  ;;  %v879_v6 = vadd.f32 %v5254_v58, %v6322_v1  ;;  %v1096_v10 = vmul.f32 0.7978846, %v1064_v59 }
 0x11d   : > { %v970_v2 = vmul.f32 %v868_v57, %v868_v57  ;;  %v1063_v7 = vmul.f32 %v1031_v0, %v855_v40  ;;  %v871_v9 = vadd.f32 %v6322_v1, %v870_v62  ;;  %v1094_v14 = vmul.f32 0.7978846, %v1062_v63 }
 0x11e   : > { %v1004_v5 = vmul.f32 0.044715, %v972_v61  ;;  %v973_v13 = vmul.f32 %v879_v6, %v879_v6  ;;  %v6352_v15 = vmul.f32 0.5, %v876_v53  ;;  %v1097_v19 = vmul.f32 0.7978846, %v1065_v3 }
 0x11f   : > { %v1002_v8 = vmul.f32 0.044715, %v970_v2  ;;  %v971_v17 = vmul.f32 %v871_v9, %v871_v9  ;;  %v6354_v20 = vmul.f32 0.5, %v868_v57  ;;  %v1095_v24 = vmul.f32 0.7978846, %v1063_v7 }
 0x120   : > { %v1036_v12 = vadd.f32 1.0, %v1004_v5  ;;  %v1005_v21 = vmul.f32 0.044715, %v973_v13  ;;  %5646 = vtanh.f32 %v1096_v10  ;;  %v6360_v35 = vmul.f32 0.5, %v879_v6 }
 0x121   : > { %v1034_v16 = vadd.f32 1.0, %v1002_v8  ;;  %v5257_v18 = vpop.f32.mrb[12].mxu0  ;;  %v1003_v26 = vmul.f32 0.044715, %v971_v17  ;;  %v6358_v34 = vpop.eup %5638  ;;  %5648 = vtanh.f32 %v1094_v14  ;;  %v6362_v40 = vmul.f32 0.5, %v871_v9 }
 0x122   : > { %v892_v22 = vadd.f32 %v5257_v18, %v6322_v1  ;;  %v883_v23 = vpop.f32.mrb[13].mxu0  ;;  %v1068_v25 = vmul.f32 %v1036_v12, %v876_v53  ;;  %v1037_v30 = vadd.f32 1.0, %v1005_v21  ;;  %v5641_v39 = vpop.eup %5640  ;;  %5650 = vtanh.f32 %v1097_v19 }
 0x123   : > { %v884_v27 = vadd.f32 %v6322_v1, %v883_v23  ;;  %v5258_v28 = vpop.f32.mrb[14].mxu0  ;;  %v1066_v29 = vmul.f32 %v1034_v16, %v868_v57  ;;  %v1035_v37 = vadd.f32 1.0, %v1003_v26  ;;  %v6365_v44 = vpop.eup %5642  ;;  %5652 = vtanh.f32 %v1095_v24 }
 0x124   : > { %v976_v31 = vmul.f32 %v892_v22, %v892_v22  ;;  %v886_v32 = vpop.f32.mrb[15].mxu0  ;;  %v895_v43 = vadd.f32 %v5258_v28, %v6322_v1  ;;  %v1100_v45 = vmul.f32 0.7978846, %v1068_v25  ;;  %v1069_v52 = vmul.f32 %v1037_v30, %v879_v6  ;;  %v5645_v55 = vpop.eup %5644 }
 0x125   : > { %v974_v38 = vmul.f32 %v884_v27, %v884_v27  ;;  %v887_v47 = vadd.f32 %v6322_v1, %v886_v32  ;;  %v1098_v48 = vmul.f32 0.7978846, %v1066_v29  ;;  %v1067_v56 = vmul.f32 %v1035_v37, %v871_v9 }
 0x126   : > { %v1008_v41 = vmul.f32 0.044715, %v976_v31  ;;  %v977_v54 = vmul.f32 %v895_v43, %v895_v43  ;;  %v6368_v57 = vmul.f32 0.5, %v892_v22  ;;  %v6370_v62 = vmul.f32 0.5, %v884_v27 }
 0x127   : > { %v1006_v46 = vmul.f32 0.044715, %v974_v38  ;;  %v975_v59 = vmul.f32 %v887_v47, %v887_v47  ;;  %5654 = vtanh.f32 %v1100_v45  ;;  %v1101_v8 = vmul.f32 0.7978846, %v1069_v52 }
 0x128   : > { %v1040_v53 = vadd.f32 1.0, %v1008_v41  ;;  %v1009_v63 = vmul.f32 0.044715, %v977_v54  ;;  %5656 = vtanh.f32 %v1098_v48  ;;  %v1099_v13 = vmul.f32 0.7978846, %v1067_v56 }
 0x129   : > { %v1038_v58 = vadd.f32 1.0, %v1006_v46  ;;  %v5261_v60 = vpop.f32.mrb[16].mxu0  ;;  %v1007_v5 = vmul.f32 0.044715, %v975_v59  ;;  %v6376_v14 = vmul.f32 0.5, %v895_v43  ;;  %v1186_v23 = vadd.f32 1.0, %v5641_v39 }
 0x12a   : > { %v1072_v61 = vmul.f32 %v1040_v53, %v892_v22  ;;  %v908_v0 = vadd.f32 %v5261_v60, %v6322_v1  ;;  %v899_v2 = vpop.f32.mrb[17].mxu0  ;;  %v1041_v9 = vadd.f32 1.0, %v1009_v63  ;;  %v6380_v18 = vpop.eup %5646  ;;  %v1187_v28 = vadd.f32 1.0, %v5645_v55 }
 0x12b   : > { %v1070_v3 = vmul.f32 %v1038_v58, %v884_v27  ;;  %v6374_v6 = vadd.f32 %v6322_v1, %v899_v2  ;;  %v5262_v7 = vpop.f32.mrb[18].mxu0  ;;  %v1039_v16 = vadd.f32 1.0, %v1007_v5  ;;  %v5649_v24 = vpop.eup %5648  ;;  %v6382_v27 = vmul.f32 0.5, %v887_v47 }
 0x12c   : > { %v980_v10 = vmul.f32 %v908_v0, %v908_v0  ;;  %v902_v12 = vpop.f32.mrb[19].mxu0  ;;  %v1104_v19 = vmul.f32 0.7978846, %v1072_v61  ;;  %v1073_v21 = vmul.f32 %v1041_v9, %v895_v43  ;;  %v6384_v29 = vpop.eup %5650  ;;  %5658 = vtanh.f32 %v1101_v8 }
 0x12d   : > { %v978_v17 = vmul.f32 %v6374_v6, %v6374_v6  ;;  %v1102_v25 = vmul.f32 0.7978846, %v1070_v3  ;;  %v1071_v26 = vmul.f32 %v1039_v16, %v887_v47  ;;  %v911_v32 = vadd.f32 %v5262_v7, %v6322_v1  ;;  %v5653_v37 = vpop.eup %5652 }
 0x12e   : > { %v1012_v22 = vmul.f32 0.044715, %v980_v10  ;;  %5660 = vtanh.f32 %v1099_v13  ;;  %v1218_v38 = vmul.f32 %v1186_v23, %v6333_v36  ;;  %v1219_v41 = vmul.f32 %v1187_v28, %v6338_v49 }
 0x12f   : > { %v1010_v31 = vmul.f32 0.044715, %v978_v17  ;;  %v1188_v39 = vadd.f32 1.0, %v6358_v34  ;;  %5662 = vtanh.f32 %v1104_v19  ;;  %v1105_v45 = vmul.f32 0.7978846, %v1073_v21 }
 0x130   : > { %v1044_v30 = vadd.f32 1.0, %v1012_v22  ;;  %v6390_v46 = vmul.f32 0.5, %v908_v0  ;;  %v981_v47 = vmul.f32 %v911_v32, %v911_v32  ;;  %5664 = vtanh.f32 %v1102_v25 }
 0x131   : > { %v5265_v43 = vpop.f32.mrb[20].mxu0  ;;  %v1103_v52 = vmul.f32 0.7978846, %v1071_v26  ;;  %v1267_v53 = vpack.c.bf16 %v1219_v41, %v1218_v38  ;;  %v1189_v54 = vadd.f32 1.0, %v6365_v44  ;;  %v1042_v58 = vadd.f32 1.0, %v1010_v31  ;;  %v6394_v34 = vpop.eup %5654 }
 0x132   : > { %v915_v48 = vpop.f32.mrb[21].mxu0  ;;  %v1076_v56 = vmul.f32 %v1044_v30, %v908_v0  ;;  %v1013_v36 = vmul.f32 0.044715, %v981_v47  ;;  %v903_v49 = vadd.f32 %v6322_v1, %v902_v12  ;;  %v1220_v60 = vmul.f32 %v1188_v39, %v6330_v33  ;;  %v6400_v3 = vpop.eup %5656 }
 0x133   : > { %v5266_v55 = vpop.f32.mrb[22].mxu0  ;;  %5291 = vmatprep.mubr.bf16.mxu1 %v1267_v53  ;;  %v1221_v61 = vmul.f32 %v1189_v54, %v6336_v42  ;;  %v924_v63 = vadd.f32 %v5265_v43, %v6322_v1  ;;  %v916_v2 = vadd.f32 %v6322_v1, %v915_v48  ;;  %5666 = vtanh.f32 %v1105_v45 }
 0x134   : > { %v918_v59 = vpop.f32.mrb[23].mxu0  ;;  %v6403_v44 = vmul.f32 0.5, %v6374_v6  ;;  %v1045_v0 = vadd.f32 1.0, %v1013_v36  ;;  %v979_v5 = vmul.f32 %v903_v49, %v903_v49  ;;  %5668 = vtanh.f32 %v1103_v52 }
 0x135   : > { %v6405_v7 = vmul.f32 0.5, %v911_v32  ;;  %v1268_v8 = vpack.c.bf16 %v1221_v61, %v1220_v60  ;;  %v984_v9 = vmul.f32 %v924_v63, %v924_v63  ;;  %v1108_v33 = vmul.f32 0.7978846, %v1076_v56 }
 0x136   : > { %v1074_v42 = vmul.f32 %v1042_v58, %v6374_v6  ;;  %v1011_v10 = vmul.f32 0.044715, %v979_v5  ;;  %v982_v12 = vmul.f32 %v916_v2, %v916_v2  ;;  %v1190_v16 = vadd.f32 1.0, %v5649_v24  ;;  %v6411_v22 = vpop.eup %5658 }
 0x137   : > { %5292 = vmatmul.mubr.bf16.vlgmr.msra.gmra.mrb[0].mxu1 %v1268_v8  ;;  %v1016_v13 = vmul.f32 0.044715, %v984_v9  ;;  %v1191_v17 = vadd.f32 1.0, %v5653_v37  ;;  %v6409_v19 = vadd.f32 %v5266_v55, %v6322_v1  ;;  %v1077_v23 = vmul.f32 %v1045_v0, %v911_v32 }
 0x138   : > { %v1043_v25 = vadd.f32 1.0, %v1011_v10  ;;  %v1014_v26 = vmul.f32 0.044715, %v982_v12  ;;  %v1192_v28 = vadd.f32 1.0, %v6380_v18  ;;  %v5661_v30 = vpop.eup %5660  ;;  %v1222_v6 = vmul.f32 %v1190_v16, %v6342_v51 }
 0x139   : > { %v5269_v21 = vpop.f32.mrb[24].mxu0  ;;  %v1048_v31 = vadd.f32 1.0, %v1016_v13  ;;  %v1223_v38 = vmul.f32 %v1191_v17, %v6350_v11  ;;  %v985_v24 = vmul.f32 %v6409_v19, %v6409_v19  ;;  %v6418_v41 = vpop.eup %5662  ;;  %5670 = vtanh.f32 %v1108_v33 }
 0x13a   : > { %v931_v37 = vpop.f32.mrb[25].mxu0  ;;  %v1106_v39 = vmul.f32 0.7978846, %v1074_v42  ;;  %v1075_v43 = vmul.f32 %v1043_v25, %v903_v49  ;;  %v1046_v32 = vadd.f32 1.0, %v1014_v26  ;;  %v6420_v47 = vpop.eup %5664  ;;  %v1193_v51 = vadd.f32 1.0, %v6384_v29 }
 0x13b   : > { %v5270_v45 = vpop.f32.mrb[26].mxu0  ;;  %v1080_v18 = vmul.f32 %v1048_v31, %v924_v63  ;;  %v1269_v48 = vpack.c.bf16 %v1223_v38, %v1222_v6  ;;  %v1017_v52 = vmul.f32 0.044715, %v985_v24  ;;  %v1109_v11 = vmul.f32 0.7978846, %v1077_v23 }
 0x13c   : > { %v934_v53 = vpop.f32.mrb[27].mxu0  ;;  %v1107_v54 = vmul.f32 0.7978846, %v1075_v43  ;;  %v6423_v55 = vmul.f32 0.5, %v903_v49  ;;  %v6426_v56 = vadd.f32 %v6322_v1, %v918_v59  ;;  %v1224_v36 = vmul.f32 %v1192_v28, %v6340_v50 }
 0x13d   : > { %5295 = vmatprep.mubr.bf16.mxu1 %v1269_v48  ;;  %v1049_v58 = vadd.f32 1.0, %v1017_v52  ;;  %v1225_v60 = vmul.f32 %v1193_v51, %v6346_v4  ;;  %v6431_v61 = vadd.f32 %v5269_v21, %v6322_v1  ;;  %v6433_v0 = vpop.eup %5666  ;;  %5672 = vtanh.f32 %v1106_v39 }
 0x13e   : > { %v6435_v29 = vmul.f32 0.5, %v924_v63  ;;  %v1078_v5 = vmul.f32 %v1046_v32, %v916_v2  ;;  %v983_v49 = vmul.f32 %v6426_v56, %v6426_v56  ;;  %v5669_v59 = vpop.eup %5668  ;;  %v1112_v8 = vmul.f32 0.7978846, %v1080_v18 }
 0x13f   : > { %v6439_v9 = vmul.f32 0.5, %v916_v2  ;;  %v1270_v33 = vpack.c.bf16 %v1225_v60, %v1224_v36  ;;  %v988_v50 = vmul.f32 %v6431_v61, %v6431_v61  ;;  %5674 = vtanh.f32 %v1109_v11 }
 0x140   : > { %v1081_v42 = vmul.f32 %v1049_v58, %v6409_v19  ;;  %v1015_v10 = vmul.f32 0.044715, %v983_v49  ;;  %v6445_v63 = vadd.f32 %v6322_v1, %v931_v37  ;;  %5676 = vtanh.f32 %v1107_v54 }
 0x141   : > { %v5273_v4 = vpop.f32.mrb[28].mxu0  ;;  %5296 = vmatmul.mubr.bf16.gmra.mrb[4].mxu1 %v1270_v33  ;;  %v1020_v13 = vmul.f32 0.044715, %v988_v50  ;;  %v1194_v16 = vadd.f32 1.0, %v6400_v3  ;;  %v1195_v2 = vadd.f32 1.0, %v5661_v30  ;;  %v6451_v25 = vadd.f32 %v5270_v45, %v6322_v1 }
 0x142   : > { %v947_v12 = vpop.f32.mrb[29].mxu0  ;;  %v1110_v17 = vmul.f32 0.7978846, %v1078_v5  ;;  %v1047_v21 = vadd.f32 1.0, %v1015_v10  ;;  %v986_v23 = vmul.f32 %v6445_v63, %v6445_v63  ;;  %5678 = vtanh.f32 %v1112_v8 }
 0x143   : > { %v5274_v26 = vpop.f32.mrb[30].mxu0  ;;  %v1052_v28 = vadd.f32 1.0, %v1020_v13  ;;  %v1226_v31 = vmul.f32 %v1194_v16, %v6354_v20  ;;  %v1227_v6 = vmul.f32 %v1195_v2, %v6362_v40  ;;  %v6457_v24 = vpop.eup %5670  ;;  %v1113_v3 = vmul.f32 0.7978846, %v1081_v42 }
 0x144   : > { %v6455_v38 = vpop.f32.mrb[31].mxu0  ;;  %v1079_v30 = vmul.f32 %v1047_v21, %v6426_v56  ;;  %v1018_v37 = vmul.f32 0.044715, %v986_v23  ;;  %v989_v39 = vmul.f32 %v6451_v25, %v6451_v25  ;;  %v1196_v45 = vadd.f32 1.0, %v6394_v34 }
 0x145   : > { %v1084_v43 = vmul.f32 %v1052_v28, %v6431_v61  ;;  %v1271_v32 = vpack.c.bf16 %v1227_v6, %v1226_v31  ;;  %v1197_v20 = vadd.f32 1.0, %v6411_v22  ;;  %v6466_v52 = vadd.f32 %v6322_v1, %v934_v53 }
 0x146   : > { %v1111_v18 = vmul.f32 0.7978846, %v1079_v30  ;;  %v1050_v40 = vadd.f32 1.0, %v1018_v37  ;;  %v1021_v48 = vmul.f32 0.044715, %v989_v39  ;;  %5680 = vtanh.f32 %v1110_v17 }
 0x147   : > { %5299 = vmatprep.mubr.bf16.mxu1 %v1271_v32  ;;  %v1228_v51 = vmul.f32 %v1196_v45, %v6352_v15  ;;  %v1229_v11 = vmul.f32 %v1197_v20, %v6360_v35  ;;  %v6471_v54 = vadd.f32 %v5273_v4, %v6322_v1  ;;  %v5673_v58 = vpop.eup %5672  ;;  %v1116_v36 = vmul.f32 0.7978846, %v1084_v43 }
 0x148   : > { %v1082_v34 = vmul.f32 %v1050_v40, %v6445_v63  ;;  %v1053_v22 = vadd.f32 1.0, %v1021_v48  ;;  %v987_v60 = vmul.f32 %v6466_v52, %v6466_v52  ;;  %v6477_v53 = vmul.f32 0.5, %v6409_v19 }
 0x149   : > { %5682 = vtanh.f32 %v1111_v18  ;;  %v1272_v5 = vpack.c.bf16 %v1229_v11, %v1228_v51  ;;  %v992_v15 = vmul.f32 %v6471_v54, %v6471_v54  ;;  %v5675_v35 = vpop.eup %5674  ;;  %v6483_v42 = vadd.f32 %v6322_v1, %v947_v12 }
 0x14a   : > { %5684 = vtanh.f32 %v1113_v3  ;;  %v1114_v49 = vmul.f32 0.7978846, %v1082_v34  ;;  %v1085_v8 = vmul.f32 %v1053_v22, %v6451_v25  ;;  %v1019_v33 = vmul.f32 0.044715, %v987_v60  ;;  %v5677_v50 = vpop.eup %5676 }
 0x14b   : > { %5300 = vmatmul.mubr.bf16.gmra.mrb[8].mxu1 %v1272_v5  ;;  %v1024_v4 = vmul.f32 0.044715, %v992_v15  ;;  %v1198_v19 = vadd.f32 1.0, %v6420_v47  ;;  %v1199_v10 = vadd.f32 1.0, %v5669_v59  ;;  %5686 = vtanh.f32 %v1116_v36 }
 0x14c   : > { %v1117_v13 = vmul.f32 0.7978846, %v1085_v8  ;;  %v1051_v16 = vadd.f32 1.0, %v1019_v33  ;;  %v6487_v2 = vadd.f32 %v5274_v26, %v6322_v1  ;;  %v5679_v17 = vpop.eup %5678  ;;  %5688 = vtanh.f32 %v1114_v49 }
 0x14d   : > { %v1056_v21 = vadd.f32 1.0, %v1024_v4  ;;  %v990_v23 = vmul.f32 %v6483_v42, %v6483_v42  ;;  %v1230_v28 = vmul.f32 %v1198_v19, %v6370_v62  ;;  %v1231_v47 = vmul.f32 %v1199_v10, %v6382_v27 }
 0x14e   : > { %5690 = vtanh.f32 %v1117_v13  ;;  %v1083_v12 = vmul.f32 %v1051_v16, %v6466_v52  ;;  %v993_v59 = vmul.f32 %v6487_v2, %v6487_v2  ;;  %v1143_v31 = vmul.f32 0.5, %v6426_v56 }
 0x14f   : > { %v1088_v26 = vmul.f32 %v1056_v21, %v6471_v54  ;;  %v1022_v6 = vmul.f32 0.044715, %v990_v23  ;;  %v1200_v3 = vadd.f32 1.0, %v6418_v41  ;;  %v1273_v37 = vpack.c.bf16 %v1231_v47, %v1230_v28 }
 0x150   : > { %v1115_v30 = vmul.f32 0.7978846, %v1083_v12  ;;  %v1025_v39 = vmul.f32 0.044715, %v993_v59  ;;  %v1201_v62 = vadd.f32 1.0, %v6433_v0  ;;  %v5681_v43 = vpop.eup %5680  ;;  %v6503_v20 = vadd.f32 %v6322_v1, %v6455_v38 }
 0x151   : > { %v1120_v32 = vmul.f32 0.7978846, %v1088_v26  ;;  %v1054_v45 = vadd.f32 1.0, %v1022_v6  ;;  %v1232_v27 = vmul.f32 %v1200_v3, %v6368_v57  ;;  %5303 = vmatprep.mubr.bf16.mxu1 %v1273_v37  ;;  %v1202_v41 = vadd.f32 1.0, %v5673_v58 }
 0x152   : > { %5692 = vtanh.f32 %v1115_v30  ;;  %v1057_v56 = vadd.f32 1.0, %v1025_v39  ;;  %v1233_v18 = vmul.f32 %v1201_v62, %v6376_v14  ;;  %v1148_v48 = vmul.f32 0.5, %v6431_v61 }
 0x153   : > { %v5683_v40 = vpop.eup %5682  ;;  %5694 = vtanh.f32 %v1120_v32  ;;  %v1086_v0 = vmul.f32 %v1054_v45, %v6483_v42  ;;  %v991_v51 = vmul.f32 %v6503_v20, %v6503_v20  ;;  %v1203_v38 = vadd.f32 1.0, %v5677_v50 }
 0x154   : > { %v5685_v57 = vpop.eup %5684  ;;  %v1089_v11 = vmul.f32 %v1057_v56, %v6487_v2  ;;  %v1274_v1 = vpack.c.bf16 %v1233_v18, %v1232_v27  ;;  %v1234_v36 = vmul.f32 %v1202_v41, %v6403_v44  ;;  %v1204_v14 = vadd.f32 1.0, %v6457_v24 }
 0x155   : > { %v1118_v34 = vmul.f32 0.7978846, %v1086_v0  ;;  %v1023_v22 = vmul.f32 0.044715, %v991_v51  ;;  %v1205_v58 = vadd.f32 1.0, %v5675_v35  ;;  %v5687_v60 = vpop.eup %5686  ;;  %v1235_v5 = vmul.f32 %v1203_v38, %v6423_v55  ;;  %v5525_v38 = vld [vmem:[%s8197_s9] sm:$0xff]  }
 0x156   : > { %v1121_v61 = vmul.f32 0.7978846, %v1089_v11  ;;  %5304 = vmatmul.mubr.bf16.gmra.mrb[12].mxu1 %v1274_v1  ;;  %v1206_v15 = vadd.f32 1.0, %v5681_v43  ;;  %v1207_v49 = vadd.f32 1.0, %v5683_v40  ;;  %v5689_v8 = vpop.eup %5688  ;;  %v1236_v4 = vmul.f32 %v1204_v14, %v6390_v46  ;;  %5371 = vmatprep.subr.bf16.mxu1 %v5525_v38  ;;  %v6554_v14 = vld [vmem:[%s8261_s0] ss:$0 sm:$0xff] }
 0x157   : > { %5696 = vtanh.f32 %v1118_v34  ;;  %v1055_v33 = vadd.f32 1.0, %v1023_v22  ;;  %v1237_v50 = vmul.f32 %v1205_v58, %v6405_v7  ;;  %v1275_v19 = vpack.c.bf16 %v1235_v5, %v1234_v36  ;;  %v5526_v36 = vld [vmem:[%s8197_s9 + $0x8] sm:$0xff]   ;;  %5372 = vmatpush3.bf16.msra.mxu1 %v5525_v38  ;;  %v5527_v34 = vld [vmem:[%s8197_s9 + $0x10] sm:$0xff]   ;;  %v5528_v22 = vld [vmem:[%s8197_s9 + $0x18] sm:$0xff]  }
 0x158   : > { %v5691_v44 = vpop.eup %5690  ;;  %5698 = vtanh.f32 %v1121_v61  ;;  %v1238_v24 = vmul.f32 %v1206_v15, %v6439_v9  ;;  %v1239_v35 = vmul.f32 %v1207_v49, %v1143_v31  ;;  %v1208_v16 = vadd.f32 1.0, %v5679_v17  ;;  %5373 = vmatprep.subr.bf16.mxu1 %v5526_v36 }
 0x159   : > { %v1087_v10 = vmul.f32 %v1055_v33, %v6503_v20  ;;  %v1276_v13 = vpack.c.bf16 %v1237_v50, %v1236_v4  ;;  %v1209_v55 = vadd.f32 1.0, %v5685_v57  ;;  %v1149_v21 = vmul.f32 0.5, %v6451_v25  ;;  %5307 = vmatprep.mubr.bf16.mxu1 %v1275_v19 }
 0x15a   : > { %v1277_v23 = vpack.c.bf16 %v1239_v35, %v1238_v24  ;;  %v1212_v28 = vadd.f32 1.0, %v5687_v60  ;;  %v1213_v12 = vadd.f32 1.0, %v5691_v44  ;;  %v1240_v7 = vmul.f32 %v1208_v16, %v6435_v29 }
 0x15b   : > { %v1119_v46 = vmul.f32 0.7978846, %v1087_v10  ;;  %v1241_v47 = vmul.f32 %v1209_v55, %v6477_v53  ;;  %v1210_v59 = vadd.f32 1.0, %v5689_v8  ;;  %v1146_v9 = vmul.f32 0.5, %v6445_v63  ;;  %5374 = vmatpush3.bf16.msra.mxu1 %v5526_v36 }
 0x15c   : > { %v5693_v26 = vpop.eup %5692  ;;  %v1244_v31 = vmul.f32 %v1212_v28, %v1148_v48  ;;  %v1245_v6 = vmul.f32 %v1213_v12, %v1149_v21  ;;  %v1147_v17 = vmul.f32 0.5, %v6466_v52  ;;  %v1152_v45 = vmul.f32 0.5, %v6471_v54  ;;  %v5521_v54 = vld [vmem:[%s8259_s7 + $0x20] sm:$0xff]   ;;  %5375 = vmatprep.subr.bf16.mxu1 %v5527_v34 }
 0x15d   : > { %v5695_v3 = vpop.eup %5694  ;;  %5700 = vtanh.f32 %v1119_v46  ;;  %v1278_v25 = vpack.c.bf16 %v1241_v47, %v1240_v7  ;;  %v1211_v30 = vadd.f32 1.0, %v5693_v26  ;;  %v1242_v39 = vmul.f32 %v1210_v59, %v1146_v9  ;;  %5331 = vmatprep.subr.bf16.mxu0 %v5521_v54 }
 0x15e   : > { %5308 = vmatmul.mubr.bf16.gmra.mrb[16].mxu1 %v1276_v13  ;;  %v1280_v37 = vpack.c.bf16 %v1245_v6, %v1244_v31  ;;  %v1216_v53 = vadd.f32 1.0, %v5695_v3  ;;  %v1153_v63 = vmul.f32 0.5, %v6487_v2  ;;  %v1150_v48 = vmul.f32 0.5, %v6483_v42  ;;  %5332 = vmatpush3.bf16.msra.mxu0 %v5521_v54  ;;  %v5522_v2 = vld [vmem:[%s8259_s7 + $0x28] sm:$0xff]   ;;  %v5523_v42 = vld [vmem:[%s8259_s7 + $0x30] sm:$0xff]  }
 0x15f   : > { %5311 = vmatprep.mubr.bf16.mxu1 %v1277_v23  ;;  %v1243_v62 = vmul.f32 %v1211_v30, %v1147_v17  ;;  %v1151_v0 = vmul.f32 0.5, %v6503_v20  ;;  %5333 = vmatprep.subr.bf16.mxu0 %v5522_v2  ;;  %v5524_v20 = vld [vmem:[%s8259_s7 + $0x38] sm:$0xff]  }
 0x160   : > { %v1248_v56 = vmul.f32 %v1216_v53, %v1152_v45  ;;  %5376 = vmatpush3.bf16.msra.mxu1 %v5527_v34 }
 0x161   : > { %v5697_v29 = vpop.eup %5696  ;;  %v1279_v43 = vpack.c.bf16 %v1243_v62, %v1242_v39  ;;  %5377 = vmatprep.subr.bf16.mxu1 %v5528_v22 }
 0x162   : > { %v5699_v32 = vpop.eup %5698  ;;  %v1214_v52 = vadd.f32 1.0, %v5697_v29  ;;  %5334 = vmatpush3.bf16.msra.mxu0 %v5522_v2 }
 0x163   : > { %v1217_v27 = vadd.f32 1.0, %v5699_v32  ;;  %5335 = vmatprep.subr.bf16.mxu0 %v5523_v42 }
 0x164   : > { %v1246_v57 = vmul.f32 %v1214_v52, %v1150_v48  ;;  %5378 = vmatpush3.bf16.msra.mxu1 %v5528_v22 }
 0x165   : > { %v1249_v18 = vmul.f32 %v1217_v27, %v1153_v63 }
 0x166   : > { %5312 = vmatmul.mubr.bf16.gmra.mrb[20].mxu1 %v1278_v25  ;;  %5336 = vmatpush3.bf16.msra.mxu0 %v5523_v42 }
 0x167   : > { %v5701_v41 = vpop.eup %5700  ;;  %5315 = vmatprep.mubr.bf16.mxu1 %v1279_v43  ;;  %v1282_v40 = vpack.c.bf16 %v1249_v18, %v1248_v56  ;;  %5337 = vmatprep.subr.bf16.mxu0 %v5524_v20 }
 0x168   : > { %v1215_v51 = vadd.f32 1.0, %v5701_v41 }
 0x16a   : > { %v1247_v11 = vmul.f32 %v1215_v51, %v1151_v0  ;;  %5338 = vmatpush3.bf16.msra.mxu0 %v5524_v20 }
 0x16c   : > { %v1281_v1 = vpack.c.bf16 %v1247_v11, %v1246_v57 }
 0x16e   : > { %5316 = vmatmul.mubr.bf16.gmra.mrb[24].mxu1 %v1280_v37 }
 0x16f   : > { %5319 = vmatprep.mubr.bf16.mxu1 %v1281_v1 }
 0x176   : > { %5320 = vmatmul.mubr.bf16.gmra.mrb[28].mxu1 %v1282_v40 }
 0x20a   : > { %v5293_v58 = vpop.f32.mrb[0].mxu1 }
 0x20b   : > { %v1380_v60 = vadd.f32 %v5293_v58, %v6554_v14  ;;  %v1371_v61 = vpop.f32.mrb[1].mxu1 }
 0x20c   : > { %v1372_v5 = vadd.f32 %v6554_v14, %v1371_v61  ;;  %v5294_v15 = vpop.f32.mrb[2].mxu1 }
 0x20d   : > { %v1500_v49 = vmul.f32 %v1380_v60, %v1380_v60  ;;  %v1383_v8 = vadd.f32 %v5294_v15, %v6554_v14  ;;  %v1374_v33 = vpop.f32.mrb[3].mxu1  ;;  %v1660_v51 = vmul.f32 0.5, %v1380_v60 }
 0x20e   : > { %v1498_v4 = vmul.f32 %v1372_v5, %v1372_v5  ;;  %v1375_v50 = vadd.f32 %v6554_v14, %v1374_v33  ;;  %v1658_v42 = vmul.f32 0.5, %v1372_v5 }
 0x20f   : > { %v1532_v44 = vmul.f32 0.044715, %v1500_v49  ;;  %v1501_v19 = vmul.f32 %v1383_v8, %v1383_v8  ;;  %v1661_v61 = vmul.f32 0.5, %v1383_v8 }
 0x210   : > { %v1530_v24 = vmul.f32 0.044715, %v1498_v4  ;;  %v1499_v35 = vmul.f32 %v1375_v50, %v1375_v50  ;;  %v1659_v15 = vmul.f32 0.5, %v1375_v50 }
 0x211   : > { %v1564_v10 = vadd.f32 1.0, %v1532_v44  ;;  %v1533_v13 = vmul.f32 0.044715, %v1501_v19 }
 0x212   : > { %v1562_v16 = vadd.f32 1.0, %v1530_v24  ;;  %v1531_v55 = vmul.f32 0.044715, %v1499_v35 }
 0x213   : > { %v1596_v21 = vmul.f32 %v1564_v10, %v1380_v60  ;;  %v1565_v23 = vadd.f32 1.0, %v1533_v13 }
 0x214   : > { %v1594_v28 = vmul.f32 %v1562_v16, %v1372_v5  ;;  %v1563_v12 = vadd.f32 1.0, %v1531_v55  ;;  %v5297_v46 = vpop.f32.mrb[4].mxu1 }
 0x215   : > { %v1628_v7 = vmul.f32 0.7978846, %v1596_v21  ;;  %v1597_v47 = vmul.f32 %v1565_v23, %v1383_v8  ;;  %v1396_v59 = vadd.f32 %v5297_v46, %v6554_v14  ;;  %v1387_v26 = vpop.f32.mrb[5].mxu1 }
 0x216   : > { %v1626_v9 = vmul.f32 0.7978846, %v1594_v28  ;;  %v1595_v31 = vmul.f32 %v1563_v12, %v1375_v50  ;;  %v6562_v6 = vadd.f32 %v6554_v14, %v1387_v26  ;;  %v5298_v3 = vpop.f32.mrb[6].mxu1 }
 0x217   : > { %5702 = vtanh.f32 %v1628_v7  ;;  %v1629_v17 = vmul.f32 0.7978846, %v1597_v47  ;;  %v1504_v25 = vmul.f32 %v1396_v59, %v1396_v59  ;;  %v1390_v30 = vpop.f32.mrb[7].mxu1  ;;  %v1399_v29 = vadd.f32 %v5298_v3, %v6554_v14 }
 0x218   : > { %5704 = vtanh.f32 %v1626_v9  ;;  %v1627_v37 = vmul.f32 0.7978846, %v1595_v31  ;;  %v1502_v39 = vmul.f32 %v6562_v6, %v6562_v6  ;;  %v1391_v43 = vadd.f32 %v6554_v14, %v1390_v30 }
 0x219   : > { %5706 = vtanh.f32 %v1629_v17  ;;  %v1536_v62 = vmul.f32 0.044715, %v1504_v25  ;;  %v1505_v32 = vmul.f32 %v1399_v29, %v1399_v29  ;;  %v6571_v4 = vmul.f32 0.5, %v1396_v59 }
 0x21a   : > { %5708 = vtanh.f32 %v1627_v37  ;;  %v1534_v53 = vmul.f32 0.044715, %v1502_v39  ;;  %v1503_v45 = vmul.f32 %v1391_v43, %v1391_v43  ;;  %v6578_v26 = vmul.f32 0.5, %v1399_v29 }
 0x21b   : > { %v1568_v63 = vadd.f32 1.0, %v1536_v62  ;;  %v1537_v56 = vmul.f32 0.044715, %v1505_v32  ;;  %v6580_v39 = vmul.f32 0.5, %v1391_v43 }
 0x21c   : > { %v1566_v27 = vadd.f32 1.0, %v1534_v53  ;;  %v1535_v18 = vmul.f32 0.044715, %v1503_v45 }
 0x21d   : > { %v1600_v57 = vmul.f32 %v1568_v63, %v1396_v59  ;;  %v1569_v11 = vadd.f32 1.0, %v1537_v56  ;;  %v6576_v59 = vmul.f32 0.5, %v6562_v6 }
 0x21e   : > { %v1598_v52 = vmul.f32 %v1566_v27, %v6562_v6  ;;  %v5301_v41 = vpop.f32.mrb[8].mxu1  ;;  %v1567_v40 = vadd.f32 1.0, %v1535_v18 }
 0x21f   : > { %v1412_v48 = vadd.f32 %v5301_v41, %v6554_v14  ;;  %v1403_v0 = vpop.f32.mrb[9].mxu1  ;;  %v1632_v10 = vmul.f32 0.7978846, %v1600_v57  ;;  %v1601_v5 = vmul.f32 %v1569_v11, %v1399_v29 }
 0x220   : > { %v1404_v1 = vadd.f32 %v6554_v14, %v1403_v0  ;;  %v5302_v54 = vpop.f32.mrb[10].mxu1  ;;  %v1630_v20 = vmul.f32 0.7978846, %v1598_v52  ;;  %v1599_v38 = vmul.f32 %v1567_v40, %v1391_v43 }
 0x221   : > { %v5703_v2 = vpop.eup %5702  ;;  %v1508_v36 = vmul.f32 %v1412_v48, %v1412_v48  ;;  %v1406_v34 = vpop.f32.mrb[11].mxu1  ;;  %v1415_v19 = vadd.f32 %v5302_v54, %v6554_v14  ;;  %v1633_v37 = vmul.f32 0.7978846, %v1601_v5  ;;  %v6584_v27 = vmul.f32 0.5, %v1412_v48 }
 0x222   : > { %v5705_v22 = vpop.eup %5704  ;;  %v1724_v58 = vadd.f32 1.0, %v5703_v2  ;;  %v1506_v49 = vmul.f32 %v1404_v1, %v1404_v1  ;;  %v1631_v60 = vmul.f32 0.7978846, %v1599_v38  ;;  %5710 = vtanh.f32 %v1630_v20 }
 0x223   : > { %v5707_v33 = vpop.eup %5706  ;;  %v1540_v44 = vmul.f32 0.044715, %v1508_v36  ;;  %v1509_v21 = vmul.f32 %v1415_v19, %v1415_v19  ;;  %v1407_v50 = vadd.f32 %v6554_v14, %v1406_v34  ;;  %v1722_v46 = vadd.f32 1.0, %v5705_v22 }
 0x224   : > { %v5709_v24 = vpop.eup %5708  ;;  %v1725_v35 = vadd.f32 1.0, %v5707_v33  ;;  %v1538_v13 = vmul.f32 0.044715, %v1506_v49  ;;  %v1756_v16 = vmul.f32 %v1724_v58, %v1660_v51  ;;  %5712 = vtanh.f32 %v1631_v60 }
 0x225   : > { %v1572_v55 = vadd.f32 1.0, %v1540_v44  ;;  %v1541_v12 = vmul.f32 0.044715, %v1509_v21  ;;  %v1723_v7 = vadd.f32 1.0, %v5709_v24  ;;  %v1507_v9 = vmul.f32 %v1407_v50, %v1407_v50 }
 0x226   : > { %v1757_v23 = vmul.f32 %v1725_v35, %v1661_v61  ;;  %v1570_v8 = vadd.f32 1.0, %v1538_v13  ;;  %v1754_v25 = vmul.f32 %v1722_v46, %v1658_v42  ;;  %5714 = vtanh.f32 %v1632_v10 }
 0x227   : > { %v1604_v28 = vmul.f32 %v1572_v55, %v1412_v48  ;;  %v1573_v3 = vadd.f32 1.0, %v1541_v12  ;;  %v1755_v30 = vmul.f32 %v1723_v7, %v1659_v15  ;;  %v1539_v62 = vmul.f32 0.044715, %v1507_v9 }
 0x228   : > { %v1804_v47 = vpack.c.bf16 %v1757_v23, %v1756_v16  ;;  %v1602_v31 = vmul.f32 %v1570_v8, %v1404_v1  ;;  %v6586_v0 = vmul.f32 0.5, %v1404_v1  ;;  %5716 = vtanh.f32 %v1633_v37 }
 0x229   : > { %v5305_v17 = vpop.f32.mrb[12].mxu1  ;;  %v1636_v45 = vmul.f32 0.7978846, %v1604_v28  ;;  %v1803_v29 = vpack.c.bf16 %v1755_v30, %v1754_v25  ;;  %v1605_v56 = vmul.f32 %v1573_v3, %v1415_v19  ;;  %v1571_v18 = vadd.f32 1.0, %v1539_v62 }
 0x22a   : > { %v1428_v53 = vadd.f32 %v5305_v17, %v6554_v14  ;;  %v1419_v32 = vpop.f32.mrb[13].mxu1  ;;  %v1634_v40 = vmul.f32 0.7978846, %v1602_v31  ;;  %v6589_v57 = vmul.f32 0.5, %v1415_v19  ;;  %v6592_v2 = vmul.f32 0.5, %v1407_v50 }
 0x22b   : > { %v1420_v6 = vadd.f32 %v6554_v14, %v1419_v32  ;;  %v5306_v63 = vpop.f32.mrb[14].mxu1  ;;  %5339 = vmatprep.mubr.bf16.mxu0 %v1803_v29  ;;  %5718 = vtanh.f32 %v1636_v45  ;;  %v1637_v1 = vmul.f32 0.7978846, %v1605_v56  ;;  %v1603_v36 = vmul.f32 %v1571_v18, %v1407_v50 }
 0x22c   : > { %v1512_v52 = vmul.f32 %v1428_v53, %v1428_v53  ;;  %v1422_v41 = vpop.f32.mrb[15].mxu1  ;;  %v1431_v51 = vadd.f32 %v5306_v63, %v6554_v14  ;;  %5340 = vmatmul.mubr.bf16.vlgmr.msra.gmra.mrb[32].mxu0 %v1804_v47  ;;  %v5711_v48 = vpop.eup %5710  ;;  %5720 = vtanh.f32 %v1634_v40  ;;  %v6594_v58 = vmul.f32 0.5, %v1428_v53 }
 0x22d   : > { %v1510_v43 = vmul.f32 %v1420_v6, %v1420_v6  ;;  %v1423_v54 = vadd.f32 %v6554_v14, %v1422_v41  ;;  %v6596_v60 = vmul.f32 0.5, %v1420_v6  ;;  %v1726_v13 = vadd.f32 1.0, %v5711_v48 }
 0x22e   : > { %v1544_v11 = vmul.f32 0.044715, %v1512_v52  ;;  %v1513_v20 = vmul.f32 %v1431_v51, %v1431_v51  ;;  %v5713_v38 = vpop.eup %5712  ;;  %5722 = vtanh.f32 %v1637_v1  ;;  %v1635_v55 = vmul.f32 0.7978846, %v1603_v36 }
 0x22f   : > { %v1542_v42 = vmul.f32 0.044715, %v1510_v43  ;;  %v1511_v22 = vmul.f32 %v1423_v54, %v1423_v54  ;;  %v1727_v16 = vadd.f32 1.0, %v5713_v38  ;;  %v6600_v28 = vmul.f32 0.5, %v1431_v51 }
 0x230   : > { %v1576_v34 = vadd.f32 1.0, %v1544_v11  ;;  %v1545_v15 = vmul.f32 0.044715, %v1513_v20  ;;  %v5715_v50 = vpop.eup %5714  ;;  %v6602_v46 = vmul.f32 0.5, %v1423_v54  ;;  %v1758_v30 = vmul.f32 %v1726_v13, %v6576_v59 }
 0x231   : > { %v1574_v61 = vadd.f32 1.0, %v1542_v42  ;;  %v5309_v49 = vpop.f32.mrb[16].mxu1  ;;  %v1543_v44 = vmul.f32 0.044715, %v1511_v22  ;;  %v1759_v37 = vmul.f32 %v1727_v16, %v6580_v39  ;;  %5724 = vtanh.f32 %v1635_v55 }
 0x232   : > { %v1608_v33 = vmul.f32 %v1576_v34, %v1428_v53  ;;  %v1444_v19 = vadd.f32 %v5309_v49, %v6554_v14  ;;  %v1435_v24 = vpop.f32.mrb[17].mxu1  ;;  %v1577_v35 = vadd.f32 1.0, %v1545_v15  ;;  %v5717_v62 = vpop.eup %5716  ;;  %v1728_v13 = vadd.f32 1.0, %v5715_v50 }
 0x233   : > { %v1436_v10 = vadd.f32 %v6554_v14, %v1435_v24  ;;  %v5310_v5 = vpop.f32.mrb[18].mxu1  ;;  %v1606_v21 = vmul.f32 %v1574_v61, %v1420_v6  ;;  %v1575_v12 = vadd.f32 1.0, %v1543_v44  ;;  %v1805_v42 = vpack.c.bf16 %v1759_v37, %v1758_v30 }
 0x234   : > { %v1516_v23 = vmul.f32 %v1444_v19, %v1444_v19  ;;  %v1438_v8 = vpop.f32.mrb[19].mxu1  ;;  %v1640_v47 = vmul.f32 0.7978846, %v1608_v33  ;;  %v1609_v9 = vmul.f32 %v1577_v35, %v1431_v51  ;;  %v1447_v3 = vadd.f32 %v5310_v5, %v6554_v14 }
 0x235   : > { %v1514_v7 = vmul.f32 %v1436_v10, %v1436_v10  ;;  %v1439_v25 = vadd.f32 %v6554_v14, %v1438_v8  ;;  %v1638_v53 = vmul.f32 0.7978846, %v1606_v21  ;;  %v6608_v6 = vpop.eup %5718  ;;  %v1607_v63 = vmul.f32 %v1575_v12, %v1423_v54  ;;  %5343 = vmatprep.mubr.bf16.mxu0 %v1805_v42 }
 0x236   : > { %v1548_v31 = vmul.f32 0.044715, %v1516_v23  ;;  %v1517_v45 = vmul.f32 %v1447_v3, %v1447_v3  ;;  %v6610_v29 = vmul.f32 0.5, %v1444_v19  ;;  %5726 = vtanh.f32 %v1640_v47  ;;  %v5721_v39 = vpop.eup %5720 }
 0x237   : > { %v1546_v17 = vmul.f32 0.044715, %v1514_v7  ;;  %v1515_v18 = vmul.f32 %v1439_v25, %v1439_v25  ;;  %v1641_v41 = vmul.f32 0.7978846, %v1609_v9  ;;  %5728 = vtanh.f32 %v1638_v53 }
 0x238   : > { %v1580_v32 = vadd.f32 1.0, %v1548_v31  ;;  %v1549_v40 = vmul.f32 0.044715, %v1517_v45  ;;  %v6616_v54 = vmul.f32 0.5, %v1436_v10  ;;  %v1639_v34 = vmul.f32 0.7978846, %v1607_v63  ;;  %v6620_v49 = vpop.eup %5722 }
 0x239   : > { %v1578_v56 = vadd.f32 1.0, %v1546_v17  ;;  %v5313_v52 = vpop.f32.mrb[20].mxu1  ;;  %v1547_v11 = vmul.f32 0.044715, %v1515_v18  ;;  %v6622_v44 = vmul.f32 0.5, %v1447_v3  ;;  %5730 = vtanh.f32 %v1641_v41 }
 0x23a   : > { %v1460_v59 = vadd.f32 %v5313_v52, %v6554_v14  ;;  %v1451_v43 = vpop.f32.mrb[21].mxu1  ;;  %v1612_v51 = vmul.f32 %v1580_v32, %v1444_v19  ;;  %v1581_v38 = vadd.f32 1.0, %v1549_v40  ;;  %5732 = vtanh.f32 %v1639_v34 }
 0x23b   : > { %v6614_v48 = vadd.f32 %v6554_v14, %v1451_v43  ;;  %v5314_v20 = vpop.f32.mrb[22].mxu1  ;;  %v1610_v22 = vmul.f32 %v1578_v56, %v1436_v10  ;;  %v1579_v61 = vadd.f32 1.0, %v1547_v11  ;;  %v6627_v10 = vmul.f32 0.5, %v1439_v25  ;;  %v5725_v47 = vpop.eup %5724 }
 0x23c   : > { %v1520_v1 = vmul.f32 %v1460_v59, %v1460_v59  ;;  %v1454_v36 = vpop.f32.mrb[23].mxu1  ;;  %v1613_v33 = vmul.f32 %v1581_v38, %v1447_v3  ;;  %v6625_v24 = vadd.f32 %v5314_v20, %v6554_v14  ;;  %v1644_v35 = vmul.f32 0.7978846, %v1612_v51 }
 0x23d   : > { %v1518_v15 = vmul.f32 %v6614_v48, %v6614_v48  ;;  %v1611_v16 = vmul.f32 %v1579_v61, %v1439_v25  ;;  %v1642_v23 = vmul.f32 0.7978846, %v1610_v22  ;;  %v1729_v12 = vadd.f32 1.0, %v5717_v62 }
 0x23e   : > { %v1552_v19 = vmul.f32 0.044715, %v1520_v1  ;;  %v1521_v21 = vmul.f32 %v6625_v24, %v6625_v24  ;;  %v1645_v9 = vmul.f32 0.7978846, %v1613_v33  ;;  %v6632_v17 = vadd.f32 %v6554_v14, %v1454_v36 }
 0x23f   : > { %v1550_v5 = vmul.f32 0.044715, %v1518_v15  ;;  %5734 = vtanh.f32 %v1644_v35  ;;  %v1760_v25 = vmul.f32 %v1728_v13, %v6571_v4  ;;  %v1761_v30 = vmul.f32 %v1729_v12, %v6578_v26 }
 0x240   : > { %v1584_v55 = vadd.f32 1.0, %v1552_v19  ;;  %v1553_v3 = vmul.f32 0.044715, %v1521_v21  ;;  %v6639_v32 = vpop.eup %5726  ;;  %v1643_v62 = vmul.f32 0.7978846, %v1611_v16  ;;  %v1519_v56 = vmul.f32 %v6632_v17, %v6632_v17 }
 0x241   : > { %v1582_v8 = vadd.f32 1.0, %v1550_v5  ;;  %v5317_v7 = vpop.f32.mrb[24].mxu1  ;;  %5736 = vtanh.f32 %v1642_v23  ;;  %v6644_v52 = vmul.f32 0.5, %v1460_v59  ;;  %v1806_v4 = vpack.c.bf16 %v1761_v30, %v1760_v25  ;;  %v6648_v41 = vpop.eup %5728 }
 0x242   : > { %v1616_v31 = vmul.f32 %v1584_v55, %v1460_v59  ;;  %v1467_v50 = vpop.f32.mrb[25].mxu1  ;;  %v6637_v37 = vadd.f32 %v5317_v7, %v6554_v14  ;;  %v1585_v63 = vadd.f32 1.0, %v1553_v3  ;;  %5738 = vtanh.f32 %v1645_v9 }
 0x243   : > { %v5318_v53 = vpop.f32.mrb[26].mxu1  ;;  %v1614_v45 = vmul.f32 %v1582_v8, %v6614_v48  ;;  %v1551_v43 = vmul.f32 0.044715, %v1519_v56  ;;  %v6651_v51 = vadd.f32 %v6554_v14, %v1467_v50  ;;  %5344 = vmatmul.mubr.bf16.gmra.mrb[36].mxu0 %v1806_v4  ;;  %v1730_v20 = vadd.f32 1.0, %v5721_v39  ;;  %v6656_v34 = vpop.eup %5730 }
 0x244   : > { %v1470_v18 = vpop.f32.mrb[27].mxu1  ;;  %v1524_v26 = vmul.f32 %v6637_v37, %v6637_v37  ;;  %v1648_v40 = vmul.f32 0.7978846, %v1616_v31  ;;  %v1617_v11 = vmul.f32 %v1585_v63, %v6625_v24  ;;  %v1731_v38 = vadd.f32 1.0, %v5725_v47  ;;  %v5733_v16 = vpop.eup %5732 }
 0x245   : > { %5740 = vtanh.f32 %v1643_v62  ;;  %v1646_v59 = vmul.f32 0.7978846, %v1614_v45  ;;  %v1583_v1 = vadd.f32 1.0, %v1551_v43  ;;  %v1522_v36 = vmul.f32 %v6651_v51, %v6651_v51 }
 0x246   : > { %v1556_v42 = vmul.f32 0.044715, %v1524_v26  ;;  %v1762_v61 = vmul.f32 %v1730_v20, %v6586_v0  ;;  %v1763_v15 = vmul.f32 %v1731_v38, %v6592_v2  ;;  %v6661_v33 = vadd.f32 %v5318_v53, %v6554_v14 }
 0x247   : > { %5742 = vtanh.f32 %v1648_v40  ;;  %v1615_v39 = vmul.f32 %v1583_v1, %v6632_v17  ;;  %v1554_v35 = vmul.f32 0.044715, %v1522_v36  ;;  %v1732_v5 = vadd.f32 1.0, %v6608_v6 }
 0x248   : > { %v1588_v22 = vadd.f32 1.0, %v1556_v42  ;;  %v1649_v55 = vmul.f32 0.7978846, %v1617_v11  ;;  %v1807_v23 = vpack.c.bf16 %v1763_v15, %v1762_v61  ;;  %v1525_v0 = vmul.f32 %v6661_v33, %v6661_v33 }
 0x249   : > { %v5321_v19 = vpop.f32.mrb[28].mxu1  ;;  %5744 = vtanh.f32 %v1646_v59  ;;  %v1647_v8 = vmul.f32 0.7978846, %v1615_v39  ;;  %v1586_v12 = vadd.f32 1.0, %v1554_v35  ;;  %v1733_v7 = vadd.f32 1.0, %v6620_v49  ;;  %v6669_v9 = vpop.eup %5734 }
 0x24a   : > { %v1483_v13 = vpop.f32.mrb[29].mxu1  ;;  %v1620_v21 = vmul.f32 %v1588_v22, %v6637_v37  ;;  %5347 = vmatprep.mubr.bf16.mxu0 %v1807_v23  ;;  %v1557_v6 = vmul.f32 0.044715, %v1525_v0  ;;  %v6672_v3 = vadd.f32 %v6554_v14, %v1470_v18  ;;  %v6675_v50 = vadd.f32 %v5321_v19, %v6554_v14 }
 0x24b   : > { %v5322_v2 = vpop.f32.mrb[30].mxu1  ;;  %v1618_v25 = vmul.f32 %v1586_v12, %v6651_v51  ;;  %v1764_v30 = vmul.f32 %v1732_v5, %v6584_v27  ;;  %v1765_v53 = vmul.f32 %v1733_v7, %v6589_v57  ;;  %v6681_v49 = vadd.f32 %v6554_v14, %v1483_v13  ;;  %v5737_v62 = vpop.eup %5736 }
 0x24c   : > { %v1486_v47 = vpop.f32.mrb[31].mxu1  ;;  %v1652_v31 = vmul.f32 0.7978846, %v1620_v21  ;;  %v6684_v45 = vmul.f32 0.5, %v6614_v48  ;;  %5746 = vtanh.f32 %v1649_v55  ;;  %v1589_v63 = vadd.f32 1.0, %v1557_v6  ;;  %v5739_v18 = vpop.eup %5738 }
 0x24d   : > { %v1523_v56 = vmul.f32 %v6672_v3, %v6672_v3  ;;  %5748 = vtanh.f32 %v1647_v8  ;;  %v1650_v4 = vmul.f32 0.7978846, %v1618_v25  ;;  %v1808_v26 = vpack.c.bf16 %v1765_v53, %v1764_v30 }
 0x24e   : > { %v1528_v27 = vmul.f32 %v6675_v50, %v6675_v50  ;;  %5750 = vtanh.f32 %v1652_v31  ;;  %v1621_v57 = vmul.f32 %v1589_v63, %v6661_v33  ;;  %v1526_v48 = vmul.f32 %v6681_v49, %v6681_v49 }
 0x24f   : > { %v1555_v40 = vmul.f32 0.044715, %v1523_v56  ;;  %v5741_v43 = vpop.eup %5740  ;;  %5752 = vtanh.f32 %v1650_v4  ;;  %5348 = vmatmul.mubr.bf16.gmra.mrb[40].mxu0 %v1808_v26  ;;  %v1734_v42 = vadd.f32 1.0, %v6648_v41  ;;  %v1735_v20 = vadd.f32 1.0, %v5733_v16 }
 0x250   : > { %v1560_v11 = vmul.f32 0.044715, %v1528_v27  ;;  %v1653_v38 = vmul.f32 0.7978846, %v1621_v57  ;;  %v1558_v1 = vmul.f32 0.044715, %v1526_v48  ;;  %v6695_v36 = vadd.f32 %v5322_v2, %v6554_v14 }
 0x251   : > { %v1587_v59 = vadd.f32 1.0, %v1555_v40  ;;  %v5743_v22 = vpop.eup %5742  ;;  %v1766_v15 = vmul.f32 %v1734_v42, %v6596_v60  ;;  %v1767_v19 = vmul.f32 %v1735_v20, %v6602_v46  ;;  %v1736_v39 = vadd.f32 1.0, %v6639_v32 }
 0x252   : > { %v1592_v61 = vadd.f32 1.0, %v1560_v11  ;;  %5754 = vtanh.f32 %v1653_v38  ;;  %v1590_v5 = vadd.f32 1.0, %v1558_v1  ;;  %v1529_v41 = vmul.f32 %v6695_v36, %v6695_v36 }
 0x253   : > { %v1619_v35 = vmul.f32 %v1587_v59, %v6672_v3  ;;  %v5745_v13 = vpop.eup %5744  ;;  %v1681_v16 = vmul.f32 0.5, %v6625_v24  ;;  %v1809_v21 = vpack.c.bf16 %v1767_v19, %v1766_v15  ;;  %v1737_v23 = vadd.f32 1.0, %v6656_v34 }
 0x254   : > { %v1624_v55 = vmul.f32 %v1592_v61, %v6675_v50  ;;  %v1622_v46 = vmul.f32 %v1590_v5, %v6681_v49  ;;  %v1561_v0 = vmul.f32 0.044715, %v1529_v41  ;;  %v1768_v32 = vmul.f32 %v1736_v39, %v6594_v58 }
 0x255   : > { %v1651_v60 = vmul.f32 0.7978846, %v1619_v35  ;;  %5351 = vmatprep.mubr.bf16.mxu0 %v1809_v21  ;;  %v1769_v8 = vmul.f32 %v1737_v23, %v6600_v28  ;;  %v6710_v12 = vadd.f32 %v6554_v14, %v1486_v47  ;;  %v1738_v7 = vadd.f32 1.0, %v5737_v62 }
 0x256   : > { %v1656_v2 = vmul.f32 0.7978846, %v1624_v55  ;;  %v5747_v24 = vpop.eup %5746  ;;  %v1679_v31 = vmul.f32 0.5, %v6632_v17  ;;  %v1593_v6 = vadd.f32 1.0, %v1561_v0  ;;  %v1739_v34 = vadd.f32 1.0, %v5741_v43 }
 0x257   : > { %5756 = vtanh.f32 %v1651_v60  ;;  %v5749_v25 = vpop.eup %5748  ;;  %v1684_v30 = vmul.f32 0.5, %v6637_v37  ;;  %v1654_v53 = vmul.f32 0.7978846, %v1622_v46  ;;  %v1810_v63 = vpack.c.bf16 %v1769_v8, %v1768_v32 }
 0x258   : > { %v1527_v58 = vmul.f32 %v6710_v12, %v6710_v12  ;;  %v5751_v56 = vpop.eup %5750  ;;  %5758 = vtanh.f32 %v1656_v2  ;;  %v1625_v14 = vmul.f32 %v1593_v6, %v6695_v36  ;;  %v1770_v28 = vmul.f32 %v1738_v7, %v6616_v54 }
 0x259   : > { %v1771_v47 = vmul.f32 %v1739_v34, %v6627_v10  ;;  %v5753_v17 = vpop.eup %5752  ;;  %5352 = vmatmul.mubr.bf16.gmra.mrb[44].mxu0 %v1810_v63  ;;  %v1740_v4 = vadd.f32 1.0, %v6669_v9  ;;  %v1741_v26 = vadd.f32 1.0, %v5739_v18  ;;  %v1742_v37 = vadd.f32 1.0, %v5745_v13 }
 0x25a   : > { %v1559_v62 = vmul.f32 0.044715, %v1527_v58  ;;  %v1657_v27 = vmul.f32 0.7978846, %v1625_v14  ;;  %v1743_v40 = vadd.f32 1.0, %v5749_v25  ;;  %v1744_v48 = vadd.f32 1.0, %v5743_v22 }
 0x25b   : > { %v1811_v57 = vpack.c.bf16 %v1771_v47, %v1770_v28  ;;  %v1685_v43 = vmul.f32 0.5, %v6661_v33  ;;  %v1772_v42 = vmul.f32 %v1740_v4, %v6610_v29  ;;  %v1773_v54 = vmul.f32 %v1741_v26, %v6622_v44  ;;  %v5533_v58 = vld [vmem:[%s8201_s13 + $0x40] sm:$0xff]  }
 0x25c   : > { %v1591_v11 = vadd.f32 1.0, %v1559_v62  ;;  %v5755_v20 = vpop.eup %5754  ;;  %5760 = vtanh.f32 %v1657_v27  ;;  %v1774_v10 = vmul.f32 %v1742_v37, %v6684_v45  ;;  %v1775_v38 = vmul.f32 %v1743_v40, %v1679_v31 }
 0x25d   : > { %5355 = vmatprep.mubr.bf16.mxu0 %v1811_v57  ;;  %v1745_v9 = vadd.f32 1.0, %v5747_v24  ;;  %5762 = vtanh.f32 %v1654_v53  ;;  %v1812_v59 = vpack.c.bf16 %v1773_v54, %v1772_v42  ;;  %v1748_v1 = vadd.f32 1.0, %v5751_v56  ;;  %v6750_v56 = vld [vmem:[%s8196_s8] ss:$0 sm:$0xff] }
 0x25e   : > { %v1623_v18 = vmul.f32 %v1591_v11, %v6710_v12  ;;  %v1813_v22 = vpack.c.bf16 %v1775_v38, %v1774_v10  ;;  %v1776_v33 = vmul.f32 %v1744_v48, %v6644_v52  ;;  %v1749_v15 = vadd.f32 1.0, %v5755_v20 }
 0x25f   : > { %v1777_v61 = vmul.f32 %v1745_v9, %v1681_v16  ;;  %v1746_v19 = vadd.f32 1.0, %v5753_v17  ;;  %v1780_v35 = vmul.f32 %v1748_v1, %v1684_v30  ;;  %v1682_v45 = vmul.f32 0.5, %v6651_v51 }
 0x260   : > { %v1655_v29 = vmul.f32 0.7978846, %v1623_v18  ;;  %v1781_v5 = vmul.f32 %v1749_v15, %v1685_v43  ;;  %v1683_v41 = vmul.f32 0.5, %v6672_v3  ;;  %v1688_v32 = vmul.f32 0.5, %v6675_v50  ;;  %v5529_v50 = vld [vmem:[%s8197_s9 + $0x20] sm:$0xff]  }
 0x261   : > { %v5757_v44 = vpop.eup %5756  ;;  %v1814_v39 = vpack.c.bf16 %v1777_v61, %v1776_v33  ;;  %5356 = vmatmul.mubr.bf16.gmra.mrb[48].mxu0 %v1812_v59  ;;  %v1778_v23 = vmul.f32 %v1746_v19, %v1682_v45  ;;  %v1689_v2 = vmul.f32 0.5, %v6695_v36  ;;  %v1686_v6 = vmul.f32 0.5, %v6681_v49  ;;  %5379 = vmatprep.subr.bf16.mxu1 %v5529_v50  ;;  %v5530_v36 = vld [vmem:[%s8197_s9 + $0x28] sm:$0xff]   ;;  %v5531_v49 = vld [vmem:[%s8197_s9 + $0x30] sm:$0xff]  }
 0x262   : > { %5764 = vtanh.f32 %v1655_v29  ;;  %v1747_v13 = vadd.f32 1.0, %v5757_v44  ;;  %v5759_v55 = vpop.eup %5758  ;;  %5359 = vmatprep.mubr.bf16.mxu0 %v1813_v22  ;;  %v1816_v21 = vpack.c.bf16 %v1781_v5, %v1780_v35  ;;  %v1687_v34 = vmul.f32 0.5, %v6710_v12  ;;  %5380 = vmatpush3.bf16.msra.mxu1 %v5529_v50  ;;  %v5532_v12 = vld [vmem:[%s8197_s9 + $0x38] sm:$0xff]  }
 0x263   : > { %v1752_v60 = vadd.f32 1.0, %v5759_v55  ;;  %5381 = vmatprep.subr.bf16.mxu1 %v5530_v36 }
 0x264   : > { %v1779_v52 = vmul.f32 %v1747_v13, %v1683_v41 }
 0x265   : > { %v1784_v51 = vmul.f32 %v1752_v60, %v1688_v32 }
 0x266   : > { %v1815_v16 = vpack.c.bf16 %v1779_v52, %v1778_v23  ;;  %v5761_v46 = vpop.eup %5760  ;;  %5382 = vmatpush3.bf16.msra.mxu1 %v5530_v36  ;;  %v5534_v36 = vld [vmem:[%s8201_s13] sm:$0xff]  }
 0x267   : > { %v5763_v0 = vpop.eup %5762  ;;  %v1753_v8 = vadd.f32 1.0, %v5761_v46  ;;  %5383 = vmatprep.subr.bf16.mxu1 %v5531_v49 }
 0x268   : > { %v1750_v7 = vadd.f32 1.0, %v5763_v0 }
 0x269   : > { %5360 = vmatmul.mubr.bf16.gmra.mrb[52].mxu0 %v1814_v39  ;;  %v1785_v3 = vmul.f32 %v1753_v8, %v1689_v2 }
 0x26a   : > { %5363 = vmatprep.mubr.bf16.mxu0 %v1815_v16  ;;  %v1782_v30 = vmul.f32 %v1750_v7, %v1686_v6  ;;  %5384 = vmatpush3.bf16.msra.mxu1 %v5531_v49  ;;  %v5535_v49 = vld [vmem:[%s8201_s13 + $0x48] sm:$0xff]  }
 0x26b   : > { %v1818_v31 = vpack.c.bf16 %v1785_v3, %v1784_v51  ;;  %5385 = vmatprep.subr.bf16.mxu1 %v5532_v12 }
 0x26c   : > { %v5765_v24 = vpop.eup %5764 }
 0x26d   : > { %v1751_v25 = vadd.f32 1.0, %v5765_v24 }
 0x26e   : > { %5386 = vmatpush3.bf16.msra.mxu1 %v5532_v12 }
 0x26f   : > { %v1783_v53 = vmul.f32 %v1751_v25, %v1687_v34  ;;  %5134 = vmatprep.subr.bf16.mxu1 %v5533_v58 }
 0x271   : > { %v1817_v63 = vpack.c.bf16 %v1783_v53, %v1782_v30  ;;  %5364 = vmatmul.mubr.bf16.gmra.mrb[56].mxu0 %v1816_v21 }
 0x273   : > { %5367 = vmatprep.mubr.bf16.mxu0 %v1817_v63 }
 0x279   : > { %5368 = vmatmul.mubr.bf16.gmra.mrb[60].mxu0 %v1818_v31 }
 0x2ff   : > { %v5341_v14 = vpop.f32.mrb[32].mxu0 }
 0x300   : > { %v1916_v28 = vadd.f32 %v5341_v14, %v6750_v56  ;;  %v1907_v47 = vpop.f32.mrb[33].mxu0 }
 0x301   : > { %v1908_v17 = vadd.f32 %v6750_v56, %v1907_v47  ;;  %v5342_v62 = vpop.f32.mrb[34].mxu0 }
 0x302   : > { %v2036_v4 = vmul.f32 %v1916_v28, %v1916_v28  ;;  %v1919_v26 = vadd.f32 %v5342_v62, %v6750_v56  ;;  %v1910_v37 = vpop.f32.mrb[35].mxu0  ;;  %v2196_v5 = vmul.f32 0.5, %v1916_v28  ;;  %v5536_v62 = vld [vmem:[%s8201_s13 + $0x8] sm:$0xff]  }
 0x303   : > { %v2034_v27 = vmul.f32 %v1908_v17, %v1908_v17  ;;  %v1911_v57 = vadd.f32 %v6750_v56, %v1910_v37  ;;  %v2194_v55 = vmul.f32 0.5, %v1908_v17 }
 0x304   : > { %v2068_v40 = vmul.f32 0.044715, %v2036_v4  ;;  %v2037_v48 = vmul.f32 %v1919_v26, %v1919_v26  ;;  %v2197_v21 = vmul.f32 0.5, %v1919_v26 }
 0x305   : > { %v2066_v43 = vmul.f32 0.044715, %v2034_v27  ;;  %v2035_v11 = vmul.f32 %v1911_v57, %v1911_v57  ;;  %v2195_v60 = vmul.f32 0.5, %v1911_v57 }
 0x306   : > { %v2100_v42 = vadd.f32 1.0, %v2068_v40  ;;  %v2069_v54 = vmul.f32 0.044715, %v2037_v48 }
 0x307   : > { %v2098_v20 = vadd.f32 1.0, %v2066_v43  ;;  %v2067_v10 = vmul.f32 0.044715, %v2035_v11 }
 0x308   : > { %v2132_v38 = vmul.f32 %v2100_v42, %v1916_v28  ;;  %v2101_v9 = vadd.f32 1.0, %v2069_v54 }
 0x309   : > { %v2130_v18 = vmul.f32 %v2098_v20, %v1908_v17  ;;  %v2099_v59 = vadd.f32 1.0, %v2067_v10 }
 0x30a   : > { %v2164_v1 = vmul.f32 0.7978846, %v2132_v38  ;;  %v2133_v22 = vmul.f32 %v2101_v9, %v1919_v26  ;;  %v5537_v26 = vld [vmem:[%s8201_s13 + $0x50] sm:$0xff]  }
 0x30b   : > { %v2162_v33 = vmul.f32 0.7978846, %v2130_v18  ;;  %v2131_v61 = vmul.f32 %v2099_v59, %v1911_v57  ;;  %v5538_v38 = vld [vmem:[%s8201_s13 + $0x10] sm:$0xff]   ;;  %v5539_v59 = vld [vmem:[%s8201_s13 + $0x58] sm:$0xff]  }
 0x30c   : > { %5766 = vtanh.f32 %v2164_v1  ;;  %v2165_v15 = vmul.f32 0.7978846, %v2133_v22 }
 0x30d   : > { %5768 = vtanh.f32 %v2162_v33  ;;  %v2163_v29 = vmul.f32 0.7978846, %v2131_v61 }
 0x30e   : > { %5770 = vtanh.f32 %v2165_v15 }
 0x30f   : > { %5772 = vtanh.f32 %v2163_v29 }
 0x316   : > { %v5767_v19 = vpop.eup %5766  ;;  %v5345_v45 = vpop.f32.mrb[36].mxu0 }
 0x317   : > { %v5769_v44 = vpop.eup %5768  ;;  %v2260_v39 = vadd.f32 1.0, %v5767_v19  ;;  %v6757_v52 = vadd.f32 %v5345_v45, %v6750_v56  ;;  %v1923_v16 = vpop.f32.mrb[37].mxu0  ;;  %v5541_v45 = vld [vmem:[%s8201_s13 + $0x60] sm:$0xff]  }
 0x318   : > { %v5771_v35 = vpop.eup %5770  ;;  %v2258_v41 = vadd.f32 1.0, %v5769_v44  ;;  %v6760_v46 = vadd.f32 %v6750_v56, %v1923_v16  ;;  %v5346_v0 = vpop.f32.mrb[38].mxu0 }
 0x319   : > { %v5773_v13 = vpop.eup %5772  ;;  %v2261_v23 = vadd.f32 1.0, %v5771_v35  ;;  %v2292_v2 = vmul.f32 %v2260_v39, %v2196_v5  ;;  %v6763_v51 = vadd.f32 %v5346_v0, %v6750_v56  ;;  %v1926_v3 = vpop.f32.mrb[39].mxu0  ;;  %v2040_v24 = vmul.f32 %v6757_v52, %v6757_v52  ;;  %v5540_v39 = vld [vmem:[%s8201_s13 + $0x18] sm:$0xff]  }
 0x31a   : > { %v2259_v32 = vadd.f32 1.0, %v5773_v13  ;;  %v2290_v7 = vmul.f32 %v2258_v41, %v2194_v55  ;;  %v2038_v31 = vmul.f32 %v6760_v46, %v6760_v46  ;;  %v6770_v6 = vadd.f32 %v6750_v56, %v1926_v3 }
 0x31b   : > { %v2293_v8 = vmul.f32 %v2261_v23, %v2197_v21  ;;  %v2041_v30 = vmul.f32 %v6763_v51, %v6763_v51  ;;  %v2072_v12 = vmul.f32 0.044715, %v2040_v24  ;;  %v6809_v0 = vmul.f32 0.5, %v6757_v52 }
 0x31c   : > { %v2291_v34 = vmul.f32 %v2259_v32, %v2195_v60  ;;  %v2070_v53 = vmul.f32 0.044715, %v2038_v31  ;;  %v2039_v63 = vmul.f32 %v6770_v6, %v6770_v6  ;;  %v6812_v32 = vmul.f32 0.5, %v6760_v46 }
 0x31d   : > { %v2340_v25 = vpack.c.bf16 %v2293_v8, %v2292_v2  ;;  %v2073_v28 = vmul.f32 0.044715, %v2041_v30  ;;  %v2104_v37 = vadd.f32 1.0, %v2072_v12  ;;  %v6819_v24 = vmul.f32 0.5, %v6763_v51 }
 0x31e   : > { %v2339_v50 = vpack.c.bf16 %v2291_v34, %v2290_v7  ;;  %v2102_v58 = vadd.f32 1.0, %v2070_v53  ;;  %v2071_v14 = vmul.f32 0.044715, %v2039_v63  ;;  %v5542_v7 = vld [vmem:[%s8201_s13 + $0x20] sm:$0xff]   ;;  %v6822_v31 = vmul.f32 0.5, %v6770_v6 }
 0x31f   : > { %v2105_v43 = vadd.f32 1.0, %v2073_v28  ;;  %v2136_v1 = vmul.f32 %v2104_v37, %v6757_v52  ;;  %v5544_v28 = vld [vmem:[%s8201_s13 + $0x28] sm:$0xff]  }
 0x320   : > { %5387 = vmatprep.mubr.bf16.mxu1 %v2339_v50  ;;  %v2134_v47 = vmul.f32 %v2102_v58, %v6760_v46  ;;  %v2103_v17 = vadd.f32 1.0, %v2071_v14 }
 0x321   : > { %5388 = vmatmul.mubr.bf16.vlgmr.msra.gmra.mrb[32].mxu1 %v2340_v25  ;;  %v2137_v61 = vmul.f32 %v2105_v43, %v6763_v51  ;;  %v2168_v41 = vmul.f32 0.7978846, %v2136_v1  ;;  %v5543_v25 = vld [vmem:[%s8201_s13 + $0x68] sm:$0xff]  }
 0x322   : > { %5135 = vmatpush3.bf16.msra.mxu1 %v5534_v36  ;;  %v5349_v4 = vpop.f32.mrb[40].mxu0  ;;  %v2135_v27 = vmul.f32 %v2103_v17, %v6770_v6  ;;  %v2166_v48 = vmul.f32 0.7978846, %v2134_v47 }
 0x323   : > { %5136 = vmatprep.subr.bf16.mxu1 %v5535_v49  ;;  %v1948_v57 = vadd.f32 %v5349_v4, %v6750_v56  ;;  %v1939_v40 = vpop.f32.mrb[41].mxu0  ;;  %v2169_v21 = vmul.f32 0.7978846, %v2137_v61 }
 0x324   : > { %v1940_v11 = vadd.f32 %v6750_v56, %v1939_v40  ;;  %v5350_v42 = vpop.f32.mrb[42].mxu0  ;;  %v2167_v54 = vmul.f32 0.7978846, %v2135_v27  ;;  %5774 = vtanh.f32 %v2166_v48 }
 0x325   : > { %v2044_v20 = vmul.f32 %v1948_v57, %v1948_v57  ;;  %v1942_v10 = vpop.f32.mrb[43].mxu0  ;;  %v1951_v18 = vadd.f32 %v5350_v42, %v6750_v56  ;;  %v6828_v30 = vmul.f32 0.5, %v1948_v57 }
 0x326   : > { %5137 = vmatpush3.bf16.msra.mxu1 %v5536_v62  ;;  %v2042_v9 = vmul.f32 %v1940_v11, %v1940_v11  ;;  %v1943_v33 = vadd.f32 %v6750_v56, %v1942_v10  ;;  %5776 = vtanh.f32 %v2167_v54  ;;  %v6830_v49 = vmul.f32 0.5, %v1940_v11 }
 0x327   : > { %5138 = vmatprep.subr.bf16.mxu1 %v5537_v26  ;;  %v2076_v22 = vmul.f32 0.044715, %v2044_v20  ;;  %v2045_v29 = vmul.f32 %v1951_v18, %v1951_v18  ;;  %5778 = vtanh.f32 %v2168_v41  ;;  %v6837_v17 = vmul.f32 0.5, %v1951_v18  ;;  %v5545_v26 = vld [vmem:[%s8201_s13 + $0x70] sm:$0xff]  }
 0x328   : > { %v2074_v15 = vmul.f32 0.044715, %v2042_v9  ;;  %v2043_v44 = vmul.f32 %v1943_v33, %v1943_v33  ;;  %5780 = vtanh.f32 %v2169_v21  ;;  %v6839_v62 = vmul.f32 0.5, %v1943_v33 }
 0x329   : > { %v2108_v19 = vadd.f32 1.0, %v2076_v22  ;;  %v2077_v5 = vmul.f32 0.044715, %v2045_v29  ;;  %v5547_v29 = vld [vmem:[%s8201_s13 + $0x78] sm:$0xff]  }
 0x32a   : > { %5139 = vmatpush3.bf16.msra.mxu1 %v5538_v38  ;;  %v2106_v35 = vadd.f32 1.0, %v2074_v15  ;;  %v2075_v55 = vmul.f32 0.044715, %v2043_v44 }
 0x32b   : > { %5140 = vmatprep.subr.bf16.mxu1 %v5539_v59  ;;  %v2140_v13 = vmul.f32 %v2108_v19, %v1948_v57  ;;  %v2109_v16 = vadd.f32 1.0, %v2077_v5  ;;  %v5546_v59 = vld [vmem:[%s8201_s13 + $0x30] sm:$0xff]  }
 0x32c   : > { %v2138_v23 = vmul.f32 %v2106_v35, %v1940_v11  ;;  %v5353_v60 = vpop.f32.mrb[44].mxu0  ;;  %v2107_v2 = vadd.f32 1.0, %v2075_v55 }
 0x32d   : > { %v1964_v8 = vadd.f32 %v5353_v60, %v6750_v56  ;;  %v1955_v3 = vpop.f32.mrb[45].mxu0  ;;  %v2172_v52 = vmul.f32 0.7978846, %v2140_v13  ;;  %v2141_v53 = vmul.f32 %v2109_v16, %v1951_v18  ;;  %v5548_v60 = vld [vmem:[%s8201_s13 + $0x38] sm:$0xff]  }
 0x32e   : > { %5141 = vmatpush3.bf16.msra.mxu1 %v5540_v39  ;;  %v1956_v34 = vadd.f32 %v6750_v56, %v1955_v3  ;;  %v5354_v46 = vpop.f32.mrb[46].mxu0  ;;  %v2170_v51 = vmul.f32 0.7978846, %v2138_v23  ;;  %v2139_v36 = vmul.f32 %v2107_v2, %v1943_v33  ;;  %v5775_v47 = vpop.eup %5774 }
 0x32f   : > { %5142 = vmatprep.subr.bf16.mxu1 %v5541_v45  ;;  %v2048_v63 = vmul.f32 %v1964_v8, %v1964_v8  ;;  %v1958_v50 = vpop.f32.mrb[47].mxu0  ;;  %v1967_v58 = vadd.f32 %v5354_v46, %v6750_v56  ;;  %5782 = vtanh.f32 %v2172_v52  ;;  %v2173_v27 = vmul.f32 0.7978846, %v2141_v53 }
 0x330   : > { %v2046_v6 = vmul.f32 %v1956_v34, %v1956_v34  ;;  %v1959_v14 = vadd.f32 %v6750_v56, %v1958_v50  ;;  %v5777_v37 = vpop.eup %5776  ;;  %v6844_v40 = vmul.f32 0.5, %v1964_v8  ;;  %5784 = vtanh.f32 %v2170_v51 }
 0x331   : > { %v2080_v12 = vmul.f32 0.044715, %v2048_v63  ;;  %v2049_v48 = vmul.f32 %v1967_v58, %v1967_v58  ;;  %v2171_v43 = vmul.f32 0.7978846, %v2139_v36  ;;  %v6846_v20 = vmul.f32 0.5, %v1956_v34  ;;  %v5779_v13 = vpop.eup %5778 }
 0x332   : > { %5143 = vmatpush3.bf16.msra.mxu1 %v5542_v7  ;;  %v2078_v4 = vmul.f32 0.044715, %v2046_v6  ;;  %v2047_v42 = vmul.f32 %v1959_v14, %v1959_v14  ;;  %v2262_v18 = vadd.f32 1.0, %v5775_v47  ;;  %v2263_v15 = vadd.f32 1.0, %v5777_v37  ;;  %v5781_v2 = vpop.eup %5780 }
 0x333   : > { %5144 = vmatprep.subr.bf16.mxu1 %v5543_v25  ;;  %v2112_v57 = vadd.f32 1.0, %v2080_v12  ;;  %v2081_v10 = vmul.f32 0.044715, %v2049_v48  ;;  %5786 = vtanh.f32 %v2173_v27  ;;  %v6856_v5 = vmul.f32 0.5, %v1967_v58 }
 0x334   : > { %v2110_v11 = vadd.f32 1.0, %v2078_v4  ;;  %v5357_v54 = vpop.f32.mrb[48].mxu0  ;;  %v2079_v22 = vmul.f32 0.044715, %v2047_v42  ;;  %5788 = vtanh.f32 %v2171_v43  ;;  %v6858_v55 = vmul.f32 0.5, %v1959_v14 }
 0x335   : > { %v1980_v38 = vadd.f32 %v5357_v54, %v6750_v56  ;;  %v1971_v9 = vpop.f32.mrb[49].mxu0  ;;  %v2144_v1 = vmul.f32 %v2112_v57, %v1964_v8  ;;  %v2113_v44 = vadd.f32 1.0, %v2081_v10  ;;  %v2294_v16 = vmul.f32 %v2262_v18, %v6812_v32 }
 0x336   : > { %5145 = vmatpush3.bf16.msra.mxu1 %v5544_v28  ;;  %v1972_v33 = vadd.f32 %v6750_v56, %v1971_v9  ;;  %v5358_v61 = vpop.f32.mrb[50].mxu0  ;;  %v2142_v19 = vmul.f32 %v2110_v11, %v1956_v34  ;;  %v2111_v45 = vadd.f32 1.0, %v2079_v22  ;;  %v2295_v52 = vmul.f32 %v2263_v15, %v6822_v31  ;;  %v5549_v34 = vld [vmem:[%s8201_s13 + $0xc0] sm:$0xff]  }
 0x337   : > { %5146 = vmatprep.subr.bf16.mxu1 %v5545_v26  ;;  %v2052_v39 = vmul.f32 %v1980_v38, %v1980_v38  ;;  %v1974_v35 = vpop.f32.mrb[51].mxu0  ;;  %v1983_v23 = vadd.f32 %v5358_v61, %v6750_v56  ;;  %v2176_v8 = vmul.f32 0.7978846, %v2144_v1  ;;  %v2145_v25 = vmul.f32 %v2113_v44, %v1967_v58 }
 0x338   : > { %v2050_v41 = vmul.f32 %v1972_v33, %v1972_v33  ;;  %v1975_v7 = vadd.f32 %v6750_v56, %v1974_v35  ;;  %v2174_v46 = vmul.f32 0.7978846, %v2142_v19  ;;  %v2143_v50 = vmul.f32 %v2111_v45, %v1959_v14 }
 0x339   : > { %v2084_v21 = vmul.f32 0.044715, %v2052_v39  ;;  %v2053_v53 = vmul.f32 %v1983_v23, %v1983_v23  ;;  %v6870_v63 = vpop.eup %5782  ;;  %v2264_v12 = vadd.f32 1.0, %v5779_v13  ;;  %v6872_v28 = vmul.f32 0.5, %v1980_v38 }
 0x33a   : > { %5147 = vmatpush3.bf16.msra.mxu1 %v5546_v59  ;;  %v2082_v3 = vmul.f32 0.044715, %v2050_v41  ;;  %v2051_v36 = vmul.f32 %v1975_v7, %v1975_v7  ;;  %v6874_v47 = vmul.f32 0.5, %v1972_v33  ;;  %v5785_v37 = vpop.eup %5784  ;;  %5790 = vtanh.f32 %v2176_v8 }
 0x33b   : > { %5148 = vmatprep.subr.bf16.mxu1 %v5547_v29  ;;  %v2116_v32 = vadd.f32 1.0, %v2084_v21  ;;  %v2085_v31 = vmul.f32 0.044715, %v2053_v53  ;;  %5792 = vtanh.f32 %v2174_v46  ;;  %v2177_v48 = vmul.f32 0.7978846, %v2145_v25 }
 0x33c   : > { %v2114_v51 = vadd.f32 1.0, %v2082_v3  ;;  %v5361_v6 = vpop.f32.mrb[52].mxu0  ;;  %v2083_v27 = vmul.f32 0.044715, %v2051_v36  ;;  %v2175_v54 = vmul.f32 0.7978846, %v2143_v50  ;;  %v2341_v61 = vpack.c.bf16 %v2295_v52, %v2294_v16 }
 0x33d   : > { %v1996_v4 = vadd.f32 %v5361_v6, %v6750_v56  ;;  %v1987_v26 = vpop.f32.mrb[53].mxu0  ;;  %v2148_v58 = vmul.f32 %v2116_v32, %v1980_v38  ;;  %v2117_v43 = vadd.f32 1.0, %v2085_v31  ;;  %v5787_v59 = vpop.eup %5786  ;;  %v6882_v38 = vmul.f32 0.5, %v1983_v23 }
 0x33e   : > { %5149 = vmatpush3.bf16.msra.mxu1 %v5548_v60  ;;  %v6878_v57 = vadd.f32 %v6750_v56, %v1987_v26  ;;  %v5362_v14 = vpop.f32.mrb[54].mxu0  ;;  %v2146_v10 = vmul.f32 %v2114_v51, %v1972_v33  ;;  %v2115_v9 = vadd.f32 1.0, %v2083_v27  ;;  %v5789_v15 = vpop.eup %5788  ;;  %5794 = vtanh.f32 %v2177_v48  ;;  %5391 = vmatprep.mubr.bf16.mxu1 %v2341_v61 }
 0x33f   : > { %5156 = vmatprep.subr.bf16.mxu1 %v5549_v34  ;;  %v2056_v11 = vmul.f32 %v1996_v4, %v1996_v4  ;;  %v1990_v42 = vpop.f32.mrb[55].mxu0  ;;  %v2149_v1 = vmul.f32 %v2117_v43, %v1983_v23  ;;  %v2180_v29 = vmul.f32 0.7978846, %v2148_v58  ;;  %v6885_v39 = vadd.f32 %v5362_v14, %v6750_v56 }
 0x340   : > { %v2054_v18 = vmul.f32 %v6878_v57, %v6878_v57  ;;  %v2147_v19 = vmul.f32 %v2115_v9, %v1975_v7  ;;  %v6887_v35 = vmul.f32 0.5, %v1975_v7  ;;  %v2265_v45 = vadd.f32 1.0, %v5781_v2 }
 0x341   : > { %v2088_v22 = vmul.f32 0.044715, %v2056_v11  ;;  %5796 = vtanh.f32 %v2175_v54  ;;  %v2178_v41 = vmul.f32 0.7978846, %v2146_v10  ;;  %v2057_v21 = vmul.f32 %v6885_v39, %v6885_v39 }
 0x342   : > { %v2086_v44 = vmul.f32 0.044715, %v2054_v18  ;;  %v2181_v16 = vmul.f32 0.7978846, %v2149_v1  ;;  %v2296_v60 = vmul.f32 %v2264_v12, %v6809_v0  ;;  %v2297_v8 = vmul.f32 %v2265_v45, %v6819_v24 }
 0x343   : > { %v2120_v33 = vadd.f32 1.0, %v2088_v22  ;;  %v6894_v3 = vadd.f32 %v6750_v56, %v1990_v42  ;;  %5798 = vtanh.f32 %v2180_v29  ;;  %v2179_v52 = vmul.f32 0.7978846, %v2147_v19 }
 0x344   : > { %v2118_v13 = vadd.f32 1.0, %v2086_v44  ;;  %v5365_v23 = vpop.f32.mrb[56].mxu0  ;;  %v2089_v34 = vmul.f32 0.044715, %v2057_v21  ;;  %v2342_v53 = vpack.c.bf16 %v2297_v8, %v2296_v60  ;;  %v6902_v24 = vpop.eup %5790  ;;  %5800 = vtanh.f32 %v2178_v41 }
 0x345   : > { %v2003_v7 = vpop.f32.mrb[57].mxu0  ;;  %v6897_v2 = vadd.f32 %v5365_v23, %v6750_v56  ;;  %v2152_v25 = vmul.f32 %v2120_v33, %v1996_v4  ;;  %v2055_v0 = vmul.f32 %v6894_v3, %v6894_v3  ;;  %v6904_v51 = vmul.f32 0.5, %v1996_v4  ;;  %v6908_v12 = vpop.eup %5792 }
 0x346   : > { %v5366_v46 = vpop.f32.mrb[58].mxu0  ;;  %v2150_v32 = vmul.f32 %v2118_v13, %v6878_v57  ;;  %v2121_v36 = vadd.f32 1.0, %v2089_v34  ;;  %5802 = vtanh.f32 %v2181_v16  ;;  %5392 = vmatmul.mubr.bf16.gmra.mrb[36].mxu1 %v2342_v53  ;;  %v6911_v26 = vadd.f32 %v6750_v56, %v2003_v7 }
 0x347   : > { %v2006_v50 = vpop.f32.mrb[59].mxu0  ;;  %v2060_v6 = vmul.f32 %v6897_v2, %v6897_v2  ;;  %v2087_v31 = vmul.f32 0.044715, %v2055_v0  ;;  %v2266_v58 = vadd.f32 1.0, %v5785_v37  ;;  %5804 = vtanh.f32 %v2179_v52 }
 0x348   : > { %v2153_v27 = vmul.f32 %v2121_v36, %v6885_v39  ;;  %v2267_v48 = vadd.f32 1.0, %v5789_v15  ;;  %v2184_v4 = vmul.f32 0.7978846, %v2152_v25  ;;  %v2182_v43 = vmul.f32 0.7978846, %v2150_v32  ;;  %v6921_v1 = vpop.eup %5794 }
 0x349   : > { %v2092_v14 = vmul.f32 0.044715, %v2060_v6  ;;  %v2119_v11 = vadd.f32 1.0, %v2087_v31  ;;  %v2058_v42 = vmul.f32 %v6911_v26, %v6911_v26  ;;  %v2298_v10 = vmul.f32 %v2266_v58, %v6830_v49 }
 0x34a   : > { %v2299_v9 = vmul.f32 %v2267_v48, %v6839_v62  ;;  %v6919_v18 = vadd.f32 %v5366_v46, %v6750_v56  ;;  %v2268_v15 = vadd.f32 1.0, %v6870_v63  ;;  %v2269_v29 = vadd.f32 1.0, %v5787_v59 }
 0x34b   : > { %v2124_v54 = vadd.f32 1.0, %v2092_v14  ;;  %v2151_v22 = vmul.f32 %v2119_v11, %v6894_v3  ;;  %v2090_v61 = vmul.f32 0.044715, %v2058_v42  ;;  %v5797_v44 = vpop.eup %5796  ;;  %v2185_v33 = vmul.f32 0.7978846, %v2153_v27 }
 0x34c   : > { %v5369_v37 = vpop.f32.mrb[60].mxu0  ;;  %v2343_v49 = vpack.c.bf16 %v2299_v9, %v2298_v10  ;;  %v2061_v62 = vmul.f32 %v6919_v18, %v6919_v18  ;;  %5806 = vtanh.f32 %v2184_v4  ;;  %v2300_v23 = vmul.f32 %v2268_v15, %v6828_v30 }
 0x34d   : > { %v2019_v19 = vpop.f32.mrb[61].mxu0  ;;  %v2156_v45 = vmul.f32 %v2124_v54, %v6897_v2  ;;  %v2183_v13 = vmul.f32 0.7978846, %v2151_v22  ;;  %v2122_v21 = vadd.f32 1.0, %v2090_v61  ;;  %v6929_v60 = vpop.eup %5798  ;;  %v2301_v8 = vmul.f32 %v2269_v29, %v6837_v17 }
 0x34e   : > { %v5370_v41 = vpop.f32.mrb[62].mxu0  ;;  %5395 = vmatprep.mubr.bf16.mxu1 %v2343_v49  ;;  %v2093_v59 = vmul.f32 0.044715, %v2061_v62  ;;  %v6933_v7 = vadd.f32 %v6750_v56, %v2006_v50  ;;  %5808 = vtanh.f32 %v2182_v43  ;;  %v6937_v34 = vadd.f32 %v5369_v37, %v6750_v56  ;;  %v5801_v30 = vpop.eup %5800 }
 0x34f   : > { %v2022_v16 = vpop.f32.mrb[63].mxu0  ;;  %v2188_v63 = vmul.f32 0.7978846, %v2156_v45  ;;  %v2154_v52 = vmul.f32 %v2122_v21, %v6911_v26  ;;  %v6940_v46 = vadd.f32 %v6750_v56, %v2019_v19  ;;  %5810 = vtanh.f32 %v2185_v33 }
 0x350   : > { %v2125_v25 = vadd.f32 1.0, %v2093_v59  ;;  %v2344_v32 = vpack.c.bf16 %v2301_v8, %v2300_v23  ;;  %v2059_v53 = vmul.f32 %v6933_v7, %v6933_v7  ;;  %v5803_v17 = vpop.eup %5802  ;;  %v6945_v0 = vmul.f32 0.5, %v6878_v57 }
 0x351   : > { %5812 = vtanh.f32 %v2183_v13  ;;  %v2186_v50 = vmul.f32 0.7978846, %v2154_v52  ;;  %v2064_v36 = vmul.f32 %v6937_v34, %v6937_v34  ;;  %v5805_v6 = vpop.eup %5804  ;;  %v2062_v27 = vmul.f32 %v6940_v46, %v6940_v46 }
 0x352   : > { %5814 = vtanh.f32 %v2188_v63  ;;  %v2157_v31 = vmul.f32 %v2125_v25, %v6919_v18  ;;  %5396 = vmatmul.mubr.bf16.gmra.mrb[40].mxu1 %v2344_v32  ;;  %v2091_v58 = vmul.f32 0.044715, %v2059_v53  ;;  %v2270_v48 = vadd.f32 1.0, %v6908_v12 }
 0x353   : > { %5816 = vtanh.f32 %v2186_v50  ;;  %v2096_v14 = vmul.f32 0.044715, %v2064_v36  ;;  %v2271_v57 = vadd.f32 1.0, %v5797_v44  ;;  %v2094_v11 = vmul.f32 0.044715, %v2062_v27 }
 0x354   : > { %v2189_v4 = vmul.f32 0.7978846, %v2157_v31  ;;  %v2123_v43 = vadd.f32 1.0, %v2091_v58  ;;  %v6954_v42 = vadd.f32 %v5370_v41, %v6750_v56  ;;  %v2302_v10 = vmul.f32 %v2270_v48, %v6846_v20 }
 0x355   : > { %v2128_v54 = vadd.f32 1.0, %v2096_v14  ;;  %v2303_v9 = vmul.f32 %v2271_v57, %v6858_v55  ;;  %v2272_v37 = vadd.f32 1.0, %v6902_v24  ;;  %v2126_v61 = vadd.f32 1.0, %v2094_v11 }
 0x356   : > { %5818 = vtanh.f32 %v2189_v4  ;;  %v2155_v22 = vmul.f32 %v2123_v43, %v6933_v7  ;;  %v2065_v12 = vmul.f32 %v6954_v42, %v6954_v42  ;;  %v5807_v15 = vpop.eup %5806  ;;  %v2217_v29 = vmul.f32 0.5, %v6885_v39 }
 0x357   : > { %v2160_v19 = vmul.f32 %v2128_v54, %v6937_v34  ;;  %v2345_v44 = vpack.c.bf16 %v2303_v9, %v2302_v10  ;;  %v2273_v33 = vadd.f32 1.0, %v6921_v1  ;;  %v2158_v55 = vmul.f32 %v2126_v61, %v6940_v46 }
 0x358   : > { %v2187_v20 = vmul.f32 0.7978846, %v2155_v22  ;;  %v2097_v45 = vmul.f32 0.044715, %v2065_v12  ;;  %v2304_v24 = vmul.f32 %v2272_v37, %v6844_v40  ;;  %v5809_v49 = vpop.eup %5808  ;;  %v6969_v13 = vadd.f32 %v6750_v56, %v2022_v16 }
 0x359   : > { %v2192_v62 = vmul.f32 0.7978846, %v2160_v19  ;;  %5399 = vmatprep.mubr.bf16.mxu1 %v2345_v44  ;;  %v2305_v41 = vmul.f32 %v2273_v33, %v6856_v5  ;;  %v2274_v39 = vadd.f32 1.0, %v5801_v30  ;;  %v5811_v21 = vpop.eup %5810  ;;  %v2215_v23 = vmul.f32 0.5, %v6894_v3 }
 0x35a   : > { %5820 = vtanh.f32 %v2187_v20  ;;  %v2129_v1 = vadd.f32 1.0, %v2097_v45  ;;  %v2275_v63 = vadd.f32 1.0, %v5805_v6  ;;  %v2220_v8 = vmul.f32 0.5, %v6897_v2 }
 0x35b   : > { %v5813_v59 = vpop.eup %5812  ;;  %v2190_v52 = vmul.f32 0.7978846, %v2158_v55  ;;  %v2346_v40 = vpack.c.bf16 %v2305_v41, %v2304_v24  ;;  %v2063_v25 = vmul.f32 %v6969_v13, %v6969_v13  ;;  %5822 = vtanh.f32 %v2192_v62 }
 0x35c   : > { %v5815_v32 = vpop.eup %5814  ;;  %v2161_v56 = vmul.f32 %v2129_v1, %v6954_v42  ;;  %v2306_v5 = vmul.f32 %v2274_v39, %v6874_v47  ;;  %v2307_v16 = vmul.f32 %v2275_v63, %v6887_v35  ;;  %v2276_v53 = vadd.f32 1.0, %v6929_v60 }
 0x35d   : > { %v5817_v3 = vpop.eup %5816  ;;  %5400 = vmatmul.mubr.bf16.gmra.mrb[44].mxu1 %v2346_v40  ;;  %v2095_v30 = vmul.f32 0.044715, %v2063_v25  ;;  %v2277_v50 = vadd.f32 1.0, %v5803_v17  ;;  %v2278_v2 = vadd.f32 1.0, %v5809_v49  ;;  %v2279_v31 = vadd.f32 1.0, %v5813_v59  ;;  %v3783_v25 = vld [vmem:[%s8263_s4] sm:$0xff] }
 0x35e   : > { %v2193_v36 = vmul.f32 0.7978846, %v2161_v56  ;;  %v2347_v6 = vpack.c.bf16 %v2307_v16, %v2306_v5  ;;  %v2280_v58 = vadd.f32 1.0, %v5807_v15  ;;  %v2221_v27 = vmul.f32 0.5, %v6919_v18  ;;  %s5036_s4 = sld [smem:[#allocation3 + $0x1]] }
 0x35f   : > { %v2127_v14 = vadd.f32 1.0, %v2095_v30  ;;  %v2308_v48 = vmul.f32 %v2276_v53, %v6872_v28  ;;  %v2309_v47 = vmul.f32 %v2277_v50, %v6882_v38  ;;  %v2310_v35 = vmul.f32 %v2278_v2, %v6945_v0 }
 0x360   : > { %v5819_v57 = vpop.eup %5818  ;;  %5824 = vtanh.f32 %v2193_v36  ;;  %5403 = vmatprep.mubr.bf16.mxu1 %v2347_v6  ;;  %v2311_v4 = vmul.f32 %v2279_v31, %v2215_v23  ;;  %v2281_v60 = vadd.f32 1.0, %v5811_v21  ;;  %v2284_v11 = vadd.f32 1.0, %v5815_v32  ;;  %v5551_v31 = vld [vmem:[%s8201_s13 + $0xc8] sm:$0xff]  }
 0x361   : > { %5826 = vtanh.f32 %v2190_v52  ;;  %v2159_v17 = vmul.f32 %v2127_v14, %v6969_v13  ;;  %v2348_v43 = vpack.c.bf16 %v2309_v47, %v2308_v48  ;;  %v2312_v18 = vmul.f32 %v2280_v58, %v6904_v51  ;;  %v5552_v58 = vld [vmem:[%s8201_s13 + $0x88] sm:$0xff]   ;;  %v5554_v14 = vld [vmem:[%s8201_s13 + $0x90] sm:$0xff]   ;;  %v5555_v48 = vld [vmem:[%s8201_s13 + $0xd8] sm:$0xff]  }
 0x362   : > { %v2349_v54 = vpack.c.bf16 %v2311_v4, %v2310_v35  ;;  %v2313_v10 = vmul.f32 %v2281_v60, %v2217_v29  ;;  %v2285_v9 = vadd.f32 1.0, %v5819_v57  ;;  %v2282_v37 = vadd.f32 1.0, %v5817_v3  ;;  %v5566_v47 = vld [vmem:[%s8199_s11] ss:$8 sps:$4 sm:$0xff]   ;;  %v5568_v57 = vld [vmem:[%s8199_s11 + $0x4] ss:$8 sps:$4 sm:$0xff]  }
 0x363   : > { %v2191_v28 = vmul.f32 0.7978846, %v2159_v17  ;;  %v2316_v61 = vmul.f32 %v2284_v11, %v2220_v8  ;;  %v2218_v0 = vmul.f32 0.5, %v6911_v26  ;;  %v2219_v15 = vmul.f32 0.5, %v6933_v7  ;;  %v5556_v35 = vld [vmem:[%s8201_s13 + $0x98] sm:$0xff]   ;;  %2982 = vmatprep.subr.bf16.mxu0 %v5568_v57  ;;  %v5557_v4 = vld [vmem:[%s8201_s13 + $0xe0] sm:$0xff]  }
 0x364   : > { %v5821_v38 = vpop.eup %5820  ;;  %v2350_v22 = vpack.c.bf16 %v2313_v10, %v2312_v18  ;;  %v2317_v12 = vmul.f32 %v2285_v9, %v2221_v27  ;;  %v2892_v20 = vlaneseq  ;;  %v6070_v51 = vmov 1983009808   ;;  %v5553_v27 = vld [vmem:[%s8201_s13 + $0xd0] sm:$0xff]   ;;  %2983 = vmatpush1.bf16.msra.mxu0 %v5566_v47  ;;  %v5559_v11 = vld [vmem:[%s8201_s13 + $0xe8] sm:$0xff]   ;;  %v5563_v9 = vld [vmem:[%s8201_s13 + $0xf8] sm:$0xff]  }
 0x365   : > { %5828 = vtanh.f32 %v2191_v28  ;;  %5404 = vmatmul.mubr.bf16.gmra.mrb[48].mxu1 %v2348_v43  ;;  %v2283_v19 = vadd.f32 1.0, %v5821_v38  ;;  %v5823_v44 = vpop.eup %5822  ;;  %v3852_v29 = vunpack.c.l.s4 %v6070_v51  ;;  %v2314_v55 = vmul.f32 %v2282_v37, %v2218_v0  ;;  %v5569_v60 = vld [vmem:[%s8199_s11 + $0x10] ss:$8 sps:$4 sm:$0xff]   ;;  %v5571_v17 = vld [vmem:[%s8199_s11 + $0x14] ss:$8 sps:$4 sm:$0xff]   ;;  %v5558_v43 = vld [vmem:[%s8201_s13 + $0xa0] sm:$0xff]  }
 0x366   : > { %5407 = vmatprep.mubr.bf16.mxu1 %v2349_v54  ;;  %v2352_v33 = vpack.c.bf16 %v2317_v12, %v2316_v61  ;;  %v2288_v49 = vadd.f32 1.0, %v5823_v44  ;;  %v6987_v41 = vshrl.u32 %v2892_v20, 7  ;;  %v2224_v7 = vmul.f32 0.5, %v6937_v34  ;;  %2984 = vmatprep.subr.bf16.mxu0 %v5571_v17  ;;  %v5560_v54 = vld [vmem:[%s8201_s13 + $0xa8] sm:$0xff]   ;;  %v5561_v18 = vld [vmem:[%s8201_s13 + $0xf0] sm:$0xff]   ;;  %v5564_v28 = vld [vmem:[%s8201_s13 + $0xb8] sm:$0xff]  }
 0x367   : > { %v2315_v45 = vmul.f32 %v2283_v19, %v2219_v15  ;;  %v3853_v39 = vunpack.c.0.s8 %v3852_v29  ;;  %v2225_v21 = vmul.f32 0.5, %v6954_v42  ;;  %v2222_v32 = vmul.f32 0.5, %v6940_v46  ;;  %v5550_v46 = vld [vmem:[%s8201_s13 + $0x80] sm:$0xff]   ;;  %v5562_v10 = vld [vmem:[%s8201_s13 + $0xb0] sm:$0xff]   ;;  %v5591_v47 = vld [vmem:[%s8203_s15 + $0x8] sm:$0xff]  }
 0x368   : > { %8262 = vst [vmem:[#allocation6_spill] sm:$0xff] %v6987_v41  ;;  %v2320_v1 = vmul.f32 %v2288_v49, %v2224_v7  ;;  %v2223_v34 = vmul.f32 0.5, %v6969_v13  ;;  %v3850_v53 = vcombine.high %v3783_v25, %v3783_v25  ;;  %2985 = vmatpush1.bf16.msra.mxu0 %v5569_v60  ;;  %v5574_v38 = vld [vmem:[%s8199_s11 + $0x24] ss:$8 sps:$4 sm:$0xff]   ;;  %v5577_v61 = vld [vmem:[%s8199_s11 + $0x34] ss:$8 sps:$4 sm:$0xff]  }
 0x369   : > { %v2351_v24 = vpack.c.bf16 %v2315_v45, %v2314_v55  ;;  %v3856_v8 = vsub.s32 %v3853_v39, %v6987_v41  ;;  %2986 = vmatprep.subr.bf16.mxu0 %v5574_v38  ;;  %v5575_v12 = vld [vmem:[%s8199_s11 + $0x30] ss:$8 sps:$4 sm:$0xff]   ;;  %v5580_v0 = vld [vmem:[%s8199_s11 + $0x44] ss:$8 sps:$4 sm:$0xff]   ;;  %v5578_v15 = vld [vmem:[%s8199_s11 + $0x40] ss:$8 sps:$4 sm:$0xff]  }
 0x36a   : > { %v5825_v62 = vpop.eup %5824  ;;  %v5583_v19 = vld [vmem:[%s8199_s11 + $0x54] ss:$8 sps:$4 sm:$0xff]   ;;  %v5581_v44 = vld [vmem:[%s8199_s11 + $0x50] ss:$8 sps:$4 sm:$0xff]   ;;  %v5584_v20 = vld [vmem:[%s8199_s11 + $0x60] ss:$8 sps:$4 sm:$0xff]  }
 0x36b   : > { %v5827_v26 = vpop.eup %5826  ;;  %v2289_v23 = vadd.f32 1.0, %v5825_v62  ;;  %v3857_v16 = vrot.slane %v3783_v25, %v3856_v8  ;;  %v3864_v2 = vrot.slane %v3850_v53, %v3856_v8  ;;  %v5589_v51 = vld [vmem:[%s8199_s11 + $0x74] ss:$8 sps:$4 sm:$0xff]   ;;  %v5587_v29 = vld [vmem:[%s8199_s11 + $0x70] ss:$8 sps:$4 sm:$0xff]   ;;  %v8218_v55 = vmov 0  }
 0x36c   : > { %v2286_v59 = vadd.f32 1.0, %v5827_v26  ;;  %3014 = vmatprep.mubr.bf16.mxu0 %v8218_v55  ;;  %v7094_v45 = vld [vmem:[%s8198_s10] ss:$0 sm:$0xff] }
 0x36d   : > { %5408 = vmatmul.mubr.bf16.gmra.mrb[52].mxu1 %v2350_v22  ;;  %v2321_v63 = vmul.f32 %v2289_v23, %v2225_v21  ;;  %v3865_v30 = vcombine.high %v3857_v16, %v3857_v16  ;;  %v3866_v36 = vcombine.high %v3864_v2, %v3864_v2  ;;  %v3871_v6 = vpack.c.bf16 %v3857_v16, %v3857_v16  ;;  %v5572_v22 = vld [vmem:[%s8199_s11 + $0x20] ss:$8 sps:$4 sm:$0xff]  }
 0x36e   : > { %5411 = vmatprep.mubr.bf16.mxu1 %v2351_v24  ;;  %v2318_v42 = vmul.f32 %v2286_v59, %v2222_v32  ;;  %v3873_v37 = vpack.c.bf16 %v3864_v2, %v3864_v2  ;;  %2987 = vmatpush1.bf16.msra.mxu0 %v5572_v22  ;;  %v5593_v22 = vld [vmem:[%s8203_s15 + $0x18] sm:$0xff]  }
 0x36f   : > { %v5829_v52 = vpop.eup %5828  ;;  %v2354_v40 = vpack.c.bf16 %v2321_v63, %v2320_v1  ;;  %v3872_v50 = vpack.c.bf16 %v3865_v30, %v3865_v30  ;;  %v3874_v13 = vpack.c.bf16 %v3866_v36, %v3866_v36  ;;  %2988 = vmatprep.subr.bf16.mxu0 %v5577_v61  ;;  %v5594_v61 = vld [vmem:[%s8203_s15 + $0x20] sm:$0xff]  }
 0x370   : > { %v2287_v56 = vadd.f32 1.0, %v5829_v52 }
 0x372   : > { %v2319_v5 = vmul.f32 %v2287_v56, %v2223_v34  ;;  %2989 = vmatpush1.bf16.msra.mxu0 %v5575_v12 }
 0x373   : > { %2990 = vmatprep.subr.bf16.mxu0 %v5580_v0  ;;  %v5595_v0 = vld [vmem:[%s8203_s15 + $0x28] sm:$0xff]  }
 0x374   : > { %v2353_v3 = vpack.c.bf16 %v2319_v5, %v2318_v42 }
 0x375   : > { %5412 = vmatmul.mubr.bf16.gmra.mrb[56].mxu1 %v2352_v33  ;;  %v5586_v33 = vld [vmem:[%s8199_s11 + $0x64] ss:$8 sps:$4 sm:$0xff]  }
 0x376   : > { %5415 = vmatprep.mubr.bf16.mxu1 %v2353_v3  ;;  %2991 = vmatpush1.bf16.msra.mxu0 %v5578_v15 }
 0x377   : > { %2992 = vmatprep.subr.bf16.mxu0 %v5583_v19 }
 0x37a   : > { %2993 = vmatpush1.bf16.msra.mxu0 %v5581_v44 }
 0x37b   : > { %2994 = vmatprep.subr.bf16.mxu0 %v5586_v33 }
 0x37d   : > { %5416 = vmatmul.mubr.bf16.gmra.mrb[60].mxu1 %v2354_v40 }
 0x37e   : > { %4105 = vmatprep.mubr.bf16.mxu1 %v3872_v50  ;;  %2995 = vmatpush1.bf16.msra.mxu0 %v5584_v20 }
 0x37f   : > { %2996 = vmatprep.subr.bf16.mxu0 %v5589_v51 }
 0x382   : > { %2997 = vmatpush1.bf16.msra.mxu0 %v5587_v29 }
 0x385   : > { %4106 = vmatmul.mubr.bf16.vlgmr.msra.gmra.mrb[64].mxu1 %v3871_v6 }
 0x386   : > { %5157 = vmatpush3.bf16.msra.mxu1 %v5550_v46  ;;  %4145 = vmatprep.mubr.bf16.mxu1 %v3874_v13  ;;  %v5590_v13 = vld [vmem:[%s8203_s15] sm:$0xff]  }
 0x387   : > { %5158 = vmatprep.subr.bf16.mxu1 %v5551_v31 }
 0x38a   : > { %5159 = vmatpush3.bf16.msra.mxu1 %v5552_v58 }
 0x38b   : > { %5160 = vmatprep.subr.bf16.mxu1 %v5553_v27  ;;  %v6072_v27 = vmov 0.0  }
 0x38c   : > { %5459 = vmatprep.subr.bf16.mxu0 %v6072_v27 }
 0x38e   : > { %5161 = vmatpush3.bf16.msra.mxu1 %v5554_v14 }
 0x38f   : > { %5162 = vmatprep.subr.bf16.mxu1 %v5555_v48 }
 0x392   : > { %5163 = vmatpush3.bf16.msra.mxu1 %v5556_v35 }
 0x393   : > { %5164 = vmatprep.subr.bf16.mxu1 %v5557_v4 }
 0x396   : > { %5165 = vmatpush3.bf16.msra.mxu1 %v5558_v43 }
 0x397   : > { %5166 = vmatprep.subr.bf16.mxu1 %v5559_v11 }
 0x39a   : > { %5167 = vmatpush3.bf16.msra.mxu1 %v5560_v54 }
 0x39b   : > { %5168 = vmatprep.subr.bf16.mxu1 %v5561_v18 }
 0x39e   : > { %5169 = vmatpush3.bf16.msra.mxu1 %v5562_v10 }
 0x39f   : > { %5170 = vmatprep.subr.bf16.mxu1 %v5563_v9 }
 0x3a2   : > { %5171 = vmatpush3.bf16.msra.mxu1 %v5564_v28  ;;  %v5592_v28 = vld [vmem:[%s8203_s15 + $0x10] sm:$0xff]  }
 0x3a3   : > { %5419 = vmatprep.subr.bf16.mxu1 %v6072_v27 }
 0x3a5   : > { %4146 = vmatmul.mubr.bf16.vlgmr.msra.gmra.mrb[68].mxu1 %v3873_v37 }
 0x3a6   : > { %5420 = vmatpush3.bf16.msra.mxu1 %v5590_v13  ;;  %5435 = vmatprep.mubr.msk.bf16.mxu1 %vm6073_vm3, %v6072_v27 }
 0x3a7   : > { %5421 = vmatprep.subr.bf16.mxu1 %v6072_v27 }
 0x3aa   : > { %5422 = vmatpush3.bf16.msra.mxu1 %v5591_v47 }
 0x3ab   : > { %5423 = vmatprep.subr.bf16.mxu1 %v6072_v27 }
 0x3ae   : > { %5424 = vmatpush3.bf16.msra.mxu1 %v5592_v28 }
 0x3af   : > { %5425 = vmatprep.subr.bf16.mxu1 %v6072_v27 }
 0x3b2   : > { %5426 = vmatpush3.bf16.msra.mxu1 %v5593_v22 }
 0x3b3   : > { %5427 = vmatprep.subr.bf16.mxu1 %v6072_v27 }
 0x3b6   : > { %5428 = vmatpush3.bf16.msra.mxu1 %v5594_v61 }
 0x3b7   : > { %5429 = vmatprep.subr.bf16.mxu1 %v6072_v27 }
 0x3ba   : > { %5430 = vmatpush3.bf16.msra.mxu1 %v5595_v0 }
 0x3bb   : > { %5431 = vmatprep.subr.bf16.mxu1 %v6072_v27 }
 0x3f4   : > { %v5389_v24 = vpop.f32.mrb[32].mxu1 }
 0x3f5   : > { %v2452_v49 = vadd.f32 %v5389_v24, %v7094_v45  ;;  %v2443_v62 = vpop.f32.mrb[33].mxu1 }
 0x3f6   : > { %v2444_v39 = vadd.f32 %v7094_v45, %v2443_v62  ;;  %v5390_v26 = vpop.f32.mrb[34].mxu1  ;;  %v5596_v62 = vld [vmem:[%s8203_s15 + $0x30] sm:$0xff]  }
 0x3f7   : > { %v2572_v7 = vmul.f32 %v2452_v49, %v2452_v49  ;;  %v2455_v21 = vadd.f32 %v5390_v26, %v7094_v45  ;;  %v2446_v23 = vpop.f32.mrb[35].mxu1  ;;  %v2732_v35 = vmul.f32 0.5, %v2452_v49  ;;  %5432 = vmatpush3.bf16.msra.mxu1 %v5596_v62 }
 0x3f8   : > { %v2570_v1 = vmul.f32 %v2444_v39, %v2444_v39  ;;  %v2447_v63 = vadd.f32 %v7094_v45, %v2446_v23  ;;  %v2730_v17 = vmul.f32 0.5, %v2444_v39  ;;  %5433 = vmatprep.subr.bf16.mxu1 %v6072_v27 }
 0x3f9   : > { %v2604_v59 = vmul.f32 0.044715, %v2572_v7  ;;  %v2573_v8 = vmul.f32 %v2455_v21, %v2455_v21  ;;  %v2733_v4 = vmul.f32 0.5, %v2455_v21 }
 0x3fa   : > { %v2602_v52 = vmul.f32 0.044715, %v2570_v1  ;;  %v2571_v40 = vmul.f32 %v2447_v63, %v2447_v63  ;;  %v2731_v43 = vmul.f32 0.5, %v2447_v63 }
 0x3fb   : > { %v2636_v25 = vadd.f32 1.0, %v2604_v59  ;;  %v2605_v32 = vmul.f32 0.044715, %v2573_v8  ;;  %v5597_v8 = vld [vmem:[%s8203_s15 + $0x38] sm:$0xff]  }
 0x3fc   : > { %v2634_v34 = vadd.f32 1.0, %v2602_v52  ;;  %v2603_v56 = vmul.f32 0.044715, %v2571_v40  ;;  %5434 = vmatpush3.bf16.msra.mxu1 %v5597_v8 }
 0x3fd   : > { %v2668_v42 = vmul.f32 %v2636_v25, %v2452_v49  ;;  %v2637_v5 = vadd.f32 1.0, %v2605_v32  ;;  %5439 = vmatprep.subr.bf16.mxu1 %v6072_v27 }
 0x3fe   : > { %v2666_v16 = vmul.f32 %v2634_v34, %v2444_v39  ;;  %v2635_v3 = vadd.f32 1.0, %v2603_v56 }
 0x3ff   : > { %v2700_v30 = vmul.f32 0.7978846, %v2668_v42  ;;  %v2669_v53 = vmul.f32 %v2637_v5, %v2455_v21 }
 0x400   : > { %v2698_v50 = vmul.f32 0.7978846, %v2666_v16  ;;  %v2667_v2 = vmul.f32 %v2635_v3, %v2447_v63 }
 0x401   : > { %5830 = vtanh.f32 %v2700_v30  ;;  %v2701_v36 = vmul.f32 0.7978846, %v2669_v53 }
 0x402   : > { %5832 = vtanh.f32 %v2698_v50  ;;  %v2699_v6 = vmul.f32 0.7978846, %v2667_v2 }
 0x403   : > { %5834 = vtanh.f32 %v2701_v36 }
 0x404   : > { %5836 = vtanh.f32 %v2699_v6 }
 0x40b   : > { %v5831_v46 = vpop.eup %5830 }
 0x40c   : > { %v5833_v31 = vpop.eup %5832  ;;  %v2796_v58 = vadd.f32 1.0, %v5831_v46 }
 0x40d   : > { %v5835_v14 = vpop.eup %5834  ;;  %v2794_v48 = vadd.f32 1.0, %v5833_v31 }
 0x40e   : > { %v5837_v57 = vpop.eup %5836  ;;  %v2797_v60 = vadd.f32 1.0, %v5835_v14  ;;  %v2828_v54 = vmul.f32 %v2796_v58, %v2732_v35 }
 0x40f   : > { %v2795_v11 = vadd.f32 1.0, %v5837_v57  ;;  %v2826_v10 = vmul.f32 %v2794_v48, %v2730_v17 }
 0x410   : > { %v2829_v18 = vmul.f32 %v2797_v60, %v2733_v4 }
 0x411   : > { %v2827_v9 = vmul.f32 %v2795_v11, %v2731_v43 }
 0x412   : > { %v2876_v37 = vpack.c.bf16 %v2829_v18, %v2828_v54 }
 0x413   : > { %v2875_v38 = vpack.c.bf16 %v2827_v9, %v2826_v10 }
 0x415   : > { %3015 = vmatmul.mubr.bf16.vlgmr.msra.gmra.mrb[64].mxu0 %v2875_v38 }
 0x416   : > { %3024 = vmatprep.mubr.bf16.mxu0 %v8218_v55 }
 0x419   : > { %v5393_v12 = vpop.f32.mrb[36].mxu1 }
 0x41a   : > { %v7126_v15 = vadd.f32 %v5393_v12, %v7094_v45  ;;  %v2459_v19 = vpop.f32.mrb[37].mxu1 }
 0x41b   : > { %v2460_v44 = vadd.f32 %v7094_v45, %v2459_v19  ;;  %v5394_v33 = vpop.f32.mrb[38].mxu1 }
 0x41c   : > { %v2576_v20 = vmul.f32 %v7126_v15, %v7126_v15  ;;  %v2471_v51 = vadd.f32 %v5394_v33, %v7094_v45  ;;  %v2462_v29 = vpop.f32.mrb[39].mxu1  ;;  %v7152_v18 = vmul.f32 0.5, %v7126_v15 }
 0x41d   : > { %3025 = vmatmul.mubr.bf16.gmra.mrb[68].mxu0 %v2876_v37  ;;  %v2574_v24 = vmul.f32 %v2460_v44, %v2460_v44  ;;  %v2463_v49 = vadd.f32 %v7094_v45, %v2462_v29  ;;  %v2734_v28 = vmul.f32 0.5, %v2460_v44 }
 0x41e   : > { %3034 = vmatprep.mubr.bf16.mxu0 %v8218_v55  ;;  %v2608_v39 = vmul.f32 0.044715, %v2576_v20  ;;  %v2577_v26 = vmul.f32 %v2471_v51, %v2471_v51  ;;  %v7155_v12 = vmul.f32 0.5, %v2471_v51 }
 0x41f   : > { %v2606_v7 = vmul.f32 0.044715, %v2574_v24  ;;  %v2575_v21 = vmul.f32 %v2463_v49, %v2463_v49  ;;  %v2735_v0 = vmul.f32 0.5, %v2463_v49 }
 0x420   : > { %v2640_v23 = vadd.f32 1.0, %v2608_v39  ;;  %v2609_v1 = vmul.f32 0.044715, %v2577_v26 }
 0x421   : > { %v2638_v63 = vadd.f32 1.0, %v2606_v7  ;;  %v2607_v59 = vmul.f32 0.044715, %v2575_v21 }
 0x422   : > { %v2672_v52 = vmul.f32 %v2640_v23, %v7126_v15  ;;  %v2641_v40 = vadd.f32 1.0, %v2609_v1 }
 0x423   : > { %v2670_v25 = vmul.f32 %v2638_v63, %v2460_v44  ;;  %v2639_v32 = vadd.f32 1.0, %v2607_v59 }
 0x424   : > { %v2704_v34 = vmul.f32 0.7978846, %v2672_v52  ;;  %v2673_v30 = vmul.f32 %v2641_v40, %v2471_v51 }
 0x425   : > { %v5397_v56 = vpop.f32.mrb[40].mxu1  ;;  %v2671_v42 = vmul.f32 %v2639_v32, %v2463_v49  ;;  %v2702_v3 = vmul.f32 0.7978846, %v2670_v25 }
 0x426   : > { %v2484_v5 = vadd.f32 %v5397_v56, %v7094_v45  ;;  %v2475_v16 = vpop.f32.mrb[41].mxu1  ;;  %5838 = vtanh.f32 %v2704_v34  ;;  %v2705_v14 = vmul.f32 0.7978846, %v2673_v30 }
 0x427   : > { %v2476_v53 = vadd.f32 %v7094_v45, %v2475_v16  ;;  %v5398_v50 = vpop.f32.mrb[42].mxu1  ;;  %v2703_v2 = vmul.f32 0.7978846, %v2671_v42  ;;  %5840 = vtanh.f32 %v2702_v3 }
 0x428   : > { %v2580_v36 = vmul.f32 %v2484_v5, %v2484_v5  ;;  %v2478_v6 = vpop.f32.mrb[43].mxu1  ;;  %v2487_v13 = vadd.f32 %v5398_v50, %v7094_v45  ;;  %v7158_v24 = vmul.f32 0.5, %v2484_v5 }
 0x429   : > { %v2578_v46 = vmul.f32 %v2476_v53, %v2476_v53  ;;  %v2479_v58 = vadd.f32 %v7094_v45, %v2478_v6  ;;  %5842 = vtanh.f32 %v2703_v2  ;;  %v7160_v62 = vmul.f32 0.5, %v2476_v53 }
 0x42a   : > { %v2612_v31 = vmul.f32 0.044715, %v2580_v36  ;;  %v2581_v47 = vmul.f32 %v2487_v13, %v2487_v13  ;;  %5844 = vtanh.f32 %v2705_v14  ;;  %v7162_v26 = vmul.f32 0.5, %v2487_v13 }
 0x42b   : > { %v2610_v48 = vmul.f32 0.044715, %v2578_v46  ;;  %v2579_v35 = vmul.f32 %v2479_v58, %v2479_v58  ;;  %v7164_v7 = vmul.f32 0.5, %v2479_v58 }
 0x42c   : > { %v2644_v57 = vadd.f32 1.0, %v2612_v31  ;;  %v2613_v60 = vmul.f32 0.044715, %v2581_v47 }
 0x42d   : > { %v2642_v4 = vadd.f32 1.0, %v2610_v48  ;;  %v2611_v43 = vmul.f32 0.044715, %v2579_v35 }
 0x42e   : > { %v2676_v17 = vmul.f32 %v2644_v57, %v2484_v5  ;;  %v2645_v54 = vadd.f32 1.0, %v2613_v60 }
 0x42f   : > { %v2674_v11 = vmul.f32 %v2642_v4, %v2476_v53  ;;  %v2643_v10 = vadd.f32 1.0, %v2611_v43 }
 0x430   : > { %v5401_v9 = vpop.f32.mrb[44].mxu1  ;;  %v2708_v37 = vmul.f32 0.7978846, %v2676_v17  ;;  %v2677_v38 = vmul.f32 %v2645_v54, %v2487_v13  ;;  %v5839_v29 = vpop.eup %5838 }
 0x431   : > { %v2500_v22 = vadd.f32 %v5401_v9, %v7094_v45  ;;  %v2491_v61 = vpop.f32.mrb[45].mxu1  ;;  %v2675_v19 = vmul.f32 %v2643_v10, %v2479_v58  ;;  %v2706_v15 = vmul.f32 0.7978846, %v2674_v11  ;;  %v5841_v49 = vpop.eup %5840  ;;  %v2800_v25 = vadd.f32 1.0, %v5839_v29 }
 0x432   : > { %v2492_v33 = vadd.f32 %v7094_v45, %v2491_v61  ;;  %v5402_v20 = vpop.f32.mrb[46].mxu1  ;;  %5846 = vtanh.f32 %v2708_v37  ;;  %v2709_v23 = vmul.f32 0.7978846, %v2677_v38  ;;  %v2798_v30 = vadd.f32 1.0, %v5841_v49 }
 0x433   : > { %v2584_v39 = vmul.f32 %v2500_v22, %v2500_v22  ;;  %v2494_v44 = vpop.f32.mrb[47].mxu1  ;;  %v2503_v51 = vadd.f32 %v5402_v20, %v7094_v45  ;;  %v5843_v59 = vpop.eup %5842  ;;  %v2707_v8 = vmul.f32 0.7978846, %v2675_v19  ;;  %5848 = vtanh.f32 %v2706_v15 }
 0x434   : > { %v2582_v21 = vmul.f32 %v2492_v33, %v2492_v33  ;;  %v2495_v63 = vadd.f32 %v7094_v45, %v2494_v44  ;;  %v7168_v34 = vmul.f32 0.5, %v2500_v22  ;;  %v7170_v5 = vmul.f32 0.5, %v2492_v33  ;;  %v5845_v53 = vpop.eup %5844 }
 0x435   : > { %v2616_v1 = vmul.f32 0.044715, %v2584_v39  ;;  %v2585_v40 = vmul.f32 %v2503_v51, %v2503_v51  ;;  %5850 = vtanh.f32 %v2709_v23  ;;  %v2799_v6 = vadd.f32 1.0, %v5843_v59 }
 0x436   : > { %v2614_v52 = vmul.f32 0.044715, %v2582_v21  ;;  %v2583_v56 = vmul.f32 %v2495_v63, %v2495_v63  ;;  %5852 = vtanh.f32 %v2707_v8  ;;  %v7174_v14 = vmul.f32 0.5, %v2503_v51 }
 0x437   : > { %v2648_v32 = vadd.f32 1.0, %v2616_v1  ;;  %v2617_v16 = vmul.f32 0.044715, %v2585_v40  ;;  %v7176_v47 = vmul.f32 0.5, %v2495_v63  ;;  %v2830_v17 = vmul.f32 %v2798_v30, %v2734_v28 }
 0x438   : > { %v2646_v42 = vadd.f32 1.0, %v2614_v52  ;;  %v5405_v3 = vpop.f32.mrb[48].mxu1  ;;  %v2615_v50 = vmul.f32 0.044715, %v2583_v56  ;;  %v7178_v43 = vadd.f32 1.0, %v5845_v53  ;;  %v2831_v9 = vmul.f32 %v2799_v6, %v2735_v0 }
 0x439   : > { %v2516_v2 = vadd.f32 %v5405_v3, %v7094_v45  ;;  %v2507_v36 = vpop.f32.mrb[49].mxu1  ;;  %v2680_v46 = vmul.f32 %v2648_v32, %v2500_v22  ;;  %v2649_v13 = vadd.f32 1.0, %v2617_v16  ;;  %v7183_v61 = vmul.f32 %v2800_v25, %v7152_v18 }
 0x43a   : > { %v2508_v31 = vadd.f32 %v7094_v45, %v2507_v36  ;;  %v5406_v58 = vpop.f32.mrb[50].mxu1  ;;  %v2647_v48 = vadd.f32 1.0, %v2615_v50  ;;  %v2678_v4 = vmul.f32 %v2646_v42, %v2492_v33  ;;  %v2877_v25 = vpack.c.bf16 %v2831_v9, %v2830_v17 }
 0x43b   : > { %v2588_v57 = vmul.f32 %v2516_v2, %v2516_v2  ;;  %v2510_v35 = vpop.f32.mrb[51].mxu1  ;;  %v2681_v11 = vmul.f32 %v2649_v13, %v2503_v51  ;;  %v2519_v10 = vadd.f32 %v5406_v58, %v7094_v45  ;;  %v2712_v37 = vmul.f32 0.7978846, %v2680_v46 }
 0x43c   : > { %v2586_v60 = vmul.f32 %v2508_v31, %v2508_v31  ;;  %v2511_v22 = vadd.f32 %v7094_v45, %v2510_v35  ;;  %v7185_v19 = vpop.eup %5846  ;;  %v2679_v20 = vmul.f32 %v2647_v48, %v2495_v63  ;;  %v7187_v29 = vmul.f32 0.5, %v2516_v2  ;;  %3035 = vmatmul.mubr.bf16.gmra.mrb[72].mxu0 %v2877_v25 }
 0x43d   : > { %v2620_v54 = vmul.f32 0.044715, %v2588_v57  ;;  %v2589_v28 = vmul.f32 %v2519_v10, %v2519_v10  ;;  %v2710_v15 = vmul.f32 0.7978846, %v2678_v4  ;;  %v7189_v44 = vmul.f32 0.5, %v2508_v31  ;;  %v7191_v51 = vpop.eup %5848  ;;  %3044 = vmatprep.mubr.bf16.mxu0 %v8218_v55 }
 0x43e   : > { %v2618_v38 = vmul.f32 0.044715, %v2586_v60  ;;  %v2587_v21 = vmul.f32 %v2511_v22, %v2511_v22  ;;  %v2713_v49 = vmul.f32 0.7978846, %v2681_v11  ;;  %5854 = vtanh.f32 %v2712_v37 }
 0x43f   : > { %v2652_v33 = vadd.f32 1.0, %v2620_v54  ;;  %v2621_v1 = vmul.f32 0.044715, %v2589_v28  ;;  %v7195_v32 = vpop.eup %5850  ;;  %v2711_v56 = vmul.f32 0.7978846, %v2679_v20  ;;  %5856 = vtanh.f32 %v2710_v15 }
 0x440   : > { %v2650_v39 = vadd.f32 1.0, %v2618_v38  ;;  %v5409_v0 = vpop.f32.mrb[52].mxu1  ;;  %v2619_v63 = vmul.f32 0.044715, %v2587_v21  ;;  %v7197_v30 = vpop.eup %5852  ;;  %v7199_v53 = vmul.f32 0.5, %v2519_v10  ;;  %5858 = vtanh.f32 %v2713_v49 }
 0x441   : > { %v2684_v23 = vmul.f32 %v2652_v33, %v2516_v2  ;;  %v2532_v18 = vadd.f32 %v5409_v0, %v7094_v45  ;;  %v2523_v59 = vpop.f32.mrb[53].mxu1  ;;  %v2653_v42 = vadd.f32 1.0, %v2621_v1  ;;  %5860 = vtanh.f32 %v2711_v56 }
 0x442   : > { %v2682_v8 = vmul.f32 %v2650_v39, %v2508_v31  ;;  %v2524_v52 = vadd.f32 %v7094_v45, %v2523_v59  ;;  %v5410_v40 = vpop.f32.mrb[54].mxu1  ;;  %v2651_v50 = vadd.f32 1.0, %v2619_v63  ;;  %v7203_v31 = vmul.f32 0.5, %v2511_v22 }
 0x443   : > { %v2592_v16 = vmul.f32 %v2532_v18, %v2532_v18  ;;  %v2526_v3 = vpop.f32.mrb[55].mxu1  ;;  %v2716_v36 = vmul.f32 0.7978846, %v2684_v23  ;;  %v2535_v46 = vadd.f32 %v5410_v40, %v7094_v45  ;;  %v2685_v57 = vmul.f32 %v2653_v42, %v2519_v10 }
 0x444   : > { %v2590_v2 = vmul.f32 %v2524_v52, %v2524_v52  ;;  %v2714_v13 = vmul.f32 0.7978846, %v2682_v8  ;;  %v2527_v48 = vadd.f32 %v7094_v45, %v2526_v3  ;;  %v2683_v60 = vmul.f32 %v2651_v50, %v2511_v22 }
 0x445   : > { %v2624_v6 = vmul.f32 0.044715, %v2592_v16  ;;  %v2593_v4 = vmul.f32 %v2535_v46, %v2535_v46  ;;  %v7206_v17 = vmul.f32 0.5, %v2532_v18  ;;  %5862 = vtanh.f32 %v2716_v36 }
 0x446   : > { %v2622_v58 = vmul.f32 0.044715, %v2590_v2  ;;  %v2591_v54 = vmul.f32 %v2527_v48, %v2527_v48  ;;  %5864 = vtanh.f32 %v2714_v13  ;;  %v7209_v28 = vmul.f32 0.5, %v2524_v52 }
 0x447   : > { %v2656_v35 = vadd.f32 1.0, %v2624_v6  ;;  %v2625_v38 = vmul.f32 0.044715, %v2593_v4  ;;  %v2717_v22 = vmul.f32 0.7978846, %v2685_v57  ;;  %v7214_v59 = vmul.f32 0.5, %v2535_v46 }
 0x448   : > { %v2654_v11 = vadd.f32 1.0, %v2622_v58  ;;  %v5413_v9 = vpop.f32.mrb[56].mxu1  ;;  %v2623_v15 = vmul.f32 0.044715, %v2591_v54  ;;  %v2715_v1 = vmul.f32 0.7978846, %v2683_v60  ;;  %v7218_v63 = vpop.eup %5854 }
 0x449   : > { %v2688_v37 = vmul.f32 %v2656_v35, %v2532_v18  ;;  %v2548_v20 = vadd.f32 %v5413_v9, %v7094_v45  ;;  %v2539_v33 = vpop.f32.mrb[57].mxu1  ;;  %v2657_v0 = vadd.f32 1.0, %v2625_v38  ;;  %v7223_v16 = vpop.eup %5856  ;;  %v7225_v3 = vmul.f32 0.5, %v2527_v48 }
 0x44a   : > { %v7212_v10 = vadd.f32 %v7094_v45, %v2539_v33  ;;  %v5414_v39 = vpop.f32.mrb[58].mxu1  ;;  %v2686_v21 = vmul.f32 %v2654_v11, %v2524_v52  ;;  %v2655_v18 = vadd.f32 1.0, %v2623_v15  ;;  %v7230_v36 = vpop.eup %5858  ;;  %5866 = vtanh.f32 %v2717_v22 }
 0x44b   : > { %v2596_v49 = vmul.f32 %v2548_v20, %v2548_v20  ;;  %v2542_v23 = vpop.f32.mrb[59].mxu1  ;;  %v2720_v40 = vmul.f32 0.7978846, %v2688_v37  ;;  %v2689_v25 = vmul.f32 %v2657_v0, %v2535_v46  ;;  %v7221_v42 = vadd.f32 %v5414_v39, %v7094_v45  ;;  %v7236_v4 = vpop.eup %5860 }
 0x44c   : > { %v2594_v8 = vmul.f32 %v7212_v10, %v7212_v10  ;;  %v2687_v52 = vmul.f32 %v2655_v18, %v2527_v48  ;;  %v7228_v2 = vadd.f32 %v7094_v45, %v2542_v23  ;;  %v2718_v6 = vmul.f32 0.7978846, %v2686_v21 }
 0x44d   : > { %v2628_v56 = vmul.f32 0.044715, %v2596_v49  ;;  %v2597_v46 = vmul.f32 %v7221_v42, %v7221_v42  ;;  %5868 = vtanh.f32 %v2715_v1  ;;  %v2721_v58 = vmul.f32 0.7978846, %v2689_v25 }
 0x44e   : > { %v2626_v50 = vmul.f32 0.044715, %v2594_v8  ;;  %v2595_v35 = vmul.f32 %v7228_v2, %v7228_v2  ;;  %5870 = vtanh.f32 %v2720_v40  ;;  %v2719_v37 = vmul.f32 0.7978846, %v2687_v52 }
 0x44f   : > { %v2660_v13 = vadd.f32 1.0, %v2628_v56  ;;  %v2629_v11 = vmul.f32 0.044715, %v2597_v46  ;;  %v7245_v22 = vpop.eup %5862  ;;  %5872 = vtanh.f32 %v2718_v6  ;;  %v7251_v18 = vmul.f32 0.5, %v2548_v20 }
 0x450   : > { %v2658_v57 = vadd.f32 1.0, %v2626_v50  ;;  %v5417_v48 = vpop.f32.mrb[60].mxu1  ;;  %v2627_v33 = vmul.f32 0.044715, %v2595_v35  ;;  %v7249_v1 = vpop.eup %5864  ;;  %5874 = vtanh.f32 %v2721_v58  ;;  %v2833_v50 = vmul.f32 %v7178_v43, %v7155_v12 }
 0x451   : > { %v2692_v60 = vmul.f32 %v2660_v13, %v2548_v20  ;;  %v7239_v54 = vadd.f32 %v5417_v48, %v7094_v45  ;;  %v2555_v9 = vpop.f32.mrb[61].mxu1  ;;  %v2661_v0 = vadd.f32 1.0, %v2629_v11  ;;  %5876 = vtanh.f32 %v2719_v37 }
 0x452   : > { %v2690_v38 = vmul.f32 %v2658_v57, %v7212_v10  ;;  %v7243_v15 = vadd.f32 %v7094_v45, %v2555_v9  ;;  %v5418_v39 = vpop.f32.mrb[62].mxu1  ;;  %v2659_v8 = vadd.f32 1.0, %v2627_v33  ;;  %v2878_v58 = vpack.c.bf16 %v2833_v50, %v7183_v61 }
 0x453   : > { %v2724_v21 = vmul.f32 0.7978846, %v2692_v60  ;;  %v2600_v49 = vmul.f32 %v7239_v54, %v7239_v54  ;;  %v2558_v23 = vpop.f32.mrb[63].mxu1  ;;  %v2693_v56 = vmul.f32 %v2661_v0, %v7221_v42  ;;  %v7260_v46 = vadd.f32 %v5418_v39, %v7094_v45 }
 0x454   : > { %v2598_v40 = vmul.f32 %v7243_v15, %v7243_v15  ;;  %v2722_v25 = vmul.f32 0.7978846, %v2690_v38  ;;  %v2691_v6 = vmul.f32 %v2659_v8, %v7228_v2  ;;  %v7264_v57 = vadd.f32 %v7094_v45, %v2558_v23  ;;  %v5867_v11 = vpop.eup %5866  ;;  %3045 = vmatmul.mubr.bf16.gmra.mrb[76].mxu0 %v2878_v58 }
 0x455   : > { %v2632_v52 = vmul.f32 0.044715, %v2600_v49  ;;  %5878 = vtanh.f32 %v2724_v21  ;;  %v2725_v35 = vmul.f32 0.7978846, %v2693_v56  ;;  %v2601_v12 = vmul.f32 %v7260_v46, %v7260_v46  ;;  %3054 = vmatprep.mubr.bf16.mxu0 %v8218_v55 }
 0x456   : > { %v2630_v13 = vmul.f32 0.044715, %v2598_v40  ;;  %v2723_v48 = vmul.f32 0.7978846, %v2691_v6  ;;  %v7269_v9 = vmul.f32 0.5, %v7212_v10  ;;  %5880 = vtanh.f32 %v2722_v25 }
 0x457   : > { %v2664_v20 = vadd.f32 1.0, %v2632_v52  ;;  %v2599_v61 = vmul.f32 %v7264_v57, %v7264_v57  ;;  %v5869_v38 = vpop.eup %5868  ;;  %v2633_v39 = vmul.f32 0.044715, %v2601_v12  ;;  %v2802_v21 = vadd.f32 1.0, %v7191_v51 }
 0x458   : > { %v2662_v60 = vadd.f32 1.0, %v2630_v13  ;;  %v5150_v43 = vpop.f32.mrb[64].mxu1  ;;  %5882 = vtanh.f32 %v2723_v48  ;;  %v5871_v10 = vpop.eup %5870  ;;  %v2803_v8 = vadd.f32 1.0, %v7197_v30  ;;  %v2804_v50 = vadd.f32 1.0, %v7185_v19 }
 0x459   : > { %v2696_v37 = vmul.f32 %v2664_v20, %v7239_v54  ;;  %v5151_v45 = vpop.f32.mrb[65].mxu1  ;;  %v2631_v23 = vmul.f32 0.044715, %v2599_v61  ;;  %5884 = vtanh.f32 %v2725_v35  ;;  %v2665_v52 = vadd.f32 1.0, %v2633_v39  ;;  %v5873_v6 = vpop.eup %5872 }
 0x45a   : > { %v2694_v33 = vmul.f32 %v2662_v60, %v7243_v15  ;;  %v5153_v0 = vpop.f32.mrb[66].mxu1  ;;  %v7278_v40 = vadd.f32 %v5151_v45, %v5150_v43  ;;  %v2834_v20 = vmul.f32 %v2802_v21, %v7160_v62  ;;  %v2835_v51 = vmul.f32 %v2803_v8, %v7164_v7  ;;  %v5875_v58 = vpop.eup %5874 }
 0x45b   : > { %v2728_v49 = vmul.f32 0.7978846, %v2696_v37  ;;  %v5154_v25 = vpop.f32.mrb[67].mxu1  ;;  %v2663_v13 = vadd.f32 1.0, %v2631_v23  ;;  %v2697_v48 = vmul.f32 %v2665_v52, %v7260_v46  ;;  %v2805_v30 = vadd.f32 1.0, %v7195_v32  ;;  %v5877_v37 = vpop.eup %5876 }
 0x45c   : > { %v2726_v56 = vmul.f32 0.7978846, %v2694_v33  ;;  %v2836_v60 = vmul.f32 %v2804_v50, %v7158_v24  ;;  %v2879_v12 = vpack.c.bf16 %v2835_v51, %v2834_v20  ;;  %v2806_v19 = vadd.f32 1.0, %v7223_v16 }
 0x45d   : > { %5886 = vtanh.f32 %v2728_v49  ;;  %v2695_v35 = vmul.f32 %v2663_v13, %v7264_v57  ;;  %v2807_v43 = vadd.f32 1.0, %v7236_v4  ;;  %v2729_v61 = vmul.f32 0.7978846, %v2697_v48 }
 0x45e   : > { %5888 = vtanh.f32 %v2726_v56  ;;  %v2837_v62 = vmul.f32 %v2805_v30, %v7162_v26  ;;  %v2808_v7 = vadd.f32 1.0, %v7218_v63  ;;  %v2809_v45 = vadd.f32 1.0, %v7230_v36  ;;  %3055 = vmatmul.mubr.bf16.gmra.mrb[80].mxu0 %v2879_v12 }
 0x45f   : > { %v5879_v33 = vpop.eup %5878  ;;  %v2727_v39 = vmul.f32 0.7978846, %v2695_v35  ;;  %v7293_v24 = vmul.f32 %v2806_v19, %v7170_v5  ;;  %v2839_v32 = vmul.f32 %v2807_v43, %v7176_v47  ;;  %v2810_v16 = vadd.f32 1.0, %v7249_v1  ;;  %3064 = vmatprep.mubr.bf16.mxu0 %v8218_v55 }
 0x460   : > { %5890 = vtanh.f32 %v2729_v61  ;;  %v2880_v4 = vpack.c.bf16 %v2837_v62, %v2836_v60  ;;  %v7299_v26 = vmul.f32 %v2808_v7, %v7168_v34  ;;  %v2841_v63 = vmul.f32 %v2809_v45, %v7174_v14  ;;  %v5881_v36 = vpop.eup %5880 }
 0x461   : > { %5892 = vtanh.f32 %v2727_v39  ;;  %v2881_v21 = vpack.c.bf16 %v2839_v32, %v7293_v24  ;;  %v2811_v0 = vadd.f32 1.0, %v5869_v38  ;;  %v7304_v5 = vmul.f32 %v2810_v16, %v7189_v44 }
 0x462   : > { %v5883_v47 = vpop.eup %5882  ;;  %v2882_v1 = vpack.c.bf16 %v2841_v63, %v7299_v26  ;;  %v2812_v49 = vadd.f32 1.0, %v7245_v22  ;;  %v2813_v23 = vadd.f32 1.0, %v5867_v11  ;;  %v2814_v8 = vadd.f32 1.0, %v5873_v6 }
 0x463   : > { %v2843_v34 = vmul.f32 %v2811_v0, %v7203_v31  ;;  %v2815_v25 = vadd.f32 1.0, %v5877_v37  ;;  %v2816_v56 = vadd.f32 1.0, %v5871_v10  ;;  %v2817_v14 = vadd.f32 1.0, %v5875_v58  ;;  %v5885_v52 = vpop.eup %5884 }
 0x464   : > { %v2844_v50 = vmul.f32 %v2812_v49, %v7187_v29  ;;  %v2845_v38 = vmul.f32 %v2813_v23, %v7199_v53  ;;  %v2846_v44 = vmul.f32 %v2814_v8, %v7209_v28  ;;  %v2818_v13 = vadd.f32 1.0, %v5881_v36 }
 0x465   : > { %v2883_v51 = vpack.c.bf16 %v2843_v34, %v7304_v5  ;;  %v2847_v22 = vmul.f32 %v2815_v25, %v7225_v3  ;;  %v7315_v11 = vmul.f32 %v2816_v56, %v7206_v17  ;;  %v7318_v31 = vmul.f32 %v2817_v14, %v7214_v59  ;;  %v2874_v14 = vld [vmem:[%s8200_s12] sm:$0x3] }
 0x466   : > { %v2755_v6 = vmul.f32 0.5, %v7228_v2  ;;  %v2884_v29 = vpack.c.bf16 %v2845_v38, %v2844_v50  ;;  %v2819_v58 = vadd.f32 1.0, %v5883_v47  ;;  %v2820_v53 = vadd.f32 1.0, %v5879_v33  ;;  %3065 = vmatmul.mubr.bf16.gmra.mrb[84].mxu0 %v2880_v4 }
 0x467   : > { %v5887_v20 = vpop.eup %5886  ;;  %v2757_v28 = vmul.f32 0.5, %v7221_v42  ;;  %v2885_v48 = vpack.c.bf16 %v2847_v22, %v2846_v44  ;;  %v2886_v30 = vpack.c.bf16 %v7318_v31, %v7315_v11  ;;  %v2821_v3 = vadd.f32 1.0, %v5885_v52  ;;  %3074 = vmatprep.mubr.bf16.mxu0 %v8218_v55 }
 0x468   : > { %v5889_v10 = vpop.eup %5888  ;;  %v2850_v17 = vmul.f32 %v2818_v13, %v7269_v9  ;;  %v2851_v59 = vmul.f32 %v2819_v58, %v2755_v6  ;;  %v2852_v60 = vmul.f32 %v2820_v53, %v7251_v18  ;;  %v2824_v2 = vadd.f32 1.0, %v5887_v20 }
 0x469   : > { %v2853_v35 = vmul.f32 %v2821_v3, %v2757_v28  ;;  %v2822_v43 = vadd.f32 1.0, %v5889_v10  ;;  %v2760_v42 = vmul.f32 0.5, %v7239_v54  ;;  %v2761_v61 = vmul.f32 0.5, %v7260_v46  ;;  %v4959_v54 = vld [vmem:[%s8202_s14] ss:$0 sm:$0xff] }
 0x46a   : > { %v5891_v12 = vpop.eup %5890  ;;  %v2887_v19 = vpack.c.bf16 %v2851_v59, %v2850_v17  ;;  %v2758_v45 = vmul.f32 0.5, %v7243_v15  ;;  %v2759_v33 = vmul.f32 0.5, %v7264_v57  ;;  %v4108_v15 = vadd.f32 %v7278_v40, %v4959_v54 }
 0x46b   : > { %v5893_v37 = vpop.eup %5892  ;;  %v2888_v62 = vpack.c.bf16 %v2853_v35, %v2852_v60  ;;  %v2825_v7 = vadd.f32 1.0, %v5891_v12  ;;  %v2856_v39 = vmul.f32 %v2824_v2, %v2760_v42  ;;  %v8217_v56 = vsub.s32 0, %v6987_v41  ;;  %v5599_v60 = vld [vmem:[%s8207_s19 + $0x8] sm:$0xff]  }
 0x46c   : > { %v2823_v9 = vadd.f32 1.0, %v5893_v37  ;;  %v2854_v18 = vmul.f32 %v2822_v43, %v2758_v45  ;;  %v8216_v52 = vsub.s32 1, %v6987_v41 }
 0x46d   : > { %v2857_v24 = vmul.f32 %v2825_v7, %v2761_v61  ;;  %v7355_v50 = vrot.slane %v2874_v14, %v8217_v56 }
 0x46e   : > { %v2855_v32 = vmul.f32 %v2823_v9, %v2759_v33  ;;  %3075 = vmatmul.mubr.bf16.gmra.mrb[88].mxu0 %v2881_v21  ;;  %v7359_v38 = vrot.slane %v2874_v14, %v8216_v52  ;;  %v5600_v9 = vld [vmem:[%s8207_s19 + $0x10] sm:$0xff]  }
 0x46f   : > { %v2890_v16 = vpack.c.bf16 %v2857_v24, %v2856_v39  ;;  %3084 = vmatprep.mubr.bf16.mxu0 %v8218_v55 }
 0x470   : > { %v2889_v4 = vpack.c.bf16 %v2855_v32, %v2854_v18 }
 0x476   : > { %3085 = vmatmul.mubr.bf16.gmra.mrb[92].mxu0 %v2882_v1 }
 0x477   : > { %3094 = vmatprep.mubr.bf16.mxu0 %v8218_v55 }
 0x478   : > { %v5172_v46 = vpop.f32.mrb[68].mxu1 }
 0x479   : > { %v5173_v26 = vpop.f32.mrb[69].mxu1 }
 0x47a   : > { %v5174_v57 = vadd.f32 %v5173_v26, %v5172_v46  ;;  %v5175_v63 = vpop.f32.mrb[70].mxu1 }
 0x47b   : > { %v5176_v36 = vpop.f32.mrb[71].mxu1 }
 0x47c   : > { %v4148_v0 = vadd.f32 %v5174_v57, %v4108_v15  ;;  %v5601_v57 = vld [vmem:[%s8207_s19 + $0x18] sm:$0xff]  }
 0x47e   : > { %v4153_v21 = vmul.f32 %v4148_v0, %v4148_v0  ;;  %3095 = vmatmul.mubr.bf16.gmra.mrb[96].mxu0 %v2883_v51  ;;  %v4158_v1 = vmul.f32 0.5, %v4148_v0 }
 0x47f   : > { %3104 = vmatprep.mubr.bf16.mxu0 %v8218_v55 }
 0x480   : > { %v4154_v5 = vmul.f32 0.044715, %v4153_v21 }
 0x482   : > { %v4155_v47 = vadd.f32 1.0, %v4154_v5 }
 0x484   : > { %v4156_v49 = vmul.f32 %v4155_v47, %v4148_v0 }
 0x486   : > { %v4157_v23 = vmul.f32 0.7978846, %v4156_v49  ;;  %3105 = vmatmul.mubr.bf16.gmra.mrb[100].mxu0 %v2884_v29  ;;  %v5598_v29 = vld [vmem:[%s8207_s19] sm:$0xff]  }
 0x487   : > { %3114 = vmatprep.mubr.bf16.mxu0 %v8218_v55  ;;  %5460 = vmatpush3.bf16.msra.mxu0 %v5598_v29 }
 0x488   : > { %5894 = vtanh.f32 %v4157_v23  ;;  %5461 = vmatprep.subr.bf16.mxu0 %v6072_v27 }
 0x48b   : > { %5462 = vmatpush3.bf16.msra.mxu0 %v5599_v60 }
 0x48c   : > { %5463 = vmatprep.subr.bf16.mxu0 %v6072_v27 }
 0x48e   : > { %3115 = vmatmul.mubr.bf16.gmra.mrb[104].mxu0 %v2885_v48 }
 0x48f   : > { %3124 = vmatprep.mubr.bf16.mxu0 %v8218_v55  ;;  %5464 = vmatpush3.bf16.msra.mxu0 %v5600_v9 }
 0x490   : > { %5465 = vmatprep.subr.bf16.mxu0 %v6072_v27 }
 0x492   : > { %v5895_v40 = vpop.eup %5894 }
 0x493   : > { %v4160_v8 = vadd.f32 1.0, %v5895_v40  ;;  %5466 = vmatpush3.bf16.msra.mxu0 %v5601_v57  ;;  %v5602_v40 = vld [vmem:[%s8207_s19 + $0x20] sm:$0xff]  }
 0x494   : > { %5467 = vmatprep.subr.bf16.mxu0 %v6072_v27 }
 0x495   : > { %v4161_v34 = vmul.f32 %v4160_v8, %v4158_v1 }
 0x496   : > { %3125 = vmatmul.mubr.bf16.gmra.mrb[108].mxu0 %v2886_v30 }
 0x497   : > { %v4179_v25 = vpack.c.bf16 %v4161_v34, %v4161_v34  ;;  %3134 = vmatprep.mubr.bf16.mxu0 %v8218_v55  ;;  %5468 = vmatpush3.bf16.msra.mxu0 %v5602_v40 }
 0x498   : > { %5469 = vmatprep.subr.bf16.mxu0 %v6072_v27 }
 0x499   : > { %5436 = vmatmul.mubr.bf16.vlgmr.msra.gmra.mrb[72].mxu1 %v4179_v25 }
 0x49a   : > { %5455 = vmatprep.mubr.msk.bf16.mxu1 %vm6073_vm3, %v6072_v27 }
 0x49e   : > { %3135 = vmatmul.mubr.bf16.gmra.mrb[112].mxu0 %v2887_v19 }
 0x49f   : > { %3144 = vmatprep.mubr.bf16.mxu0 %v8218_v55 }
 0x4a6   : > { %3145 = vmatmul.mubr.bf16.gmra.mrb[116].mxu0 %v2888_v62 }
 0x4a7   : > { %3154 = vmatprep.mubr.bf16.mxu0 %v8218_v55 }
 0x4ae   : > { %3155 = vmatmul.mubr.bf16.gmra.mrb[120].mxu0 %v2889_v4 }
 0x4af   : > { %3164 = vmatprep.mubr.bf16.mxu0 %v8218_v55 }
 0x4b6   : > { %3165 = vmatmul.mubr.bf16.gmra.mrb[124].mxu0 %v2890_v16 }
 0x4b7   : > { %5475 = vmatprep.mubr.msk.bf16.mxu0 %vm6073_vm3, %v6072_v27 }
 0x4e8   : > { %v3016_v44 = vpop.f32.mrb[64].mxu0 }
 0x4e9   : > { %v7362_v13 = vadd.f32 %v3016_v44, %v7355_v50  ;;  %v3018_v20 = vpop.f32.mrb[65].mxu0 }
 0x4ea   : > { %v7365_v51 = vadd.f32 %v3018_v20, %v7359_v38  ;;  %v3020_v22 = vpop.f32.mrb[66].mxu0 }
 0x4eb   : > { %v3175_v11 = vmul.f32 %v7362_v13, %v7362_v13  ;;  %v7370_v31 = vadd.f32 %v3020_v22, %v7355_v50  ;;  %v3022_v10 = vpop.f32.mrb[67].mxu0  ;;  %v5603_v22 = vld [vmem:[%s8207_s19 + $0x28] sm:$0xff]   ;;  %v3495_v29 = vmul.f32 0.5, %v7362_v13 }
 0x4ec   : > { %v7373_v6 = vadd.f32 %v3022_v10, %v7359_v38  ;;  %v3176_v28 = vmul.f32 %v7365_v51, %v7365_v51  ;;  %5470 = vmatpush3.bf16.msra.mxu0 %v5603_v22 }
 0x4ed   : > { %v3239_v58 = vmul.f32 0.044715, %v3175_v11  ;;  %v3177_v53 = vmul.f32 %v7370_v31, %v7370_v31  ;;  %5471 = vmatprep.subr.bf16.mxu0 %v6072_v27 }
 0x4ee   : > { %v3178_v48 = vmul.f32 %v7373_v6, %v7373_v6  ;;  %v3240_v43 = vmul.f32 0.044715, %v3176_v28 }
 0x4ef   : > { %v3303_v30 = vadd.f32 1.0, %v3239_v58  ;;  %v3241_v3 = vmul.f32 0.044715, %v3177_v53  ;;  %v3497_v58 = vmul.f32 0.5, %v7370_v31 }
 0x4f0   : > { %v3242_v17 = vmul.f32 0.044715, %v3178_v48  ;;  %v3026_v59 = vpop.f32.mrb[68].mxu0  ;;  %v3304_v32 = vadd.f32 1.0, %v3240_v43 }
 0x4f1   : > { %v3367_v35 = vmul.f32 %v3303_v30, %v7362_v13  ;;  %v3305_v2 = vadd.f32 1.0, %v3241_v3  ;;  %v7390_v12 = vadd.f32 %v3026_v59, %v7355_v50  ;;  %v3028_v19 = vpop.f32.mrb[69].mxu0  ;;  %v5604_v3 = vld [vmem:[%s8207_s19 + $0x30] sm:$0xff]   ;;  %v5605_v13 = vld [vmem:[%s8205_s17] sm:$0xff]  }
 0x4f2   : > { %v3030_v37 = vpop.f32.mrb[70].mxu0  ;;  %v7396_v7 = vadd.f32 %v3028_v19, %v7359_v38  ;;  %v3306_v33 = vadd.f32 1.0, %v3242_v17  ;;  %v3368_v21 = vmul.f32 %v3304_v32, %v7365_v51  ;;  %5472 = vmatpush3.bf16.msra.mxu0 %v5604_v3  ;;  %5440 = vmatpush3.bf16.msra.mxu1 %v5605_v13  ;;  %v3498_v32 = vmul.f32 0.5, %v7373_v6 }
 0x4f3   : > { %v3431_v42 = vmul.f32 0.7978846, %v3367_v35  ;;  %v3369_v61 = vmul.f32 %v3305_v2, %v7370_v31  ;;  %v3179_v62 = vmul.f32 %v7390_v12, %v7390_v12  ;;  %v3032_v45 = vpop.f32.mrb[71].mxu0  ;;  %v7403_v18 = vadd.f32 %v3030_v37, %v7355_v50  ;;  %5473 = vmatprep.subr.bf16.mxu0 %v6072_v27  ;;  %v5606_v35 = vld [vmem:[%s8207_s19 + $0x38] sm:$0xff]   ;;  %5441 = vmatprep.subr.bf16.mxu1 %v6072_v27 }
 0x4f4   : > { %v7406_v16 = vadd.f32 %v3032_v45, %v7359_v38  ;;  %v3180_v54 = vmul.f32 %v7396_v7, %v7396_v7  ;;  %v3370_v26 = vmul.f32 %v3306_v33, %v7373_v6  ;;  %v3432_v25 = vmul.f32 0.7978846, %v3368_v21  ;;  %v5607_v45 = vld [vmem:[%s8205_s17 + $0x8] sm:$0xff]  }
 0x4f5   : > { %5896 = vtanh.f32 %v3431_v42  ;;  %v3433_v39 = vmul.f32 0.7978846, %v3369_v61  ;;  %v3243_v24 = vmul.f32 0.044715, %v3179_v62  ;;  %v3181_v46 = vmul.f32 %v7403_v18, %v7403_v18 }
 0x4f6   : > { %v3182_v15 = vmul.f32 %v7406_v16, %v7406_v16  ;;  %v3244_v47 = vmul.f32 0.044715, %v3180_v54  ;;  %v3434_v23 = vmul.f32 0.7978846, %v3370_v26  ;;  %5474 = vmatpush3.bf16.msra.mxu0 %v5606_v35  ;;  %v3499_v37 = vmul.f32 0.5, %v7390_v12  ;;  %5442 = vmatpush3.bf16.msra.mxu1 %v5607_v45 }
 0x4f7   : > { %5898 = vtanh.f32 %v3433_v39  ;;  %v3307_v4 = vadd.f32 1.0, %v3243_v24  ;;  %v3245_v36 = vmul.f32 0.044715, %v3181_v46  ;;  %v3501_v42 = vmul.f32 0.5, %v7403_v18  ;;  %5443 = vmatprep.subr.bf16.mxu1 %v6072_v27  ;;  %v5616_v45 = vld [vmem:[%s8209_s21 + $0x4] ss:$8 sps:$4 sm:$0xff]  }
 0x4f8   : > { %v3246_v0 = vmul.f32 0.044715, %v3182_v15  ;;  %v3308_v14 = vadd.f32 1.0, %v3244_v47  ;;  %v5609_v15 = vld [vmem:[%s8205_s17 + $0x18] sm:$0xff]   ;;  %v3500_v21 = vmul.f32 0.5, %v7396_v7 }
 0x4f9   : > { %v3371_v63 = vmul.f32 %v3307_v4, %v7390_v12  ;;  %v3309_v49 = vadd.f32 1.0, %v3245_v36  ;;  %v3496_v4 = vmul.f32 0.5, %v7365_v51  ;;  %v3502_v51 = vmul.f32 0.5, %v7406_v16 }
 0x4fa   : > { %v3310_v8 = vadd.f32 1.0, %v3246_v0  ;;  %v3372_v28 = vmul.f32 %v3308_v14, %v7396_v7  ;;  %v5610_v0 = vld [vmem:[%s8205_s17 + $0x20] sm:$0xff]   ;;  %v5611_v7 = vld [vmem:[%s8205_s17 + $0x28] sm:$0xff]  }
 0x4fb   : > { %v3435_v5 = vmul.f32 0.7978846, %v3371_v63  ;;  %v3373_v1 = vmul.f32 %v3309_v49, %v7403_v18  ;;  %v5608_v18 = vld [vmem:[%s8205_s17 + $0x10] sm:$0xff]  }
 0x4fc   : > { %v3374_v10 = vmul.f32 %v3310_v8, %v7406_v16  ;;  %v3436_v60 = vmul.f32 0.7978846, %v3372_v28  ;;  %5444 = vmatpush3.bf16.msra.mxu1 %v5608_v18  ;;  %v5612_v28 = vld [vmem:[%s8205_s17 + $0x30] sm:$0xff]  }
 0x4fd   : > { %5900 = vtanh.f32 %v3435_v5  ;;  %v3437_v44 = vmul.f32 0.7978846, %v3373_v1  ;;  %5445 = vmatprep.subr.bf16.mxu1 %v6072_v27 }
 0x4fe   : > { %5902 = vtanh.f32 %v3434_v23  ;;  %v3438_v17 = vmul.f32 0.7978846, %v3374_v10 }
 0x4ff   : > { %v5897_v34 = vpop.eup %5896  ;;  %5904 = vtanh.f32 %v3437_v44 }
 0x500   : > { %v3623_v20 = vadd.f32 1.0, %v5897_v34  ;;  %5906 = vtanh.f32 %v3432_v25  ;;  %5446 = vmatpush3.bf16.msra.mxu1 %v5609_v15 }
 0x501   : > { %v5899_v11 = vpop.eup %5898  ;;  %5908 = vtanh.f32 %v3438_v17  ;;  %5447 = vmatprep.subr.bf16.mxu1 %v6072_v27 }
 0x502   : > { %v3625_v53 = vadd.f32 1.0, %v5899_v11  ;;  %v7435_v48 = vmul.f32 %v3623_v20, %v3495_v29  ;;  %5910 = vtanh.f32 %v3436_v60 }
 0x504   : > { %8264 = vst [vmem:[#allocation7_spill] sm:$0xff] %v7435_v48  ;;  %v7437_v30 = vmul.f32 %v3625_v53, %v3497_v58  ;;  %5448 = vmatpush3.bf16.msra.mxu1 %v5610_v0 }
 0x505   : > { %5449 = vmatprep.subr.bf16.mxu1 %v6072_v27 }
 0x506   : > { %8265 = vst [vmem:[#allocation8_spill] sm:$0xff] %v7437_v30 }
 0x507   : > { %v5901_v59 = vpop.eup %5900 }
 0x508   : > { %v5903_v2 = vpop.eup %5902  ;;  %v3627_v19 = vadd.f32 1.0, %v5901_v59  ;;  %5450 = vmatpush3.bf16.msra.mxu1 %v5611_v7 }
 0x509   : > { %v5905_v43 = vpop.eup %5904  ;;  %v3626_v33 = vadd.f32 1.0, %v5903_v2  ;;  %5451 = vmatprep.subr.bf16.mxu1 %v6072_v27 }
 0x50a   : > { %v3629_v61 = vadd.f32 1.0, %v5905_v43  ;;  %v5907_v62 = vpop.eup %5906  ;;  %v7457_v9 = vmul.f32 %v3627_v19, %v3499_v37  ;;  %v5613_v43 = vld [vmem:[%s8205_s17 + $0x38] sm:$0xff]  }
 0x50b   : > { %v3624_v24 = vadd.f32 1.0, %v5907_v62  ;;  %v7469_v54 = vmul.f32 %v3626_v33, %v3498_v32  ;;  %v5909_v46 = vpop.eup %5908 }
 0x50c   : > { %8266 = vst [vmem:[#allocation9_spill] sm:$0xff] %v7457_v9  ;;  %v7459_v39 = vmul.f32 %v3629_v61, %v3501_v42  ;;  %v5911_v6 = vpop.eup %5910  ;;  %v3630_v57 = vadd.f32 1.0, %v5909_v46  ;;  %5452 = vmatpush3.bf16.msra.mxu1 %v5612_v28 }
 0x50d   : > { %8268 = vst [vmem:[#allocation11_spill] sm:$0xff] %v7469_v54  ;;  %v7471_v26 = vmul.f32 %v3624_v24, %v3496_v4  ;;  %v3628_v36 = vadd.f32 1.0, %v5911_v6  ;;  %5453 = vmatprep.subr.bf16.mxu1 %v6072_v27 }
 0x50e   : > { %8267 = vst [vmem:[#allocation10_spill] sm:$0xff] %v7459_v39  ;;  %v7485_v5 = vmul.f32 %v3630_v57, %v3502_v51 }
 0x50f   : > { %8269 = vst [vmem:[#allocation12_spill] sm:$0xff] %v7471_v26  ;;  %v3036_v47 = vpop.f32.mrb[72].mxu0  ;;  %v7488_v40 = vmul.f32 %v3628_v36, %v3500_v21 }
 0x510   : > { %8270 = vst [vmem:[#allocation13_spill] sm:$0xff] %v7485_v5  ;;  %v3037_v49 = vadd.f32 %v3036_v47, %v7355_v50  ;;  %v3038_v23 = vpop.f32.mrb[73].mxu0  ;;  %5454 = vmatpush3.bf16.msra.mxu1 %v5613_v43 }
 0x511   : > { %8271 = vst [vmem:[#allocation14_spill] sm:$0xff] %v7488_v40  ;;  %v3039_v1 = vadd.f32 %v3038_v23, %v7359_v38  ;;  %v3040_v16 = vpop.f32.mrb[74].mxu0  ;;  %4634 = vmatprep.subr.bf16.mxu1 %v5616_v45 }
 0x512   : > { %v3183_v8 = vmul.f32 %v3037_v49, %v3037_v49  ;;  %v3041_v34 = vadd.f32 %v3040_v16, %v7355_v50  ;;  %v3042_v25 = vpop.f32.mrb[75].mxu0  ;;  %v3503_v18 = vmul.f32 0.5, %v3037_v49 }
 0x513   : > { %v3184_v14 = vmul.f32 %v3039_v1, %v3039_v1  ;;  %v3043_v44 = vadd.f32 %v3042_v25, %v7359_v38  ;;  %v3504_v15 = vmul.f32 0.5, %v3039_v1 }
 0x514   : > { %v3247_v22 = vmul.f32 0.044715, %v3183_v8  ;;  %v3185_v11 = vmul.f32 %v3041_v34, %v3041_v34  ;;  %v3505_v57 = vmul.f32 0.5, %v3041_v34 }
 0x515   : > { %v3248_v10 = vmul.f32 0.044715, %v3184_v14  ;;  %v3186_v29 = vmul.f32 %v3043_v44, %v3043_v44  ;;  %v3506_v14 = vmul.f32 0.5, %v3043_v44 }
 0x516   : > { %v3311_v58 = vadd.f32 1.0, %v3247_v22  ;;  %v3249_v53 = vmul.f32 0.044715, %v3185_v11 }
 0x517   : > { %v3312_v3 = vadd.f32 1.0, %v3248_v10  ;;  %v3250_v17 = vmul.f32 0.044715, %v3186_v29 }
 0x518   : > { %v3375_v13 = vmul.f32 %v3311_v58, %v3037_v49  ;;  %v3313_v59 = vadd.f32 1.0, %v3249_v53 }
 0x519   : > { %v3376_v60 = vmul.f32 %v3312_v3, %v3039_v1  ;;  %v3314_v35 = vadd.f32 1.0, %v3250_v17 }
 0x51a   : > { %v3439_v2 = vmul.f32 0.7978846, %v3375_v13  ;;  %v3377_v19 = vmul.f32 %v3313_v59, %v3041_v34 }
 0x51b   : > { %v3440_v37 = vmul.f32 0.7978846, %v3376_v60  ;;  %v3378_v42 = vmul.f32 %v3314_v35, %v3043_v44 }
 0x51c   : > { %5912 = vtanh.f32 %v3439_v2  ;;  %v3441_v61 = vmul.f32 0.7978846, %v3377_v19 }
 0x51d   : > { %5914 = vtanh.f32 %v3440_v37  ;;  %v3442_v62 = vmul.f32 0.7978846, %v3378_v42 }
 0x51e   : > { %5916 = vtanh.f32 %v3441_v61 }
 0x51f   : > { %5918 = vtanh.f32 %v3442_v62 }
 0x526   : > { %v5913_v32 = vpop.eup %5912 }
 0x527   : > { %v3046_v27 = vpop.f32.mrb[76].mxu0  ;;  %v5915_v6 = vpop.eup %5914  ;;  %v3631_v47 = vadd.f32 1.0, %v5913_v32 }
 0x528   : > { %v3047_v33 = vadd.f32 %v3046_v27, %v7355_v50  ;;  %v3048_v24 = vpop.f32.mrb[77].mxu0  ;;  %v5917_v21 = vpop.eup %5916  ;;  %v3632_v23 = vadd.f32 1.0, %v5915_v6 }
 0x529   : > { %v3049_v4 = vadd.f32 %v3048_v24, %v7359_v38  ;;  %v3050_v46 = vpop.f32.mrb[78].mxu0  ;;  %v5919_v25 = vpop.eup %5918  ;;  %v3633_v7 = vadd.f32 1.0, %v5917_v21  ;;  %v7520_v3 = vmul.f32 %v3631_v47, %v3503_v18 }
 0x52a   : > { %v3187_v36 = vmul.f32 %v3047_v33, %v3047_v33  ;;  %v3051_v51 = vadd.f32 %v3050_v46, %v7355_v50  ;;  %v3052_v0 = vpop.f32.mrb[79].mxu0  ;;  %v3634_v11 = vadd.f32 1.0, %v5919_v25  ;;  %v7514_v10 = vmul.f32 0.5, %v3047_v33 }
 0x52b   : > { %v3188_v16 = vmul.f32 %v3049_v4, %v3049_v4  ;;  %v3053_v8 = vadd.f32 %v3052_v0, %v7359_v38  ;;  %v7516_v34 = vmul.f32 0.5, %v3049_v4  ;;  %v7518_v29 = vmul.f32 %v3633_v7, %v3505_v57  ;;  %8273 = vst [vmem:[#allocation16_spill] sm:$0xff] %v7520_v3 }
 0x52c   : > { %v3251_v49 = vmul.f32 0.044715, %v3187_v36  ;;  %v3189_v22 = vmul.f32 %v3051_v51, %v3051_v51  ;;  %v7522_v17 = vmul.f32 %v3632_v23, %v3504_v15  ;;  %v7524_v13 = vmul.f32 %v3634_v11, %v3506_v14 }
 0x52d   : > { %v3252_v1 = vmul.f32 0.044715, %v3188_v16  ;;  %8272 = vst [vmem:[#allocation15_spill] sm:$0xff] %v7518_v29  ;;  %v3190_v28 = vmul.f32 %v3053_v8, %v3053_v8  ;;  %v7532_v6 = vmul.f32 0.5, %v3051_v51  ;;  %v7534_v15 = vmul.f32 0.5, %v3053_v8 }
 0x52e   : > { %v3315_v58 = vadd.f32 1.0, %v3251_v49  ;;  %v3253_v53 = vmul.f32 0.044715, %v3189_v22  ;;  %8274 = vst [vmem:[#allocation17_spill] sm:$0xff] %v7522_v17  ;;  %8275 = vst [vmem:[#allocation18_spill] sm:$0xff] %v7524_v13 }
 0x52f   : > { %v3316_v44 = vadd.f32 1.0, %v3252_v1  ;;  %v3254_v2 = vmul.f32 0.044715, %v3190_v28 }
 0x530   : > { %v3379_v60 = vmul.f32 %v3315_v58, %v3047_v33  ;;  %v3317_v35 = vadd.f32 1.0, %v3253_v53 }
 0x531   : > { %v3056_v59 = vpop.f32.mrb[80].mxu0  ;;  %v3380_v37 = vmul.f32 %v3316_v44, %v3049_v4  ;;  %v3318_v32 = vadd.f32 1.0, %v3254_v2 }
 0x532   : > { %v3057_v19 = vadd.f32 %v3056_v59, %v7355_v50  ;;  %v3058_v43 = vpop.f32.mrb[81].mxu0  ;;  %v3443_v27 = vmul.f32 0.7978846, %v3379_v60  ;;  %v3381_v24 = vmul.f32 %v3317_v35, %v3051_v51 }
 0x533   : > { %v3059_v42 = vadd.f32 %v3058_v43, %v7359_v38  ;;  %v3060_v61 = vpop.f32.mrb[82].mxu0  ;;  %v3444_v46 = vmul.f32 0.7978846, %v3380_v37  ;;  %v3382_v36 = vmul.f32 %v3318_v32, %v3053_v8 }
 0x534   : > { %v3191_v18 = vmul.f32 %v3057_v19, %v3057_v19  ;;  %v3062_v33 = vpop.f32.mrb[83].mxu0  ;;  %5920 = vtanh.f32 %v3443_v27  ;;  %v3445_v57 = vmul.f32 0.7978846, %v3381_v24  ;;  %v3061_v47 = vadd.f32 %v3060_v61, %v7355_v50 }
 0x535   : > { %v3192_v4 = vmul.f32 %v3059_v42, %v3059_v42  ;;  %5922 = vtanh.f32 %v3444_v46  ;;  %v3063_v23 = vadd.f32 %v3062_v33, %v7359_v38  ;;  %v3446_v16 = vmul.f32 0.7978846, %v3382_v36 }
 0x536   : > { %v3255_v0 = vmul.f32 0.044715, %v3191_v18  ;;  %5924 = vtanh.f32 %v3445_v57  ;;  %v7538_v7 = vmul.f32 0.5, %v3057_v19  ;;  %v7540_v14 = vmul.f32 0.5, %v3059_v42 }
 0x537   : > { %v3256_v21 = vmul.f32 0.044715, %v3192_v4  ;;  %v3193_v49 = vmul.f32 %v3061_v47, %v3061_v47  ;;  %v3194_v22 = vmul.f32 %v3063_v23, %v3063_v23  ;;  %5926 = vtanh.f32 %v3446_v16 }
 0x538   : > { %v3319_v25 = vadd.f32 1.0, %v3255_v0  ;;  %v7542_v1 = vmul.f32 0.5, %v3061_v47  ;;  %v7546_v43 = vmul.f32 0.5, %v3063_v23 }
 0x539   : > { %v3320_v51 = vadd.f32 1.0, %v3256_v21  ;;  %v3066_v11 = vpop.f32.mrb[84].mxu0  ;;  %v3257_v44 = vmul.f32 0.044715, %v3193_v49  ;;  %v3258_v59 = vmul.f32 0.044715, %v3194_v22 }
 0x53a   : > { %v3383_v8 = vmul.f32 %v3319_v25, %v3057_v19  ;;  %v3067_v58 = vadd.f32 %v3066_v11, %v7355_v50  ;;  %v3068_v53 = vpop.f32.mrb[85].mxu0 }
 0x53b   : > { %v3384_v28 = vmul.f32 %v3320_v51, %v3059_v42  ;;  %v3069_v60 = vadd.f32 %v3068_v53, %v7359_v38  ;;  %v3070_v35 = vpop.f32.mrb[86].mxu0  ;;  %v3321_v19 = vadd.f32 1.0, %v3257_v44  ;;  %v3322_v32 = vadd.f32 1.0, %v3258_v59 }
 0x53c   : > { %v3447_v2 = vmul.f32 0.7978846, %v3383_v8  ;;  %v3195_v37 = vmul.f32 %v3067_v58, %v3067_v58  ;;  %v3071_v61 = vadd.f32 %v3070_v35, %v7355_v50  ;;  %v3072_v27 = vpop.f32.mrb[87].mxu0  ;;  %v7549_v46 = vmul.f32 0.5, %v3067_v58 }
 0x53d   : > { %v3448_v24 = vmul.f32 0.7978846, %v3384_v28  ;;  %v3196_v18 = vmul.f32 %v3069_v60, %v3069_v60  ;;  %v3385_v4 = vmul.f32 %v3321_v19, %v3061_v47  ;;  %v3386_v57 = vmul.f32 %v3322_v32, %v3063_v23 }
 0x53e   : > { %5928 = vtanh.f32 %v3447_v2  ;;  %v3259_v33 = vmul.f32 0.044715, %v3195_v37  ;;  %v3197_v42 = vmul.f32 %v3071_v61, %v3071_v61  ;;  %v5921_v0 = vpop.eup %5920  ;;  %v7551_v16 = vmul.f32 0.5, %v3069_v60 }
 0x53f   : > { %5930 = vtanh.f32 %v3448_v24  ;;  %v3260_v36 = vmul.f32 0.044715, %v3196_v18  ;;  %v3073_v51 = vadd.f32 %v3072_v27, %v7359_v38  ;;  %v5923_v49 = vpop.eup %5922  ;;  %v3635_v22 = vadd.f32 1.0, %v5921_v0 }
 0x540   : > { %v3323_v21 = vadd.f32 1.0, %v3259_v33  ;;  %v3261_v25 = vmul.f32 0.044715, %v3197_v42  ;;  %v3449_v11 = vmul.f32 0.7978846, %v3385_v4  ;;  %v5925_v28 = vpop.eup %5924  ;;  %v3636_v44 = vadd.f32 1.0, %v5923_v49 }
 0x541   : > { %v3450_v8 = vmul.f32 0.7978846, %v3386_v57  ;;  %v3324_v53 = vadd.f32 1.0, %v3260_v36  ;;  %v3198_v2 = vmul.f32 %v3073_v51, %v3073_v51  ;;  %v3076_v47 = vpop.f32.mrb[88].mxu0  ;;  %v3637_v23 = vadd.f32 1.0, %v5925_v28  ;;  %v5927_v32 = vpop.eup %5926 }
 0x542   : > { %v3387_v59 = vmul.f32 %v3323_v21, %v3067_v58  ;;  %v3325_v35 = vadd.f32 1.0, %v3261_v25  ;;  %5932 = vtanh.f32 %v3449_v11  ;;  %v7554_v24 = vmul.f32 0.5, %v3071_v61  ;;  %v3078_v19 = vpop.f32.mrb[89].mxu0 }
 0x543   : > { %v3388_v37 = vmul.f32 %v3324_v53, %v3069_v60  ;;  %v7557_v27 = vmul.f32 %v3635_v22, %v7514_v10  ;;  %5934 = vtanh.f32 %v3450_v8  ;;  %v3080_v42 = vpop.f32.mrb[90].mxu0  ;;  %v7560_v4 = vmul.f32 %v3636_v44, %v7516_v34 }
 0x544   : > { %v3451_v18 = vmul.f32 0.7978846, %v3387_v59  ;;  %v3389_v33 = vmul.f32 %v3325_v35, %v3071_v61  ;;  %v3638_v58 = vadd.f32 1.0, %v5927_v32  ;;  %v3262_v36 = vmul.f32 0.044715, %v3198_v2  ;;  %v3082_v0 = vpop.f32.mrb[91].mxu0 }
 0x545   : > { %8276 = vst [vmem:[#allocation19_spill] sm:$0xff] %v7560_v4  ;;  %v3452_v57 = vmul.f32 0.7978846, %v3388_v37  ;;  %v7563_v60 = vmul.f32 %v3637_v23, %v7532_v6  ;;  %v3077_v25 = vadd.f32 %v3076_v47, %v7355_v50  ;;  %v7566_v49 = vmul.f32 0.5, %v3073_v51 }
 0x546   : > { %5936 = vtanh.f32 %v3451_v18  ;;  %v3453_v21 = vmul.f32 0.7978846, %v3389_v33  ;;  %v3326_v10 = vadd.f32 1.0, %v3262_v36  ;;  %v3079_v61 = vadd.f32 %v3078_v19, %v7359_v38 }
 0x547   : > { %5938 = vtanh.f32 %v3452_v57  ;;  %v7570_v34 = vmul.f32 %v3638_v58, %v7534_v15  ;;  %v3199_v11 = vmul.f32 %v3077_v25, %v3077_v25  ;;  %v3081_v8 = vadd.f32 %v3080_v42, %v7355_v50 }
 0x548   : > { %v5929_v22 = vpop.eup %5928  ;;  %5940 = vtanh.f32 %v3453_v21  ;;  %v3390_v28 = vmul.f32 %v3326_v10, %v3073_v51  ;;  %v7573_v44 = vmul.f32 0.5, %v3077_v25  ;;  %v3200_v59 = vmul.f32 %v3079_v61, %v3079_v61 }
 0x549   : > { %8277 = vst [vmem:[#allocation20_spill] sm:$0xff] %v7570_v34  ;;  %v5931_v6 = vpop.eup %5930  ;;  %v3639_v53 = vadd.f32 1.0, %v5929_v22  ;;  %v3086_v35 = vpop.f32.mrb[92].mxu0  ;;  %v3263_v47 = vmul.f32 0.044715, %v3199_v11  ;;  %v7575_v23 = vmul.f32 0.5, %v3079_v61  ;;  %v3201_v37 = vmul.f32 %v3081_v8, %v3081_v8 }
 0x54a   : > { %v3640_v2 = vadd.f32 1.0, %v5931_v6  ;;  %v3088_v19 = vpop.f32.mrb[93].mxu0  ;;  %v3454_v32 = vmul.f32 0.7978846, %v3390_v28  ;;  %v3264_v15 = vmul.f32 0.044715, %v3200_v59  ;;  %v3083_v33 = vadd.f32 %v3082_v0, %v7359_v38 }
 0x54b   : > { %v7577_v18 = vmul.f32 0.5, %v3081_v8  ;;  %v3090_v42 = vpop.f32.mrb[94].mxu0  ;;  %v7581_v58 = vmul.f32 %v3639_v53, %v7538_v7  ;;  %v3327_v51 = vadd.f32 1.0, %v3263_v47  ;;  %v3265_v57 = vmul.f32 0.044715, %v3201_v37 }
 0x54c   : > { %v3087_v36 = vadd.f32 %v3086_v35, %v7355_v50  ;;  %v3092_v21 = vpop.f32.mrb[95].mxu0  ;;  %v5933_v10 = vpop.eup %5932  ;;  %v7585_v22 = vmul.f32 %v3640_v2, %v7540_v14  ;;  %5942 = vtanh.f32 %v3454_v32  ;;  %v3328_v11 = vadd.f32 1.0, %v3264_v15 }
 0x54d   : > { %v3202_v6 = vmul.f32 %v3083_v33, %v3083_v33  ;;  %v5935_v28 = vpop.eup %5934  ;;  %v3641_v59 = vadd.f32 1.0, %v5933_v10  ;;  %v3391_v52 = vmul.f32 %v3327_v51, %v3077_v25  ;;  %v3329_v0 = vadd.f32 1.0, %v3265_v57 }
 0x54e   : > { %8278 = vst [vmem:[#allocation21_spill] sm:$0xff] %v7585_v22  ;;  %v3203_v56 = vmul.f32 %v3087_v36, %v3087_v36  ;;  %v3642_v45 = vadd.f32 1.0, %v5935_v28  ;;  %v3392_v7 = vmul.f32 %v3328_v11, %v3079_v61  ;;  %v7587_v47 = vmul.f32 0.5, %v3083_v33 }
 0x54f   : > { %v3266_v53 = vmul.f32 0.044715, %v3202_v6  ;;  %v3455_v35 = vmul.f32 0.7978846, %v3391_v52  ;;  %v3393_v20 = vmul.f32 %v3329_v0, %v3081_v8  ;;  %v7589_v62 = vmul.f32 0.5, %v3087_v36 }
 0x550   : > { %v5937_v37 = vpop.eup %5936  ;;  %v3267_v63 = vmul.f32 0.044715, %v3203_v56  ;;  %v7592_v2 = vmul.f32 %v3641_v59, %v7542_v1  ;;  %v3456_v15 = vmul.f32 0.7978846, %v3392_v7  ;;  %v7595_v52 = vmul.f32 %v3642_v45, %v7546_v43 }
 0x551   : > { %v5939_v14 = vpop.eup %5938  ;;  %v3643_v32 = vadd.f32 1.0, %v5937_v37  ;;  %v3330_v25 = vadd.f32 1.0, %v3266_v53  ;;  %v3096_v51 = vpop.f32.mrb[96].mxu0  ;;  %5944 = vtanh.f32 %v3455_v35  ;;  %v3457_v61 = vmul.f32 0.7978846, %v3393_v20 }
 0x552   : > { %v5941_v57 = vpop.eup %5940  ;;  %v3644_v10 = vadd.f32 1.0, %v5939_v14  ;;  %v3331_v11 = vadd.f32 1.0, %v3267_v63  ;;  %v3098_v6 = vpop.f32.mrb[97].mxu0  ;;  %8279 = vst [vmem:[#allocation22_spill] sm:$0xff] %v7595_v52  ;;  %5946 = vtanh.f32 %v3456_v15  ;;  %v3089_v0 = vadd.f32 %v3088_v19, %v7359_v38 }
 0x553   : > { %v3645_v56 = vadd.f32 1.0, %v5941_v57  ;;  %v3394_v8 = vmul.f32 %v3330_v25, %v3083_v33  ;;  %v3100_v28 = vpop.f32.mrb[98].mxu0  ;;  %v7598_v1 = vmul.f32 %v3643_v32, %v7549_v46  ;;  %5948 = vtanh.f32 %v3457_v61 }
 0x554   : > { %v3395_v59 = vmul.f32 %v3331_v11, %v3087_v36  ;;  %v3102_v7 = vpop.f32.mrb[99].mxu0  ;;  %v7602_v53 = vmul.f32 %v3644_v10, %v7551_v16  ;;  %v3091_v20 = vadd.f32 %v3090_v42, %v7355_v50  ;;  %v3093_v45 = vadd.f32 %v3092_v21, %v7359_v38 }
 0x555   : > { %v3458_v63 = vmul.f32 0.7978846, %v3394_v8  ;;  %v7607_v43 = vmul.f32 %v3645_v56, %v7554_v24  ;;  %v3204_v37 = vmul.f32 %v3089_v0, %v3089_v0  ;;  %v3097_v46 = vadd.f32 %v3096_v51, %v7355_v50 }
 0x556   : > { %8280 = vst [vmem:[#allocation23_spill] sm:$0xff] %v7602_v53  ;;  %v3459_v33 = vmul.f32 0.7978846, %v3395_v59  ;;  %v5943_v35 = vpop.eup %5942  ;;  %v7610_v36 = vmul.f32 0.5, %v3089_v0  ;;  %v3205_v19 = vmul.f32 %v3091_v20, %v3091_v20  ;;  %v3206_v14 = vmul.f32 %v3093_v45, %v3093_v45 }
 0x557   : > { %5950 = vtanh.f32 %v3458_v63  ;;  %v3646_v16 = vadd.f32 1.0, %v5943_v35  ;;  %v3268_v32 = vmul.f32 0.044715, %v3204_v37  ;;  %v7612_v15 = vmul.f32 0.5, %v3091_v20 }
 0x558   : > { %5952 = vtanh.f32 %v3459_v33  ;;  %v3269_v42 = vmul.f32 0.044715, %v3205_v19  ;;  %v3270_v21 = vmul.f32 0.044715, %v3206_v14  ;;  %v7614_v25 = vmul.f32 0.5, %v3093_v45 }
 0x559   : > { %v3207_v24 = vmul.f32 %v3097_v46, %v3097_v46  ;;  %v3106_v57 = vpop.f32.mrb[100].mxu0  ;;  %v3332_v10 = vadd.f32 1.0, %v3268_v32  ;;  %v7616_v61 = vmul.f32 0.5, %v3097_v46  ;;  %v3099_v51 = vadd.f32 %v3098_v6, %v7359_v38 }
 0x55a   : > { %v3101_v11 = vadd.f32 %v3100_v28, %v7355_v50  ;;  %v3108_v56 = vpop.f32.mrb[101].mxu0  ;;  %v7621_v8 = vmul.f32 %v3646_v16, %v7566_v49  ;;  %v3333_v59 = vadd.f32 1.0, %v3269_v42  ;;  %v3334_v63 = vadd.f32 1.0, %v3270_v21 }
 0x55b   : > { %v3271_v33 = vmul.f32 0.044715, %v3207_v24  ;;  %v3110_v37 = vpop.f32.mrb[102].mxu0  ;;  %v5945_v35 = vpop.eup %5944  ;;  %v3396_v19 = vmul.f32 %v3332_v10, %v3089_v0  ;;  %v3208_v14 = vmul.f32 %v3099_v51, %v3099_v51  ;;  %v3103_v32 = vadd.f32 %v3102_v7, %v7359_v38 }
 0x55c   : > { %8281 = vst [vmem:[#allocation24_spill] sm:$0xff] %v7621_v8  ;;  %v3209_v12 = vmul.f32 %v3101_v11, %v3101_v11  ;;  %v3112_v31 = vpop.f32.mrb[103].mxu0  ;;  %v5947_v55 = vpop.eup %5946  ;;  %v3647_v41 = vadd.f32 1.0, %v5945_v35  ;;  %v3397_v6 = vmul.f32 %v3333_v59, %v3091_v20  ;;  %v3398_v17 = vmul.f32 %v3334_v63, %v3093_v45 }
 0x55d   : > { %v3335_v28 = vadd.f32 1.0, %v3271_v33  ;;  %v5949_v13 = vpop.eup %5948  ;;  %v3648_v40 = vadd.f32 1.0, %v5947_v55  ;;  %v3460_v49 = vmul.f32 0.7978846, %v3396_v19  ;;  %v3272_v16 = vmul.f32 0.044715, %v3208_v14 }
 0x55e   : > { %v7624_v42 = vmul.f32 0.5, %v3099_v51  ;;  %v3649_v21 = vadd.f32 1.0, %v5949_v13  ;;  %v3461_v24 = vmul.f32 0.7978846, %v3397_v6  ;;  %v3462_v5 = vmul.f32 0.7978846, %v3398_v17 }
 0x55f   : > { %v7626_v0 = vmul.f32 0.5, %v3101_v11  ;;  %v7629_v10 = vmul.f32 %v3647_v41, %v7573_v44  ;;  %5954 = vtanh.f32 %v3460_v49  ;;  %v3399_v7 = vmul.f32 %v3335_v28, %v3097_v46 }
 0x560   : > { %v3336_v35 = vadd.f32 1.0, %v3272_v16  ;;  %v7632_v45 = vmul.f32 %v3648_v40, %v7575_v23  ;;  %5956 = vtanh.f32 %v3461_v24  ;;  %v3273_v55 = vmul.f32 0.044715, %v3209_v12 }
 0x561   : > { %v5951_v20 = vpop.eup %5950  ;;  %v3210_v59 = vmul.f32 %v3103_v32, %v3103_v32  ;;  %v3116_v63 = vpop.f32.mrb[104].mxu0  ;;  %5958 = vtanh.f32 %v3462_v5  ;;  %v3463_v17 = vmul.f32 0.7978846, %v3399_v7  ;;  %v7637_v41 = vmul.f32 %v3649_v21, %v7577_v18 }
 0x562   : > { %8282 = vst [vmem:[#allocation25_spill] sm:$0xff] %v7632_v45  ;;  %v5953_v33 = vpop.eup %5952  ;;  %v3650_v13 = vadd.f32 1.0, %v5951_v20  ;;  %v3400_v19 = vmul.f32 %v3336_v35, %v3099_v51  ;;  %v7634_v14 = vpop.f32.mrb[105].mxu0  ;;  %v3337_v46 = vadd.f32 1.0, %v3273_v55  ;;  %v7644_v12 = vmul.f32 0.5, %v3103_v32 }
 0x563   : > { %v3651_v44 = vadd.f32 1.0, %v5953_v33  ;;  %v3274_v6 = vmul.f32 0.044715, %v3210_v59  ;;  %v7639_v28 = vpop.f32.mrb[106].mxu0  ;;  %5960 = vtanh.f32 %v3463_v17  ;;  %v3107_v5 = vadd.f32 %v3106_v57, %v7355_v50 }
 0x564   : > { %v7642_v40 = vmul.f32 %v3650_v13, %v7587_v47  ;;  %v7647_v23 = vpop.f32.mrb[107].mxu0  ;;  %v3464_v51 = vmul.f32 0.7978846, %v3400_v19  ;;  %v3401_v49 = vmul.f32 %v3337_v46, %v3101_v11  ;;  %v3109_v18 = vadd.f32 %v3108_v56, %v7359_v38 }
 0x565   : > { %v3338_v16 = vadd.f32 1.0, %v3274_v6  ;;  %v7651_v21 = vmul.f32 %v3651_v44, %v7589_v62  ;;  %v3211_v24 = vmul.f32 %v3107_v5, %v3107_v5  ;;  %v7653_v7 = vmul.f32 0.5, %v3107_v5 }
 0x566   : > { %8283 = vst [vmem:[#allocation26_spill] sm:$0xff] %v7642_v40  ;;  %v3111_v47 = vadd.f32 %v3110_v37, %v7355_v50  ;;  %v3465_v35 = vmul.f32 0.7978846, %v3401_v49  ;;  %v3212_v55 = vmul.f32 %v3109_v18, %v3109_v18  ;;  %v7656_v59 = vmul.f32 0.5, %v3109_v18 }
 0x567   : > { %8284 = vst [vmem:[#allocation27_spill] sm:$0xff] %v7651_v21  ;;  %v3402_v20 = vmul.f32 %v3338_v16, %v3103_v32  ;;  %v3275_v57 = vmul.f32 0.044715, %v3211_v24  ;;  %v3113_v11 = vadd.f32 %v3112_v31, %v7359_v38  ;;  %5962 = vtanh.f32 %v3464_v51 }
 0x568   : > { %8285 = vst [vmem:[#allocation28_spill] sm:$0xff] %v7656_v59  ;;  %v3213_v33 = vmul.f32 %v3111_v47, %v3111_v47  ;;  %v7658_v13 = vmul.f32 0.5, %v3111_v47  ;;  %v3276_v62 = vmul.f32 0.044715, %v3212_v55  ;;  %v3117_v17 = vadd.f32 %v3116_v63, %v7355_v50 }
 0x569   : > { %v3466_v56 = vmul.f32 0.7978846, %v3402_v20  ;;  %v3126_v19 = vpop.f32.mrb[108].mxu0  ;;  %v5955_v37 = vpop.eup %5954  ;;  %5964 = vtanh.f32 %v3465_v35  ;;  %v3339_v32 = vadd.f32 1.0, %v3275_v57  ;;  %v3214_v6 = vmul.f32 %v3113_v11, %v3113_v11 }
 0x56a   : > { %v3277_v46 = vmul.f32 0.044715, %v3213_v33  ;;  %v3128_v49 = vpop.f32.mrb[109].mxu0  ;;  %v5957_v24 = vpop.eup %5956  ;;  %v3652_v26 = vadd.f32 1.0, %v5955_v37  ;;  %v3340_v54 = vadd.f32 1.0, %v3276_v62  ;;  %v7664_v3 = vmul.f32 0.5, %v3113_v11 }
 0x56b   : > { %v3215_v31 = vmul.f32 %v3117_v17, %v3117_v17  ;;  %v3130_v51 = vpop.f32.mrb[110].mxu0  ;;  %v5959_v55 = vpop.eup %5958  ;;  %v3653_v63 = vadd.f32 1.0, %v5957_v24  ;;  %v3403_v29 = vmul.f32 %v3339_v32, %v3107_v5  ;;  %v3278_v39 = vmul.f32 0.044715, %v3214_v6 }
 0x56c   : > { %v7662_v44 = vpop.f32.mrb[72].mxu1  ;;  %8286 = vst [vmem:[#allocation29_spill] sm:$0xff] %v7664_v3  ;;  %v3341_v9 = vadd.f32 1.0, %v3277_v46  ;;  %v3132_v48 = vpop.f32.mrb[111].mxu0  ;;  %v3654_v57 = vadd.f32 1.0, %v5959_v55  ;;  %5966 = vtanh.f32 %v3466_v56  ;;  %v3404_v33 = vmul.f32 %v3340_v54, %v3109_v18 }
 0x56d   : > { %v5437_v16 = vpop.f32.mrb[73].mxu1  ;;  %v3279_v30 = vmul.f32 0.044715, %v3215_v31  ;;  %v7669_v62 = vmul.f32 %v3652_v26, %v7610_v36  ;;  %v3467_v37 = vmul.f32 0.7978846, %v3403_v29  ;;  %v3342_v45 = vadd.f32 1.0, %v3278_v39 }
 0x56e   : > { %v4271_v20 = vpop.f32.mrb[74].mxu1  ;;  %v7666_v16 = vpop.eup %5960  ;;  %v3405_v40 = vmul.f32 %v3341_v9, %v3111_v47  ;;  %v7675_v5 = vmul.f32 %v3654_v57, %v7614_v25  ;;  %v3468_v32 = vmul.f32 0.7978846, %v3404_v33  ;;  %v3119_v18 = vadd.f32 %v7634_v14, %v7359_v38 }
 0x56f   : > { %v5438_v35 = vpop.f32.mrb[75].mxu1  ;;  %8287 = vst [vmem:[#allocation30_spill] sm:$0xff] %v7669_v62  ;;  %v7672_v20 = vmul.f32 %v3653_v63, %v7612_v15  ;;  %v3343_v46 = vadd.f32 1.0, %v3279_v30  ;;  %5968 = vtanh.f32 %v3467_v37  ;;  %v3406_v54 = vmul.f32 %v3342_v45, %v3113_v11 }
 0x570   : > { %8289 = vst [vmem:[#allocation32_spill] sm:$0xff] %v7675_v5  ;;  %v3469_v56 = vmul.f32 0.7978846, %v3405_v40  ;;  %5970 = vtanh.f32 %v3468_v32  ;;  %v3121_v9 = vadd.f32 %v7639_v28, %v7355_v50  ;;  %v3123_v39 = vadd.f32 %v7647_v23, %v7359_v38 }
 0x571   : > { %8288 = vst [vmem:[#allocation31_spill] sm:$0xff] %v7672_v20  ;;  %v3407_v26 = vmul.f32 %v3343_v46, %v3117_v17  ;;  %v7683_v29 = vpop.f32.mrb[112].mxu0  ;;  %v3470_v36 = vmul.f32 0.7978846, %v3406_v54  ;;  %v7685_v15 = vmul.f32 0.5, %v3117_v17  ;;  %v3216_v30 = vmul.f32 %v3119_v18, %v3119_v18  ;;  %v7689_v45 = vpop.eup %5962 }
 0x572   : > { %5972 = vtanh.f32 %v3469_v56  ;;  %v7687_v25 = vpop.f32.mrb[113].mxu0  ;;  %v7691_v40 = vmul.f32 0.5, %v3119_v18  ;;  %v3217_v47 = vmul.f32 %v3121_v9, %v3121_v9  ;;  %v3218_v11 = vmul.f32 %v3123_v39, %v3123_v39 }
 0x573   : > { %v3471_v14 = vmul.f32 0.7978846, %v3407_v26  ;;  %v7693_v28 = vpop.f32.mrb[114].mxu0  ;;  %v7695_v6 = vpop.eup %5964  ;;  %5974 = vtanh.f32 %v3470_v36  ;;  %v3280_v23 = vmul.f32 0.044715, %v3216_v30  ;;  %v7697_v24 = vmul.f32 0.5, %v3121_v9 }
 0x574   : > { %8290 = vst [vmem:[#allocation33_spill] sm:$0xff] %v7691_v40  ;;  %v3127_v17 = vadd.f32 %v3126_v19, %v7355_v50  ;;  %v7700_v31 = vpop.f32.mrb[115].mxu0  ;;  %v3281_v55 = vmul.f32 0.044715, %v3217_v47  ;;  %v3282_v63 = vmul.f32 0.044715, %v3218_v11  ;;  %v3129_v57 = vadd.f32 %v3128_v49, %v7359_v38 }
 0x575   : > { %v7702_v35 = vmul.f32 0.5, %v3123_v39  ;;  %5976 = vtanh.f32 %v3471_v14  ;;  %v3344_v33 = vadd.f32 1.0, %v3280_v23  ;;  %v3131_v32 = vadd.f32 %v3130_v51, %v7355_v50  ;;  %v4992_v36 = vld [vmem:[%s8292_s24] ss:$0 sm:$0xff]  ;;  %s4896_s24 = sshll.u32 %s678_s30, 3 }
 0x576   : > { %v3219_v37 = vmul.f32 %v3127_v17, %v3127_v17  ;;  %v7706_v46 = vpop.eup %5966  ;;  %v3345_v56 = vadd.f32 1.0, %v3281_v55  ;;  %v3346_v54 = vadd.f32 1.0, %v3282_v63  ;;  %v7708_v26 = vmul.f32 0.5, %v3127_v17  ;;  %s680_s25 = scalar_lea.vmem [#allocation4], %s4896_s24 }
 0x577   : > { %8291 = vst [vmem:[#allocation34_spill] sm:$0xff] %v7702_v35  ;;  %v3220_v19 = vmul.f32 %v3129_v57, %v3129_v57  ;;  %v3408_v30 = vmul.f32 %v3344_v33, %v3119_v18  ;;  %v7713_v11 = vmul.f32 0.5, %v3129_v57  ;;  %v3221_v49 = vmul.f32 %v3131_v32, %v3131_v32 }
 0x578   : > { %v3283_v47 = vmul.f32 0.044715, %v3219_v37  ;;  %v3409_v14 = vmul.f32 %v3345_v56, %v3121_v9  ;;  %v3410_v23 = vmul.f32 %v3346_v54, %v3123_v39  ;;  %v3133_v51 = vadd.f32 %v3132_v48, %v7359_v38 }
 0x579   : > { %8293 = vst [vmem:[#allocation35_spill] sm:$0xff] %v7713_v11  ;;  %v3284_v5 = vmul.f32 0.044715, %v3220_v19  ;;  %v3146_v62 = vpop.f32.mrb[116].mxu0  ;;  %v7716_v55 = vpop.eup %5968  ;;  %v3472_v63 = vmul.f32 0.7978846, %v3408_v30  ;;  %v4269_v52 = vadd.f32 %v4992_v36, %v7662_v44 }
 0x57a   : > { %v3347_v8 = vadd.f32 1.0, %v3283_v47  ;;  %v3285_v53 = vmul.f32 0.044715, %v3221_v49  ;;  %v7719_v22 = vpop.f32.mrb[117].mxu0  ;;  %v7721_v18 = vpop.eup %5970  ;;  %v3473_v33 = vmul.f32 0.7978846, %v3409_v14  ;;  %v3222_v9 = vmul.f32 %v3133_v51, %v3133_v51 }
 0x57b   : > { %8294 = vst [vmem:[#allocation36_spill] sm:$0xff] %v7721_v18  ;;  %v3474_v37 = vmul.f32 0.7978846, %v3410_v23  ;;  %v3348_v34 = vadd.f32 1.0, %v3284_v5  ;;  %v7723_v39 = vpop.f32.mrb[118].mxu0  ;;  %5978 = vtanh.f32 %v3472_v63  ;;  %v7727_v19 = vmul.f32 0.5, %v3131_v32 }
 0x57c   : > { %v7725_v56 = vpop.eup %5972  ;;  %v3411_v48 = vmul.f32 %v3347_v8, %v3127_v17  ;;  %v3349_v54 = vadd.f32 1.0, %v3285_v53  ;;  %v7729_v30 = vpop.f32.mrb[119].mxu0  ;;  %5980 = vtanh.f32 %v3473_v33  ;;  %v3286_v36 = vmul.f32 0.044715, %v3222_v9 }
 0x57d   : > { %v3412_v44 = vmul.f32 %v3348_v34, %v3129_v57  ;;  %v4274_v47 = vmul.f32 %v4269_v52, %v4269_v52  ;;  %v7731_v49 = vpop.eup %5974  ;;  %5982 = vtanh.f32 %v3474_v37  ;;  %v7733_v23 = vmul.f32 0.5, %v3133_v51 }
 0x57e   : > { %8295 = vst [vmem:[#allocation37_spill] sm:$0xff] %v7731_v49  ;;  %v3475_v5 = vmul.f32 0.7978846, %v3411_v48  ;;  %v3413_v14 = vmul.f32 %v3349_v54, %v3131_v32  ;;  %v3350_v11 = vadd.f32 1.0, %v3286_v36  ;;  %v3137_v53 = vadd.f32 %v7683_v29, %v7355_v50 }
 0x57f   : > { %8296 = vst [vmem:[#allocation38_spill] sm:$0xff] %v7733_v23  ;;  %v3476_v4 = vmul.f32 0.7978846, %v3412_v44  ;;  %v4275_v63 = vmul.f32 0.044715, %v4274_v47  ;;  %v7737_v8 = vpop.eup %5976  ;;  %v3655_v34 = vadd.f32 1.0, %v7666_v16  ;;  %v3151_v23 = vadd.f32 %v7723_v39, %v7355_v50 }
 0x580   : > { %5984 = vtanh.f32 %v3475_v5  ;;  %v3477_v17 = vmul.f32 0.7978846, %v3413_v14  ;;  %v3657_v57 = vadd.f32 1.0, %v7695_v6  ;;  %v3414_v33 = vmul.f32 %v3350_v11, %v3133_v51 }
 0x581   : > { %5986 = vtanh.f32 %v3476_v4  ;;  %v4276_v37 = vadd.f32 1.0, %v4275_v63  ;;  %v3223_v32 = vmul.f32 %v3137_v53, %v3137_v53  ;;  %v7741_v9 = vpop.f32.mrb[120].mxu0  ;;  %v7743_v48 = vmul.f32 0.5, %v4269_v52 }
 0x582   : > { %5988 = vtanh.f32 %v3477_v17  ;;  %v3719_v54 = vmul.f32 %v3655_v34, %v7616_v61  ;;  %v3721_v29 = vmul.f32 %v3657_v57, %v7626_v0  ;;  %v7747_v44 = vpop.f32.mrb[121].mxu0  ;;  %v3478_v36 = vmul.f32 0.7978846, %v3414_v33 }
 0x583   : > { %v4277_v47 = vmul.f32 %v4276_v37, %v4269_v52  ;;  %v3287_v16 = vmul.f32 0.044715, %v3223_v32  ;;  %v3139_v4 = vadd.f32 %v7687_v25, %v7359_v38  ;;  %v7751_v6 = vpop.f32.mrb[122].mxu0  ;;  %v3141_v51 = vadd.f32 %v7693_v28, %v7355_v50 }
 0x584   : > { %v3767_v11 = vpack.c.bf16 %v3721_v29, %v3719_v54  ;;  %v3143_v5 = vadd.f32 %v7700_v31, %v7359_v38  ;;  %v3147_v61 = vadd.f32 %v3146_v62, %v7355_v50  ;;  %v7758_v0 = vpop.f32.mrb[123].mxu0  ;;  %v7760_v52 = vmul.f32 0.5, %v3137_v53 }
 0x585   : > { %v4278_v14 = vmul.f32 0.7978846, %v4277_v47  ;;  %v3351_v63 = vadd.f32 1.0, %v3287_v16  ;;  %v3224_v17 = vmul.f32 %v3139_v4, %v3139_v4  ;;  %v7762_v34 = vpop.eup %5978  ;;  %5990 = vtanh.f32 %v3478_v36 }
 0x586   : > { %8297 = vst [vmem:[#allocation39_spill] sm:$0xff] %v7762_v34  ;;  %5205 = vmatprep.subr.bf16.mxu0 %v3767_v11  ;;  %v7764_v25 = vmul.f32 0.5, %v3139_v4  ;;  %v3225_v57 = vmul.f32 %v3141_v51, %v3141_v51  ;;  %v3226_v28 = vmul.f32 %v3143_v5, %v3143_v5  ;;  %v7766_v33 = vpop.eup %5980  ;;  %v7768_v37 = vmul.f32 0.5, %v3141_v51 }
 0x587   : > { %5992 = vtanh.f32 %v4278_v14  ;;  %v3415_v31 = vmul.f32 %v3351_v63, %v3137_v53  ;;  %v3288_v62 = vmul.f32 0.044715, %v3224_v17  ;;  %v7770_v32 = vpop.eup %5982  ;;  %v7772_v47 = vmul.f32 0.5, %v3143_v5 }
 0x588   : > { %8298 = vst [vmem:[#allocation40_spill] sm:$0xff] %v7764_v25  ;;  %8299 = vst [vmem:[#allocation41_spill] sm:$0xff] %v7770_v32  ;;  %v3289_v54 = vmul.f32 0.044715, %v3225_v57  ;;  %v3290_v29 = vmul.f32 0.044715, %v3226_v28  ;;  %v3227_v16 = vmul.f32 %v3147_v61, %v3147_v61  ;;  %v3149_v25 = vadd.f32 %v7719_v22, %v7359_v38 }
 0x589   : > { %8300 = vst [vmem:[#allocation42_spill] sm:$0xff] %v7772_v47  ;;  %v3479_v36 = vmul.f32 0.7978846, %v3415_v31  ;;  %v3352_v11 = vadd.f32 1.0, %v3288_v62  ;;  %v3166_v14 = vpop.f32.mrb[124].mxu0  ;;  %v3153_v57 = vadd.f32 %v7729_v30, %v7359_v38  ;;  %v7786_v62 = vmul.f32 0.5, %v3147_v61 }
 0x58a   : > { %v7778_v53 = vpop.eup %5984  ;;  %v3353_v63 = vadd.f32 1.0, %v3289_v54  ;;  %v3354_v17 = vadd.f32 1.0, %v3290_v29  ;;  %v3291_v35 = vmul.f32 0.044715, %v3227_v16  ;;  %v7782_v28 = vpop.f32.mrb[125].mxu0  ;;  %v3228_v22 = vmul.f32 %v3149_v25, %v3149_v25 }
 0x58b   : > { %v7784_v47 = vpop.eup %5986  ;;  %5994 = vtanh.f32 %v3479_v36  ;;  %v3416_v31 = vmul.f32 %v3352_v11, %v3139_v4  ;;  %v7788_v40 = vpop.f32.mrb[126].mxu0  ;;  %v3229_v16 = vmul.f32 %v3151_v23, %v3151_v23  ;;  %v7794_v34 = vmul.f32 0.5, %v3149_v25 }
 0x58c   : > { %8301 = vst [vmem:[#allocation43_spill] sm:$0xff] %v7784_v47  ;;  %v7790_v39 = vpop.eup %5988  ;;  %v3417_v3 = vmul.f32 %v3353_v63, %v3141_v51  ;;  %v3418_v54 = vmul.f32 %v3354_v17, %v3143_v5  ;;  %v3355_v29 = vadd.f32 1.0, %v3291_v35  ;;  %v7792_v32 = vpop.f32.mrb[127].mxu0  ;;  %v3292_v59 = vmul.f32 0.044715, %v3228_v22 }
 0x58d   : > { %v3480_v30 = vmul.f32 0.7978846, %v3416_v31  ;;  %v3230_v47 = vmul.f32 %v3153_v57, %v3153_v57  ;;  %v3293_v49 = vmul.f32 0.044715, %v3229_v16  ;;  %v7796_v20 = vmul.f32 0.5, %v3151_v23 }
 0x58e   : > { %v3481_v36 = vmul.f32 0.7978846, %v3417_v3  ;;  %v3482_v4 = vmul.f32 0.7978846, %v3418_v54  ;;  %v3419_v11 = vmul.f32 %v3355_v29, %v3147_v61  ;;  %v3356_v18 = vadd.f32 1.0, %v3292_v59 }
 0x58f   : > { %5996 = vtanh.f32 %v3480_v30  ;;  %v3294_v21 = vmul.f32 0.044715, %v3230_v47  ;;  %v7798_v51 = vpop.eup %5990  ;;  %v3357_v5 = vadd.f32 1.0, %v3293_v49  ;;  %v7800_v63 = vmul.f32 0.5, %v3153_v57 }
 0x590   : > { %v3483_v35 = vmul.f32 0.7978846, %v3419_v11  ;;  %v3157_v17 = vadd.f32 %v7741_v9, %v7355_v50  ;;  %5998 = vtanh.f32 %v3481_v36  ;;  %v3420_v3 = vmul.f32 %v3356_v18, %v3149_v25 }
 0x591   : > { %8302 = vst [vmem:[#allocation44_spill] sm:$0xff] %v7800_v63  ;;  %v5993_v31 = vpop.eup %5992  ;;  %v3358_v22 = vadd.f32 1.0, %v3294_v21  ;;  %v3159_v61 = vadd.f32 %v7747_v44, %v7359_v38  ;;  %6000 = vtanh.f32 %v3482_v4  ;;  %v3421_v54 = vmul.f32 %v3357_v5, %v3151_v23 }
 0x592   : > { %v4281_v59 = vadd.f32 1.0, %v5993_v31  ;;  %v3231_v47 = vmul.f32 %v3157_v17, %v3157_v17  ;;  %6002 = vtanh.f32 %v3483_v35  ;;  %v3484_v29 = vmul.f32 0.7978846, %v3420_v3 }
 0x593   : > { %v3422_v16 = vmul.f32 %v3358_v22, %v3153_v57  ;;  %v3232_v49 = vmul.f32 %v3159_v61, %v3159_v61  ;;  %v3485_v11 = vmul.f32 0.7978846, %v3421_v54  ;;  %v7809_v63 = vmul.f32 0.5, %v3157_v17 }
 0x594   : > { %v7807_v30 = vmul.f32 %v4281_v59, %v7743_v48  ;;  %v3295_v9 = vmul.f32 0.044715, %v3231_v47  ;;  %6004 = vtanh.f32 %v3484_v29  ;;  %v3161_v23 = vadd.f32 %v7751_v6, %v7355_v50 }
 0x595   : > { %v7811_v18 = vpop.eup %5994  ;;  %v3486_v21 = vmul.f32 0.7978846, %v3422_v16  ;;  %v3296_v44 = vmul.f32 0.044715, %v3232_v49  ;;  %6006 = vtanh.f32 %v3485_v11  ;;  %v3163_v57 = vadd.f32 %v7758_v0, %v7359_v38 }
 0x596   : > { %v3359_v25 = vadd.f32 1.0, %v3295_v9  ;;  %v3167_v48 = vadd.f32 %v3166_v14, %v7355_v50  ;;  %v7818_v4 = vmul.f32 0.5, %v3159_v61  ;;  %v3233_v35 = vmul.f32 %v3161_v23, %v3161_v23 }
 0x597   : > { %6008 = vtanh.f32 %v3486_v21  ;;  %v3360_v36 = vadd.f32 1.0, %v3296_v44  ;;  %v7820_v31 = vmul.f32 0.5, %v3161_v23  ;;  %v3234_v3 = vmul.f32 %v3163_v57, %v3163_v57 }
 0x598   : > { %v3423_v5 = vmul.f32 %v3359_v25, %v3157_v17  ;;  %v3235_v22 = vmul.f32 %v3167_v48, %v3167_v48  ;;  %v3297_v54 = vmul.f32 0.044715, %v3233_v35  ;;  %v7824_v47 = vmul.f32 0.5, %v3163_v57 }
 0x599   : > { %v7822_v59 = vpop.eup %5996  ;;  %v3424_v6 = vmul.f32 %v3360_v36, %v3159_v61  ;;  %v3169_v0 = vadd.f32 %v7782_v28, %v7359_v38  ;;  %v3298_v29 = vmul.f32 0.044715, %v3234_v3  ;;  %v3171_v49 = vadd.f32 %v7788_v40, %v7355_v50 }
 0x59a   : > { %8303 = vst [vmem:[#allocation45_spill] sm:$0xff] %v7824_v47  ;;  %v3487_v14 = vmul.f32 0.7978846, %v3423_v5  ;;  %v3299_v16 = vmul.f32 0.044715, %v3235_v22  ;;  %v7830_v17 = vpop.eup %5998  ;;  %v3361_v9 = vadd.f32 1.0, %v3297_v54  ;;  %v7842_v54 = vadd.f32 %v7792_v32, %v7359_v38 }
 0x59b   : > { %v3488_v11 = vmul.f32 0.7978846, %v3424_v6  ;;  %v7832_v21 = vmul.f32 0.5, %v3167_v48  ;;  %v3236_v44 = vmul.f32 %v3169_v0, %v3169_v0  ;;  %v7834_v61 = vpop.eup %6000  ;;  %v3362_v25 = vadd.f32 1.0, %v3298_v29 }
 0x59c   : > { %6010 = vtanh.f32 %v3487_v14  ;;  %v3363_v36 = vadd.f32 1.0, %v3299_v16  ;;  %v3237_v35 = vmul.f32 %v3171_v49, %v3171_v49  ;;  %v7836_v28 = vpop.eup %6002  ;;  %v3425_v5 = vmul.f32 %v3361_v9, %v3161_v23  ;;  %v5614_v14 = vld [vmem:[%s8209_s21] ss:$8 sps:$4 sm:$0xff]  }
 0x59d   : > { %6012 = vtanh.f32 %v3488_v11  ;;  %v3300_v3 = vmul.f32 0.044715, %v3236_v44  ;;  %v7838_v22 = vmul.f32 0.5, %v3169_v0  ;;  %v3426_v50 = vmul.f32 %v3362_v25, %v3163_v57  ;;  %v5619_v57 = vld [vmem:[%s8209_s21 + $0x14] ss:$8 sps:$4 sm:$0xff]  }
 0x59e   : > { %v3427_v40 = vmul.f32 %v3363_v36, %v3167_v48  ;;  %v3301_v6 = vmul.f32 0.044715, %v3237_v35  ;;  %v7847_v29 = vpop.eup %6004  ;;  %v3489_v16 = vmul.f32 0.7978846, %v3425_v5  ;;  %v4300_v23 = vpack.c.bf16 %v7807_v30, %v7807_v30 }
 0x59f   : > { %v3364_v47 = vadd.f32 1.0, %v3300_v3  ;;  %v3656_v48 = vadd.f32 1.0, %v7689_v45  ;;  %v7855_v11 = vpop.eup %6006  ;;  %v3490_v38 = vmul.f32 0.7978846, %v3426_v50  ;;  %v3238_v44 = vmul.f32 %v7842_v54, %v7842_v54  ;;  %v5617_v3 = vld [vmem:[%s8209_s21 + $0x10] ss:$8 sps:$4 sm:$0xff]  }
 0x5a0   : > { %v3491_v32 = vmul.f32 0.7978846, %v3427_v40  ;;  %v3365_v9 = vadd.f32 1.0, %v3301_v6  ;;  %6014 = vtanh.f32 %v3489_v16  ;;  %v7861_v35 = vmul.f32 0.5, %v3171_v49  ;;  %5456 = vmatmul.mubr.bf16.vlgmr.msra.gmra.mrb[76].mxu1 %v4300_v23 }
 0x5a1   : > { %v7859_v25 = vpop.eup %6008  ;;  %v3428_v36 = vmul.f32 %v3364_v47, %v3169_v0  ;;  %v3658_v30 = vadd.f32 1.0, %v7706_v46  ;;  %6016 = vtanh.f32 %v3490_v38  ;;  %v3302_v45 = vmul.f32 0.044715, %v3238_v44  ;;  %4635 = vmatpush1.bf16.msra.mxu1 %v5614_v14  ;;  %v5622_v46 = vld [vmem:[%s8209_s21 + $0x24] ss:$8 sps:$4 sm:$0xff]  }
 0x5a2   : > { %v3429_v5 = vmul.f32 %v3365_v9, %v3171_v49  ;;  %v7868_v50 = vmul.f32 %v3656_v48, %v7624_v42  ;;  %v8304_v40 = vmov 0   ;;  %6018 = vtanh.f32 %v3491_v32  ;;  %4636 = vmatprep.subr.bf16.mxu1 %v5619_v57 }
 0x5a3   : > { %4666 = vmatprep.mubr.bf16.mxu1 %v8304_v40  ;;  %v3492_v47 = vmul.f32 0.7978846, %v3428_v36  ;;  %v7875_v0 = vmul.f32 %v3658_v30, %v7644_v12  ;;  %v3659_v49 = vadd.f32 1.0, %v7716_v55  ;;  %v3366_v14 = vadd.f32 1.0, %v3302_v45  ;;  %v5620_v55 = vld [vmem:[%s8209_s21 + $0x20] ss:$8 sps:$4 sm:$0xff]  }
 0x5a4   : > { %v3493_v6 = vmul.f32 0.7978846, %v3429_v5  ;;  %v3661_v16 = vadd.f32 1.0, %v7725_v56  ;;  %v3663_v42 = vadd.f32 1.0, %v7737_v8  ;;  %v3665_v48 = vadd.f32 1.0, %v7766_v33 }
 0x5a5   : > { %6020 = vtanh.f32 %v3492_v47  ;;  %v7883_v57 = vmul.f32 %v3659_v49, %v7653_v7  ;;  %v3430_v12 = vmul.f32 %v3366_v14, %v7842_v54  ;;  %4637 = vmatpush1.bf16.msra.mxu1 %v5617_v3  ;;  %v5625_v7 = vld [vmem:[%s8209_s21 + $0x34] ss:$8 sps:$4 sm:$0xff]   ;;  %v3667_v9 = vadd.f32 1.0, %v7778_v53 }
 0x5a6   : > { %v6011_v38 = vpop.eup %6010  ;;  %6022 = vtanh.f32 %v3493_v6  ;;  %v7891_v56 = vmul.f32 %v3661_v16, %v7658_v13  ;;  %v7894_v8 = vmul.f32 %v3663_v42, %v7685_v15  ;;  %4638 = vmatprep.subr.bf16.mxu1 %v5622_v46  ;;  %v7902_v33 = vmul.f32 %v3665_v48, %v7697_v24 }
 0x5a7   : > { %v7896_v32 = vpop.eup %6012  ;;  %v3669_v44 = vadd.f32 1.0, %v7790_v39  ;;  %v3494_v36 = vmul.f32 0.7978846, %v3430_v12  ;;  %v3671_v30 = vadd.f32 1.0, %v7811_v18  ;;  %v3673_v5 = vadd.f32 1.0, %v7830_v17  ;;  %v8305_v12 = vld [vmem:[#allocation27_spill] sm:$0xff] }
 0x5a8   : > { %v7915_v24 = vmul.f32 %v3667_v9, %v7708_v26  ;;  %v5623_v18 = vld [vmem:[%s8209_s21 + $0x30] ss:$8 sps:$4 sm:$0xff]   ;;  %v3675_v26 = vadd.f32 1.0, %v7836_v28  ;;  %v3677_v46 = vadd.f32 1.0, %v7855_v11  ;;  %v3679_v49 = vadd.f32 1.0, %v6011_v38 }
 0x5a9   : > { %v7918_v53 = vmul.f32 %v3669_v44, %v7727_v19  ;;  %6024 = vtanh.f32 %v3494_v36  ;;  %4639 = vmatpush1.bf16.msra.mxu1 %v5620_v55  ;;  %v7926_v17 = vmul.f32 %v3671_v30, %v7760_v52  ;;  %v7929_v3 = vmul.f32 %v3673_v5, %v7768_v37  ;;  %v5628_v19 = vld [vmem:[%s8209_s21 + $0x44] ss:$8 sps:$4 sm:$0xff]   ;;  %v8306_v38 = vld [vmem:[#allocation31_spill] sm:$0xff] }
 0x5aa   : > { %v6015_v40 = vpop.eup %6014  ;;  %4640 = vmatprep.subr.bf16.mxu1 %v5625_v7  ;;  %v7943_v28 = vmul.f32 %v3675_v26, %v7786_v62  ;;  %v7948_v48 = vmul.f32 %v3677_v46, %v7796_v20  ;;  %v7951_v11 = vmul.f32 %v3679_v49, %v7809_v63  ;;  %v8307_v7 = vld [vmem:[#allocation36_spill] sm:$0xff]  ;;  %v8308_v30 = vld [vmem:[#allocation37_spill] sm:$0xff]  ;;  %v8309_v5 = vld [vmem:[#allocation39_spill] sm:$0xff]  ;;  %v3676_v47 = vadd.f32 1.0, %v7847_v29 }
 0x5ab   : > { %v6017_v6 = vpop.eup %6016  ;;  %v3681_v14 = vadd.f32 1.0, %v6015_v40  ;;  %v3660_v9 = vadd.f32 1.0, %v8307_v7  ;;  %v5626_v62 = vld [vmem:[%s8209_s21 + $0x40] ss:$8 sps:$4 sm:$0xff]   ;;  %v3662_v20 = vadd.f32 1.0, %v8308_v30  ;;  %v3664_v26 = vadd.f32 1.0, %v8309_v5 }
 0x5ac   : > { %v6019_v42 = vpop.eup %6018  ;;  %v5631_v40 = vld [vmem:[%s8209_s21 + $0x54] ss:$8 sps:$4 sm:$0xff]   ;;  %v8310_v46 = vld [vmem:[#allocation28_spill] sm:$0xff]  ;;  %v8311_v7 = vld [vmem:[#allocation41_spill] sm:$0xff]  ;;  %v3680_v45 = vadd.f32 1.0, %v7896_v32 }
 0x5ad   : > { %4641 = vmatpush1.bf16.msra.mxu1 %v5623_v18  ;;  %v7960_v44 = vmul.f32 %v3681_v14, %v7820_v31  ;;  %v3683_v36 = vadd.f32 1.0, %v6019_v42  ;;  %v7970_v49 = vmul.f32 %v3660_v9, %v8310_v46  ;;  %v3666_v31 = vadd.f32 1.0, %v8311_v7  ;;  %v8312_v14 = vld [vmem:[#allocation43_spill] sm:$0xff]  ;;  %v8313_v5 = vld [vmem:[#allocation29_spill] sm:$0xff]  ;;  %v8315_v9 = vld [vmem:[#allocation34_spill] sm:$0xff] }
 0x5ae   : > { %4642 = vmatprep.subr.bf16.mxu1 %v5628_v19  ;;  %v3668_v42 = vadd.f32 1.0, %v8312_v14  ;;  %v7980_v16 = vmul.f32 %v3662_v20, %v8313_v5  ;;  %v8314_v52 = vld [vmem:[#allocation33_spill] sm:$0xff]  ;;  %v3670_v7 = vadd.f32 1.0, %v7798_v51  ;;  %v8316_v14 = vld [vmem:[#allocation35_spill] sm:$0xff]  ;;  %v8319_v5 = vld [vmem:[#allocation38_spill] sm:$0xff] }
 0x5af   : > { %v6021_v63 = vpop.eup %6020  ;;  %v7977_v19 = vmul.f32 %v3683_v36, %v7832_v21  ;;  %v7983_v39 = vmul.f32 %v3664_v26, %v8314_v52  ;;  %v7986_v46 = vmul.f32 %v3666_v31, %v8315_v9  ;;  %v5629_v21 = vld [vmem:[%s8209_s21 + $0x50] ss:$8 sps:$4 sm:$0xff]   ;;  %v8318_v52 = vld [vmem:[#allocation20_spill] sm:$0xff]  ;;  %v3674_v31 = vadd.f32 1.0, %v7834_v61  ;;  %v5637_v32 = vld [vmem:[%s8209_s21 + $0x74] ss:$8 sps:$4 sm:$0xff]  }
 0x5b0   : > { %v6023_v55 = vpop.eup %6022  ;;  %v7990_v37 = vmul.f32 %v3668_v42, %v8316_v14  ;;  %v8317_v20 = vld [vmem:[#allocation19_spill] sm:$0xff]  ;;  %v5634_v51 = vld [vmem:[%s8209_s21 + $0x64] ss:$8 sps:$4 sm:$0xff]   ;;  %v8010_v9 = vmul.f32 %v3670_v7, %v8319_v5  ;;  %v8321_v26 = vld [vmem:[#allocation22_spill] sm:$0xff]  ;;  %v3684_v7 = vadd.f32 1.0, %v6021_v63 }
 0x5b1   : > { %v3685_v18 = vadd.f32 1.0, %v6023_v55  ;;  %4643 = vmatpush1.bf16.msra.mxu1 %v5626_v62  ;;  %v3672_v55 = vadd.f32 1.0, %v7822_v59  ;;  %v8320_v14 = vld [vmem:[#allocation21_spill] sm:$0xff]  ;;  %v8322_v30 = vld [vmem:[#allocation40_spill] sm:$0xff]  ;;  %v8324_v5 = vld [vmem:[#allocation23_spill] sm:$0xff] }
 0x5b2   : > { %4644 = vmatprep.subr.bf16.mxu1 %v5631_v40  ;;  %v8323_v40 = vld [vmem:[#allocation42_spill] sm:$0xff]  ;;  %v8325_v42 = vld [vmem:[#allocation24_spill] sm:$0xff]  ;;  %v8057_v29 = vmul.f32 %v3684_v7, %v7838_v22 }
 0x5b3   : > { %v8005_v62 = vmul.f32 %v3685_v18, %v7861_v35  ;;  %v6025_v59 = vpop.eup %6024  ;;  %v8015_v61 = vmul.f32 %v3672_v55, %v8322_v30  ;;  %v8018_v13 = vmul.f32 %v3674_v31, %v8323_v40  ;;  %v3678_v35 = vadd.f32 1.0, %v7859_v25  ;;  %v5632_v30 = vld [vmem:[%s8209_s21 + $0x60] ss:$8 sps:$4 sm:$0xff]   ;;  %v8328_v40 = vld [vmem:[#allocation26_spill] sm:$0xff] }
 0x5b4   : > { %v8035_v25 = vmul.f32 %v3676_v47, %v7794_v34  ;;  %v3682_v31 = vadd.f32 1.0, %v6017_v6  ;;  %v3686_v15 = vadd.f32 1.0, %v6025_v59  ;;  %v8049_v47 = vmul.f32 %v3680_v45, %v7818_v4  ;;  %v5635_v63 = vld [vmem:[%s8209_s21 + $0x70] ss:$8 sps:$4 sm:$0xff]   ;;  %v5001_v22 = vld [vmem:[%s8206_s18] ss:$0 sm:$0xff] }
 0x5b5   : > { %v3781_v18 = vpack.c.bf16 %v8005_v62, %v7977_v19  ;;  %4645 = vmatpush1.bf16.msra.mxu1 %v5629_v21  ;;  %v8326_v19 = vld [vmem:[#allocation44_spill] sm:$0xff]  ;;  %v3558_v62 = vmul.f32 0.5, %v7842_v54  ;;  %v8327_v21 = vld [vmem:[#allocation25_spill] sm:$0xff]  ;;  %v8332_v59 = vpack.c.bf16 %v7875_v0, %v7868_v50  ;;  %v8334_v54 = vld [vmem:[#allocation7_spill] sm:$0xff] }
 0x5b6   : > { %v8038_v55 = vmul.f32 %v3678_v35, %v8326_v19  ;;  %4646 = vmatprep.subr.bf16.mxu1 %v5634_v51  ;;  %v8329_v35 = vld [vmem:[#allocation45_spill] sm:$0xff] }
 0x5b7   : > { %v8052_v6 = vmul.f32 %v3682_v31, %v8329_v35  ;;  %v8059_v23 = vmul.f32 %v3686_v15, %v3558_v62 }
 0x5b9   : > { %4647 = vmatpush1.bf16.msra.mxu1 %v5632_v30 }
 0x5ba   : > { %4648 = vmatprep.subr.bf16.mxu1 %v5637_v32 }
 0x5bd   : > { %4649 = vmatpush1.bf16.msra.mxu1 %v5635_v63 }
 0x5be   : > { %5223 = vmatprep.subr.bf16.mxu1 %v8332_v59  ;;  %v8333_v59 = vld [vmem:[#allocation8_spill] sm:$0xff] }
 0x5bf   : > { %v8335_v51 = vpack.c.bf16 %v8333_v59, %v8334_v54  ;;  %v8344_v54 = vpack.c.bf16 %v7918_v53, %v7915_v24  ;;  %v8349_v24 = vpack.c.bf16 %v7607_v43, %v7598_v1  ;;  %v8361_v59 = vld [vmem:[#allocation18_spill] sm:$0xff] }
 0x673   : > { %v4389_v15 = vpop.f32.mrb[76].mxu1 }
 0x674   : > { %v4390_v7 = vadd.f32 %v5001_v22, %v4389_v15  ;;  %v5457_v30 = vpop.f32.mrb[77].mxu1  ;;  %v8336_v22 = vpack.c.bf16 %v7891_v56, %v7883_v57  ;;  %v8337_v15 = vld [vmem:[#allocation10_spill] sm:$0xff]  ;;  %v8345_v57 = vpack.c.bf16 %v7563_v60, %v7557_v27  ;;  %v8346_v56 = vpack.c.bf16 %v7929_v3, %v7926_v17 }
 0x675   : > { %v4392_v31 = vpop.f32.mrb[78].mxu1  ;;  %v8338_v30 = vld [vmem:[#allocation9_spill] sm:$0xff]  ;;  %v8350_v27 = vpack.c.bf16 %v7960_v44, %v7951_v11  ;;  %v8351_v60 = vpack.c.bf16 %v7637_v41, %v7629_v10 }
 0x676   : > { %v4395_v62 = vmul.f32 %v4390_v7, %v4390_v7  ;;  %v5458_v35 = vpop.f32.mrb[79].mxu1  ;;  %v4400_v45 = vmul.f32 0.5, %v4390_v7  ;;  %v8354_v31 = vld [vmem:[#allocation12_spill] sm:$0xff] }
 0x677   : > { %v8356_v35 = vpack.c.bf16 %v7980_v16, %v7970_v49  ;;  %v8365_v16 = vpack.c.bf16 %v8318_v52, %v8317_v20  ;;  %v8366_v49 = vpack.c.bf16 %v8018_v13, %v8015_v61  ;;  %v8370_v20 = vpack.c.bf16 %v8052_v6, %v8049_v47  ;;  %v8376_v61 = vld [vmem:[#allocation6_spill] sm:$0xff] }
 0x678   : > { %v4396_v19 = vmul.f32 0.044715, %v4395_v62  ;;  %v8371_v13 = vpack.c.bf16 %v8328_v40, %v8327_v21  ;;  %v8372_v52 = vpack.c.bf16 %v8059_v23, %v8057_v29 }
 0x67a   : > { %v4397_v32 = vadd.f32 1.0, %v4396_v19  ;;  %v8339_v19 = vpack.c.bf16 %v8337_v15, %v8338_v30  ;;  %v8364_v30 = vpack.c.bf16 %v8010_v9, %v7990_v37  ;;  %v8369_v37 = vpack.c.bf16 %v8325_v42, %v8324_v5  ;;  %v8374_v9 = vld [vmem:[#allocation30_spill] sm:$0xff]  ;;  %v4541_v42 = vld [vmem:[%s8210_s22] sm:$0x3] }
 0x67b   : > { %v8377_v5 = vsub.s32 0, %v8376_v61 }
 0x67c   : > { %v4398_v36 = vmul.f32 %v4397_v32, %v4390_v7  ;;  %v8353_v7 = vld [vmem:[#allocation11_spill] sm:$0xff]  ;;  %v8357_v32 = vld [vmem:[#allocation13_spill] sm:$0xff] }
 0x67d   : > { %v8355_v62 = vpack.c.bf16 %v8353_v7, %v8354_v31 }
 0x67e   : > { %v4399_v4 = vmul.f32 0.7978846, %v4398_v36  ;;  %v8340_v36 = vpack.c.bf16 %v7902_v33, %v7894_v8  ;;  %v8347_v8 = vpack.c.bf16 %v7592_v2, %v7581_v58  ;;  %v8348_v33 = vpack.c.bf16 %v7948_v48, %v7943_v28  ;;  %v5010_v2 = vld [vmem:[%s8208_s20] ss:$0 sm:$0xff] }
 0x67f   : > { %v8352_v58 = vpack.c.bf16 %v8306_v38, %v8305_v12 }
 0x680   : > { %6026 = vtanh.f32 %v4399_v4  ;;  %v8341_v4 = vld [vmem:[#allocation15_spill] sm:$0xff] }
 0x68a   : > { %v6027_v63 = vpop.eup %6026 }
 0x68b   : > { %v4402_v34 = vadd.f32 1.0, %v6027_v63  ;;  %v8358_v63 = vld [vmem:[#allocation14_spill] sm:$0xff] }
 0x68d   : > { %v4403_v50 = vmul.f32 %v4402_v34, %v4400_v45  ;;  %v8342_v34 = vld [vmem:[#allocation16_spill] sm:$0xff] }
 0x68e   : > { %v8343_v45 = vpack.c.bf16 %v8341_v4, %v8342_v34  ;;  %v4678_v34 = vstv %s4677_s3 }
 0x68f   : > { %v4421_v0 = vpack.c.bf16 %v4403_v50, %v4403_v50  ;;  %v8359_v50 = vpack.c.bf16 %v8357_v32, %v8358_v63 }
 0x691   : > { %5476 = vmatmul.mubr.bf16.vlgmr.msra.gmra.mrb[128].mxu0 %v4421_v0  ;;  %v8360_v0 = vpack.c.bf16 %v7986_v46, %v7983_v39  ;;  %v8367_v39 = vpack.c.bf16 %v8321_v26, %v8320_v14  ;;  %v8368_v46 = vpack.c.bf16 %v8038_v55, %v8035_v25  ;;  %v8373_v26 = vld [vmem:[#allocation32_spill] sm:$0xff]  ;;  %v4547_v25 = vrot.slane %v4541_v42, %v8377_v5 }
 0x692   : > { %5206 = vmatpush3.bf16.xpose.msra.mxu0 %v8335_v51  ;;  %v8375_v14 = vpack.c.bf16 %v8373_v26, %v8374_v9  ;;  %v8378_v55 = vsub.s32 1, %v8376_v61 }
 0x693   : > { %5207 = vmatprep.subr.bf16.mxu0 %v8336_v22  ;;  %v8362_v22 = vld [vmem:[#allocation17_spill] sm:$0xff] }
 0x694   : > { %v8363_v15 = vpack.c.bf16 %v8361_v59, %v8362_v22  ;;  %v4551_v21 = vrot.slane %v4541_v42, %v8378_v55 }
 0x69a   : > { %5208 = vmatpush3.bf16.xpose.msra.mxu0 %v8339_v19 }
 0x69b   : > { %5209 = vmatprep.subr.bf16.mxu0 %v8340_v36 }
 0x6a2   : > { %5210 = vmatpush3.bf16.xpose.msra.mxu0 %v8343_v45  ;;  %v4733_v45 = vstv %s5036_s4 }
 0x6a3   : > { %5211 = vmatprep.subr.bf16.mxu0 %v8344_v54 }
 0x6aa   : > { %5212 = vmatpush3.bf16.xpose.msra.mxu0 %v8345_v57 }
 0x6ab   : > { %5213 = vmatprep.subr.bf16.mxu0 %v8346_v56 }
 0x6b2   : > { %5214 = vmatpush3.bf16.xpose.msra.mxu0 %v8347_v8 }
 0x6b3   : > { %5215 = vmatprep.subr.bf16.mxu0 %v8348_v33 }
 0x6ba   : > { %5216 = vmatpush3.bf16.xpose.msra.mxu0 %v8349_v24 }
 0x6bb   : > { %5217 = vmatprep.subr.bf16.mxu0 %v8350_v27 }
 0x6c2   : > { %5218 = vmatpush3.bf16.xpose.msra.mxu0 %v8351_v60 }
 0x6c3   : > { %5219 = vmatprep.subr.bf16.mxu0 %v3781_v18 }
 0x6ca   : > { %5220 = vmatpush3.bf16.xpose.msra.mxu0 %v8352_v58 }
 0x764   : > { %v4510_v53 = vpop.f32.mrb[128].mxu0 }
 0x765   : > { %v4511_v1 = vadd.f32 %v5010_v2, %v4510_v53  ;;  %v5477_v43 = vpop.f32.mrb[129].mxu0 }
 0x766   : > { %v4513_v17 = vpop.f32.mrb[130].mxu0 }
 0x767   : > { %v4516_v3 = vmul.f32 %v4511_v1, %v4511_v1  ;;  %v5478_v28 = vpop.f32.mrb[131].mxu0  ;;  %v4521_v18 = vmul.f32 0.5, %v4511_v1 }
 0x769   : > { %v4517_v48 = vmul.f32 0.044715, %v4516_v3 }
 0x76b   : > { %v4518_v11 = vadd.f32 1.0, %v4517_v48 }
 0x76d   : > { %v4519_v44 = vmul.f32 %v4518_v11, %v4511_v1 }
 0x76f   : > { %v4520_v10 = vmul.f32 0.7978846, %v4519_v44 }
 0x771   : > { %6028 = vtanh.f32 %v4520_v10 }
 0x77b   : > { %v6029_v41 = vpop.eup %6028 }
 0x77c   : > { %v4523_v51 = vadd.f32 1.0, %v6029_v41 }
 0x77e   : > { %v4524_v12 = vmul.f32 %v4523_v51, %v4521_v18 }
 0x780   : > { %v4542_v38 = vpack.c.bf16 %v4524_v12, %v4524_v12 }
 0x782   : > { %4667 = vmatmul.mubr.bf16.vlgmr.msra.gmra.mrb[80].mxu1 %v4542_v38 }
 0x783   : > { %5224 = vmatpush3.bf16.xpose.msra.mxu1 %v8355_v62 }
 0x784   : > { %5225 = vmatprep.subr.bf16.mxu1 %v8356_v35 }
 0x78b   : > { %5226 = vmatpush3.bf16.xpose.msra.mxu1 %v8359_v50 }
 0x78c   : > { %5227 = vmatprep.subr.bf16.mxu1 %v8360_v0 }
 0x793   : > { %5228 = vmatpush3.bf16.xpose.msra.mxu1 %v8363_v15 }
 0x794   : > { %5229 = vmatprep.subr.bf16.mxu1 %v8364_v30 }
 0x79b   : > { %5230 = vmatpush3.bf16.xpose.msra.mxu1 %v8365_v16 }
 0x79c   : > { %5231 = vmatprep.subr.bf16.mxu1 %v8366_v49 }
 0x7a3   : > { %5232 = vmatpush3.bf16.xpose.msra.mxu1 %v8367_v39 }
 0x7a4   : > { %5233 = vmatprep.subr.bf16.mxu1 %v8368_v46 }
 0x7ab   : > { %5234 = vmatpush3.bf16.xpose.msra.mxu1 %v8369_v37 }
 0x7ac   : > { %5235 = vmatprep.subr.bf16.mxu1 %v8370_v20 }
 0x7b3   : > { %5236 = vmatpush3.bf16.xpose.msra.mxu1 %v8371_v13 }
 0x7b4   : > { %5237 = vmatprep.subr.bf16.mxu1 %v8372_v52 }
 0x7bb   : > { %5238 = vmatpush3.bf16.xpose.msra.mxu1 %v8375_v14 }
 0x855   : > { %v4668_v40 = vpop.f32.mrb[80].mxu1 }
 0x856   : > { %v4669_v47 = vadd.f32 %v4668_v40, %v4547_v25  ;;  %v4670_v6 = vpop.f32.mrb[81].mxu1 }
 0x857   : > { %v4671_v23 = vadd.f32 %v4670_v6, %v4551_v21  ;;  %v4672_v29 = vpop.f32.mrb[82].mxu1 }
 0x858   : > { %v4675_v19 = vpack.c.bf16 %v4669_v47, %v4669_v47  ;;  %v4673_v36 = vpop.f32.mrb[83].mxu1 }
 0x859   : > { %v4676_v4 = vpack.c.bf16 %v4671_v23, %v4671_v23 }
 0x85a   : > { %5221 = vmatprep.mubr.bf16.mxu0 %v4675_v19 }
 0x85b   : > { %5222 = vmatmul.mubr.bf16.vlgmr.msra.gmra.mrb[132].mxu0 %v4675_v19  ;;  %5239 = vmatprep.mubr.bf16.mxu1 %v4676_v4 }
 0x85c   : > { %5240 = vmatmul.mubr.bf16.vlgmr.msra.gmra.mrb[84].mxu1 %v4676_v4 }
 0x92e   : > { %v4713_v54 = vpop.f32.mrb[132].mxu0 }
 0x92f   : > { %v4714_v57 = vadd.f32 %v4713_v54, %v4678_v34  ;;  %v4715_v56 = vpop.f32.mrb[133].mxu0  ;;  %v4768_v8 = vpop.f32.mrb[84].mxu1  ;;  %4794 = sbr.rel (!%p6222_p9) target bundleno = 2366 (0x93e), region = 112 }
 0x930   : > { %v4716_v33 = vadd.f32 %v4715_v56, %v4678_v34  ;;  %v4769_v24 = vadd.f32 %v4768_v8, %v4733_v45  ;;  %v4717_v27 = vpop.f32.mrb[134].mxu0  ;;  %v4770_v60 = vpop.f32.mrb[85].mxu1 }
 0x931   : > { %v4771_v58 = vadd.f32 %v4770_v60, %v4733_v45  ;;  %v4718_v2 = vpop.f32.mrb[135].mxu0  ;;  %v4772_v53 = vpop.f32.mrb[86].mxu1 }
 0x932   : > { %v4722_v1 = vcombine.low %v4714_v57, %v4716_v33  ;;  %v4773_v43 = vpop.f32.mrb[87].mxu1 }
 0x933   : > { %v4777_v17 = vcombine.low %v4769_v24, %v4771_v58 }
 0x934   : > { %5035 = vst.sshfl [vmem:[%s680_s25] sm:$0x33 pattern:$0x76325410] %v4722_v1 }
 0x935   : > { %5043 = vst.sshfl [vmem:[%s680_s25 + $0x4] sm:$0x33 pattern:$0x76325410] %v4777_v17 }
 0x93b   : > { %v4813_v3 = vld [vmem:[%s680_s25] sm:$0xf] }
 0x93c   : > { %v4815_v28 = vld [vmem:[%s680_s25 + $0x4] sm:$0xf]  ;;  %4814 = vst [vmem:[%s4797_s2] sm:$0xf] %v4813_v3 }
 0x93d   : > { %4816 = vst [vmem:[%s4797_s2 + $0x8] sm:$0xf] %v4815_v28 }
 0x93e PF: > { %p36_p13 = scmp.ge.s32.totalorder %s6212_s6, 4   ;;  %s8379_s1 = smov %s6062_s26 }
 0x93f   : > { %s8380_s26 = smov %s6220_s28  ;;  %s8381_s2 = smov %s6212_s6 }
 0x940   :  { %38 = sbr.rel (!%p36_p13) target bundleno = 25 (0x19), region = 180 }

</bundles_post_ra>
